<compile_context>
chip_gen: v5e
topology: v5e:2x2
jax: 0.10.0
libtpu: 0.0.40
codegen_flags: <defaults>
</compile_context>

<pallas_src>
import jax
import jax.numpy as jnp
from jax.experimental import pallas as pl
from jax.experimental.pallas import tpu as pltpu


# ---------------------------------------------------------------------------
# In-kernel helpers (all tiles are feature-major: (features, batch_tile))
# ---------------------------------------------------------------------------
def _reduce_sublanes(t, op):
    """Reduce (F, Bt) over its sublane (feature) axis -> (1, Bt).

    Whole 8-sublane vreg rows are combined with plain VALU ops; the final 8->1 step is a
    3-step rotate-combine tree on the XLU (pltpu.roll along sublanes).
    """
    f = t.shape[0]
    if f >= 8:
        acc = t[0:8, :]
        for g in range(1, f // 8):                   # static unroll; aligned 8-row slices
            acc = op(acc, t[8 * g:8 * g + 8, :])
        acc = op(acc, pltpu.roll(acc, shift=4, axis=0))
        acc = op(acc, pltpu.roll(acc, shift=2, axis=0))
        acc = op(acc, pltpu.roll(acc, shift=1, axis=0))
        row = acc[0:1, :]
        start = (f // 8) * 8
    else:
        row = t[0:1, :]
        start = 1
    for r in range(start, f):                        # leftover (F % 8) rows, if any
        row = op(row, t[r:r + 1, :])
    return row


def _binarize_fm(blocks, t_col, n_thresholds, min_val, max_val):
    """blocks: list of (F_b, Bt); t_col: (n*D, 1) threshold column (threshold-major).
    out[k*D + j, b] = sigmoid(clip(x[j, b]) - T[k, j])."""
    x = blocks[0] if len(blocks) == 1 else jnp.concatenate(blocks, axis=0)
    if min_val is not None:
        x = jnp.maximum(x, jnp.float32(min_val))
    if max_val is not None:
        x = jnp.minimum(x, jnp.float32(max_val))
    x_rep = jnp.concatenate([x] * n_thresholds, axis=0) if n_thresholds > 1 else x
    z = x_rep - t_col                                # (n*D, 1) broadcast along lanes
    # sigmoid via tanh identity: one EUP transcendental per element (no exp + divide).
    return 0.5 * jnp.tanh(0.5 * z) + 0.5


def _union_fm(blocks, wc_cols, wd_cols):
    """blocks: list of (F_b, Bt); wc_cols/wd_cols: per-block (F_b, n_c)/(F_b, n_d) weight
    slices (sigmoid applied in the wrapper).  Returns (n_c + n_d, Bt):
      conj_i = prod_j (1 - wc_ij * (1 - x_j));  disj_i = 1 - prod_j (1 - wd_ij * x_j)
    Direct product on full 128-lane tiles; reduction via _reduce_sublanes."""
    n_c = wc_cols[0].shape[1]
    n_d = wd_cols[0].shape[1]
    one_minus = [1.0 - xb for xb in blocks]
    rows = []
    for i in range(n_c):                             # static unroll; n_c is small here
        p = None
        for xm, wcb in zip(one_minus, wc_cols):
            pp = _reduce_sublanes(1.0 - wcb[:, i:i + 1] * xm, jnp.multiply)
            p = pp if p is None else p * pp
        rows.append(p)
    for i in range(n_d):
        p = None
        for xb, wdb in zip(blocks, wd_cols):
            pp = _reduce_sublanes(1.0 - wdb[:, i:i + 1] * xb, jnp.multiply)
            p = pp if p is None else p * pp
        rows.append(1.0 - p)
    return jnp.concatenate(rows, axis=0)


def _linear_fm(blocks, w_cols, b_col):
    """y[i, b] = sum_j W[j, i] * x[j, b] + b[i].  Broadcast multiply-adds + sublane sum
    (skips the MXU; the (out_dim, Bt) result stays lane-dense).  Skip-connection blocks
    use pre-split weight slices, so no in-kernel concat of the inputs."""
    n_out = b_col.shape[0]
    rows = []
    for i in range(n_out):                           # static unroll; out_dim is small
        s = None
        for xb, wb in zip(blocks, w_cols):
            part = _reduce_sublanes(wb[:, i:i + 1] * xb, jnp.add)
            s = part if s is None else s + part
        rows.append(s)
    return jnp.concatenate(rows, axis=0) + b_col     # (n_out, 1) bias broadcast on lanes


def _make_fused_kernel(layers, left, right):
    """Builds the single fused kernel body for the given (static) layer structure."""

    def kernel(x_ref, *refs):
        out_ref = refs[-1]
        w_refs = refs[:-1]
        blocks = [x_ref[...]]                        # feature-major (F, Bt) block list
        x_res = {}
        ri = 0
        for idx, layer in enumerate(layers):
            if layer["skip_from"] is not None:
                blocks = blocks + [x_res.pop(layer["skip_from"])]
            nb = len(blocks)
            if layer["type"] == "binarizer":
                out = _binarize_fm(blocks, w_refs[ri][...], layer["n"], left, right)
                ri += 1
            elif layer["type"] == "union":
                wc_cols = [w_refs[ri + k][...] for k in range(nb)]
                wd_cols = [w_refs[ri + nb + k][...] for k in range(nb)]
                ri += 2 * nb
                out = _union_fm(blocks, wc_cols, wd_cols)
            else:  # linear
                w_cols = [w_refs[ri + k][...] for k in range(nb)]
                b_col = w_refs[ri + nb][...]
                ri += nb + 1
                out = _linear_fm(blocks, w_cols, b_col)
            if layer["is_skip_to"]:
                x_res[idx] = out
            blocks = [out]
        out_ref[...] = blocks[0].astype(out_ref.dtype)

    return kernel


# ---------------------------------------------------------------------------
# Net: mirrors the PyTorch layer construction + skip-connection forward
# ---------------------------------------------------------------------------
class PallasNet:
    def __init__(self, dim_list, key, left=None, right=None, use_skip=True, temperature=0.01):
        self.dim_list = dim_list
        self.left = left
        self.right = right
        self.use_skip = use_skip
        self.t = jnp.log(jnp.array([temperature], jnp.float32))  # unused in forward (as in ref)
        self.layers = []

        prev_dim = dim_list[0]
        for i in range(1, len(dim_list)):
            in_widths = [prev_dim]
            skip_from = None
            if self.use_skip and i >= 4:
                skip_from = len(self.layers) - 2          # layer_list[-2] at construction time
                in_widths.append(self.layers[skip_from]["output_dim"])
            num = sum(in_widths)

            n = dim_list[i]
            key, k1, k2 = jax.random.split(key, 3)
            if i == 1:
                layer = {"type": "binarizer", "n": n, "in_dim": num,
                         "T": jax.random.normal(k1, (n, num), jnp.float32),
                         "output_dim": n * num}
            elif i == len(dim_list) - 1:
                layer = {"type": "linear", "n": n, "in_dim": num,
                         "W": 0.1 * jax.random.normal(k1, (num, n), jnp.float32),
                         "b": 0.1 * jax.random.normal(k2, (1, n), jnp.float32),
                         "output_dim": n}
            else:
                n_c, n_d = n // 2, n - n // 2
                layer = {"type": "union", "n": n, "in_dim": num,
                         "Wc": jax.random.normal(k1, (n_c, num), jnp.float32),
                         "Wd": jax.random.normal(k2, (n_d, num), jnp.float32),
                         "output_dim": n}
            layer["skip_from"] = skip_from
            layer["is_skip_to"] = False
            layer["in_widths"] = in_widths
            if skip_from is not None:
                self.layers[skip_from]["is_skip_to"] = True
            prev_dim = layer["output_dim"]
            self.layers.append(layer)
        self.out_dim = prev_dim

    # --- batch-invariant weight preprocessing (hoisted out of the kernel) ---
    def _prepared_weights(self):
        ws = []
        for layer in self.layers:
            widths = layer["in_widths"]
            offs, o = [], 0
            for fw in widths:
                offs.append(o)
                o += fw
            if layer["type"] == "binarizer":
                n, d = layer["T"].shape
                ws.append(layer["T"].reshape(n * d, 1))                  # (n*D, 1), threshold-major
            elif layer["type"] == "union":
                wct = jnp.transpose(jax.nn.sigmoid(layer["Wc"]))         # (F_total, n_c)
                wdt = jnp.transpose(jax.nn.sigmoid(layer["Wd"]))         # (F_total, n_d)
                for o_, f_ in zip(offs, widths):
                    ws.append(wct[o_:o_ + f_, :])
                for o_, f_ in zip(offs, widths):
                    ws.append(wdt[o_:o_ + f_, :])
            else:  # linear: split W per input block (current / skip), bias as a column
                for o_, f_ in zip(offs, widths):
                    ws.append(layer["W"][o_:o_ + f_, :])                 # (F_b, n_out)
                ws.append(layer["b"].reshape(-1, 1))                     # (n_out, 1)
        return ws

    @staticmethod
    def _pick_block_batch(b, max_rows=2048):
        """Largest 128-multiple divisor of b (<= max_rows), preferring an even grid (v7x 2 TCs)."""
        if b % 128 != 0:
            return b                      # single full-extent tile (block dim == array dim)
        cands = [m for m in range(128, min(b, max_rows) + 1, 128) if b % m == 0]
        if not cands:
            return b
        even = [m for m in cands if (b // m) % 2 == 0]
        return max(even) if even else max(cands)

    def _vmem_limit_bytes(self, block_batch, d_in, ws):
        """Size the scoped-VMEM limit from actual buffer sizes (not a hard-coded constant)."""
        f32 = 4
        io = 2 * (d_in + self.out_dim) * block_batch * f32                  # double-buffered x/out tiles
        wbytes = 2 * sum(int(w.size) * f32 for w in ws)                     # double-buffered resident weights
        act = 3 * sum(l["output_dim"] for l in self.layers) * block_batch * f32  # live values / spill slack
        need = io + wbytes + act + (4 << 20)
        return int(min(64 << 20, max(need, 8 << 20)))

    def forward(self, x, block_batch=None):
        b, d_in = x.shape
        assert d_in == self.dim_list[0]
        if block_batch is None:
            block_batch = self._pick_block_batch(b)
        assert b % block_batch == 0, (b, block_batch)
        grid = (b // block_batch,)

        ws = self._prepared_weights()
        kernel = _make_fused_kernel(self.layers, self.left, self.right)

        # Feature-major layout: batch rides the 128-wide lane axis (layout plumbing only).
        x_t = jnp.transpose(x)                                   # (d_in, b)

        in_specs = [pl.BlockSpec((d_in, block_batch), lambda i: (0, i))]
        for w in ws:
            # Grid-invariant full blocks -> weights DMA'd once and stay VMEM-resident.
            # TODO(synk): at production RRL widths (tens-of-MB weights) single-buffer these
            #             (pl.Buffered(1)) or stream the feature axis so the double-buffered
            #             copies fit v7x's 64 MiB VMEM.
            in_specs.append(pl.BlockSpec(w.shape, lambda i: (0, 0)))
        out_specs = pl.BlockSpec((self.out_dim, block_batch), lambda i: (0, i))

        out_t = pl.pallas_call(
            kernel,
            out_shape=jax.ShapeDtypeStruct((self.out_dim, b), jnp.float32),
            grid=grid,
            in_specs=in_specs,
            out_specs=out_specs,
            compiler_params=pltpu.CompilerParams(
                dimension_semantics=("parallel",),               # batch tiles split across v7x TCs
                vmem_limit_bytes=self._vmem_limit_bytes(block_batch, d_in, ws),
            ),
        )(x_t, *ws)
        return jnp.transpose(out_t)                              # (b, out_dim)


# ---------------------------------------------------------------------------
# Pure-JAX reference (same math, un-fused, batch-major) for a correctness gate
# ---------------------------------------------------------------------------
def reference_forward(net, x):
    xr = x
    x_res = {}
    for idx, layer in enumerate(net.layers):
        if layer["skip_from"] is not None:
            xr = jnp.concatenate([xr, x_res.pop(layer["skip_from"])], axis=1)
        if layer["type"] == "binarizer":
            xc = xr
            if net.left is not None:
                xc = jnp.maximum(xc, jnp.float32(net.left))
            if net.right is not None:
                xc = jnp.minimum(xc, jnp.float32(net.right))
            t = layer["T"]
            y = jax.nn.sigmoid(xc[:, None, :] - t[None, :, :])
            xr = y.reshape(xr.shape[0], -1)
        elif layer["type"] == "union":
            wc = jax.nn.sigmoid(layer["Wc"])
            wd = jax.nn.sigmoid(layer["Wd"])
            conj = jnp.prod(1.0 - wc[None, :, :] * (1.0 - xr[:, None, :]), axis=-1)
            disj = 1.0 - jnp.prod(1.0 - wd[None, :, :] * xr[:, None, :], axis=-1)
            xr = jnp.concatenate([conj, disj], axis=1)
        else:
            xr = jnp.dot(xr, layer["W"], precision=jax.lax.Precision.HIGHEST) + layer["b"]
        if layer["is_skip_to"]:
            x_res[idx] = xr
    return xr


# ---------------------------------------------------------------------------
if __name__ == "__main__":
    key = jax.random.PRNGKey(0)
    key, xk = jax.random.split(key)

    # dim_list = [in_features, binarizer_bins, union2_width, union3_width, out_dim]
    dim_list = [8, 2, 16, 16, 4]
    batch = 512  # -> 2 pipelined 256-lane batch tiles (even grid: both v7x TCs busy)

    net = PallasNet(dim_list, key, left=-3.0, right=3.0, use_skip=True, temperature=0.01)
    x = jax.random.normal(xk, (batch, dim_list[0]), jnp.float32)

    out = jax.block_until_ready(net.forward(x))
    assert out.shape == (batch, dim_list[-1]), out.shape
    assert bool(jnp.all(jnp.isfinite(out)))

    ref = jax.block_until_ready(reference_forward(net, x))
    max_err = float(jnp.max(jnp.abs(out - ref)))
    assert bool(jnp.allclose(out, ref, rtol=2e-2, atol=2e-2)), max_err

    print("KERNEL_OK")
</pallas_src>

<mosaic_0001>
module attributes {stable_mosaic.version = 11 : i64} {
  func.func @kernel(%arg0: i32, %arg1: memref<8x256xf32, #tpu.memory_space<vmem>>, %arg2: memref<16x1xf32, #tpu.memory_space<vmem>>, %arg3: memref<16x8xf32, #tpu.memory_space<vmem>>, %arg4: memref<16x8xf32, #tpu.memory_space<vmem>>, %arg5: memref<16x8xf32, #tpu.memory_space<vmem>>, %arg6: memref<16x8xf32, #tpu.memory_space<vmem>>, %arg7: memref<16x4xf32, #tpu.memory_space<vmem>>, %arg8: memref<16x4xf32, #tpu.memory_space<vmem>>, %arg9: memref<4x1xf32, #tpu.memory_space<vmem>>, %arg10: memref<4x256xf32, #tpu.memory_space<vmem>>) attributes {dimension_semantics = [#tpu.dimension_semantics<parallel>], iteration_bounds = array<i64: 2>, scalar_prefetch = 0 : i64, scratch_operands = 0 : i64, tpu.core_type = #tpu.core_type<tc>, window_params = [{transform_indices = @transform_0, window_bounds = array<i64: 8, 256>}, {pipeline_mode = #tpu.pipeline_mode<synchronous>, transform_indices = @transform_1, window_bounds = array<i64: 16, 1>}, {pipeline_mode = #tpu.pipeline_mode<synchronous>, transform_indices = @transform_2, window_bounds = array<i64: 16, 8>}, {pipeline_mode = #tpu.pipeline_mode<synchronous>, transform_indices = @transform_3, window_bounds = array<i64: 16, 8>}, {pipeline_mode = #tpu.pipeline_mode<synchronous>, transform_indices = @transform_4, window_bounds = array<i64: 16, 8>}, {pipeline_mode = #tpu.pipeline_mode<synchronous>, transform_indices = @transform_5, window_bounds = array<i64: 16, 8>}, {pipeline_mode = #tpu.pipeline_mode<synchronous>, transform_indices = @transform_6, window_bounds = array<i64: 16, 4>}, {pipeline_mode = #tpu.pipeline_mode<synchronous>, transform_indices = @transform_7, window_bounds = array<i64: 16, 4>}, {pipeline_mode = #tpu.pipeline_mode<synchronous>, transform_indices = @transform_8, window_bounds = array<i64: 4, 1>}, {transform_indices = @transform_9, window_bounds = array<i64: 4, 256>}]} {
    %c0 = arith.constant 0 : index
    %c0_0 = arith.constant 0 : index
    %0 = vector.load %arg1[%c0, %c0_0] : memref<8x256xf32, #tpu.memory_space<vmem>>, vector<8x256xf32>
    %c0_1 = arith.constant 0 : index
    %c0_2 = arith.constant 0 : index
    %1 = vector.load %arg2[%c0_1, %c0_2] : memref<16x1xf32, #tpu.memory_space<vmem>>, vector<16x1xf32>
    %cst = arith.constant -3.000000e+00 : f32
    %2 = vector.broadcast %cst : f32 to vector<8x256xf32>
    %3 = arith.maximumf %0, %2 : vector<8x256xf32>
    %cst_3 = arith.constant 3.000000e+00 : f32
    %4 = vector.broadcast %cst_3 : f32 to vector<8x256xf32>
    %5 = arith.minimumf %3, %4 : vector<8x256xf32>
    %6 = tpu.concatenate %5, %5 in 0 : vector<8x256xf32>, vector<8x256xf32> -> vector<16x256xf32>
    %7 = vector.broadcast %1 : vector<16x1xf32> to vector<16x256xf32>
    %8 = arith.subf %6, %7 : vector<16x256xf32>
    %cst_4 = arith.constant 5.000000e-01 : f32
    %9 = vector.broadcast %cst_4 : f32 to vector<16x256xf32>
    %10 = arith.mulf %9, %8 : vector<16x256xf32>
    %11 = math.tanh %10 : vector<16x256xf32>
    %cst_5 = arith.constant 5.000000e-01 : f32
    %12 = vector.broadcast %cst_5 : f32 to vector<16x256xf32>
    %13 = arith.mulf %12, %11 : vector<16x256xf32>
    %cst_6 = arith.constant 5.000000e-01 : f32
    %14 = vector.broadcast %cst_6 : f32 to vector<16x256xf32>
    %15 = arith.addf %13, %14 : vector<16x256xf32>
    %c0_7 = arith.constant 0 : index
    %c0_8 = arith.constant 0 : index
    %16 = vector.load %arg3[%c0_7, %c0_8] : memref<16x8xf32, #tpu.memory_space<vmem>>, vector<16x8xf32>
    %c0_9 = arith.constant 0 : index
    %c0_10 = arith.constant 0 : index
    %17 = vector.load %arg4[%c0_9, %c0_10] : memref<16x8xf32, #tpu.memory_space<vmem>>, vector<16x8xf32>
    %cst_11 = arith.constant 1.000000e+00 : f32
    %18 = vector.broadcast %cst_11 : f32 to vector<16x256xf32>
    %19 = arith.subf %18, %15 : vector<16x256xf32>
    %20 = vector.extract_strided_slice %16 {offsets = [0, 0], sizes = [16, 1], strides = [1, 1]} : vector<16x8xf32> to vector<16x1xf32>
    %21 = vector.broadcast %20 : vector<16x1xf32> to vector<16x256xf32>
    %22 = arith.mulf %21, %19 : vector<16x256xf32>
    %cst_12 = arith.constant 1.000000e+00 : f32
    %23 = vector.broadcast %cst_12 : f32 to vector<16x256xf32>
    %24 = arith.subf %23, %22 : vector<16x256xf32>
    %25 = vector.extract_strided_slice %24 {offsets = [0, 0], sizes = [8, 256], strides = [1, 1]} : vector<16x256xf32> to vector<8x256xf32>
    %26 = vector.extract_strided_slice %24 {offsets = [8, 0], sizes = [8, 256], strides = [1, 1]} : vector<16x256xf32> to vector<8x256xf32>
    %27 = arith.mulf %25, %26 : vector<8x256xf32>
    %c4_i32 = arith.constant 4 : i32
    %28 = tpu.dynamic_rotate %27 by %c4_i32 dim 0 : vector<8x256xf32>, i32 -> vector<8x256xf32>
    %29 = arith.mulf %27, %28 : vector<8x256xf32>
    %c2_i32 = arith.constant 2 : i32
    %30 = tpu.dynamic_rotate %29 by %c2_i32 dim 0 : vector<8x256xf32>, i32 -> vector<8x256xf32>
    %31 = arith.mulf %29, %30 : vector<8x256xf32>
    %c1_i32 = arith.constant 1 : i32
    %32 = tpu.dynamic_rotate %31 by %c1_i32 dim 0 : vector<8x256xf32>, i32 -> vector<8x256xf32>
    %33 = arith.mulf %31, %32 : vector<8x256xf32>
    %34 = vector.extract_strided_slice %33 {offsets = [0, 0], sizes = [1, 256], strides = [1, 1]} : vector<8x256xf32> to vector<1x256xf32>
    %35 = vector.extract_strided_slice %16 {offsets = [0, 1], sizes = [16, 1], strides = [1, 1]} : vector<16x8xf32> to vector<16x1xf32>
    %36 = vector.broadcast %35 : vector<16x1xf32> to vector<16x256xf32>
    %37 = arith.mulf %36, %19 : vector<16x256xf32>
    %cst_13 = arith.constant 1.000000e+00 : f32
    %38 = vector.broadcast %cst_13 : f32 to vector<16x256xf32>
    %39 = arith.subf %38, %37 : vector<16x256xf32>
    %40 = vector.extract_strided_slice %39 {offsets = [0, 0], sizes = [8, 256], strides = [1, 1]} : vector<16x256xf32> to vector<8x256xf32>
    %41 = vector.extract_strided_slice %39 {offsets = [8, 0], sizes = [8, 256], strides = [1, 1]} : vector<16x256xf32> to vector<8x256xf32>
    %42 = arith.mulf %40, %41 : vector<8x256xf32>
    %c4_i32_14 = arith.constant 4 : i32
    %43 = tpu.dynamic_rotate %42 by %c4_i32_14 dim 0 : vector<8x256xf32>, i32 -> vector<8x256xf32>
    %44 = arith.mulf %42, %43 : vector<8x256xf32>
    %c2_i32_15 = arith.constant 2 : i32
    %45 = tpu.dynamic_rotate %44 by %c2_i32_15 dim 0 : vector<8x256xf32>, i32 -> vector<8x256xf32>
    %46 = arith.mulf %44, %45 : vector<8x256xf32>
    %c1_i32_16 = arith.constant 1 : i32
    %47 = tpu.dynamic_rotate %46 by %c1_i32_16 dim 0 : vector<8x256xf32>, i32 -> vector<8x256xf32>
    %48 = arith.mulf %46, %47 : vector<8x256xf32>
    %49 = vector.extract_strided_slice %48 {offsets = [0, 0], sizes = [1, 256], strides = [1, 1]} : vector<8x256xf32> to vector<1x256xf32>
    %50 = vector.extract_strided_slice %16 {offsets = [0, 2], sizes = [16, 1], strides = [1, 1]} : vector<16x8xf32> to vector<16x1xf32>
    %51 = vector.broadcast %50 : vector<16x1xf32> to vector<16x256xf32>
    %52 = arith.mulf %51, %19 : vector<16x256xf32>
    %cst_17 = arith.constant 1.000000e+00 : f32
    %53 = vector.broadcast %cst_17 : f32 to vector<16x256xf32>
    %54 = arith.subf %53, %52 : vector<16x256xf32>
    %55 = vector.extract_strided_slice %54 {offsets = [0, 0], sizes = [8, 256], strides = [1, 1]} : vector<16x256xf32> to vector<8x256xf32>
    %56 = vector.extract_strided_slice %54 {offsets = [8, 0], sizes = [8, 256], strides = [1, 1]} : vector<16x256xf32> to vector<8x256xf32>
    %57 = arith.mulf %55, %56 : vector<8x256xf32>
    %c4_i32_18 = arith.constant 4 : i32
    %58 = tpu.dynamic_rotate %57 by %c4_i32_18 dim 0 : vector<8x256xf32>, i32 -> vector<8x256xf32>
    %59 = arith.mulf %57, %58 : vector<8x256xf32>
    %c2_i32_19 = arith.constant 2 : i32
    %60 = tpu.dynamic_rotate %59 by %c2_i32_19 dim 0 : vector<8x256xf32>, i32 -> vector<8x256xf32>
    %61 = arith.mulf %59, %60 : vector<8x256xf32>
    %c1_i32_20 = arith.constant 1 : i32
    %62 = tpu.dynamic_rotate %61 by %c1_i32_20 dim 0 : vector<8x256xf32>, i32 -> vector<8x256xf32>
    %63 = arith.mulf %61, %62 : vector<8x256xf32>
    %64 = vector.extract_strided_slice %63 {offsets = [0, 0], sizes = [1, 256], strides = [1, 1]} : vector<8x256xf32> to vector<1x256xf32>
    %65 = vector.extract_strided_slice %16 {offsets = [0, 3], sizes = [16, 1], strides = [1, 1]} : vector<16x8xf32> to vector<16x1xf32>
    %66 = vector.broadcast %65 : vector<16x1xf32> to vector<16x256xf32>
    %67 = arith.mulf %66, %19 : vector<16x256xf32>
    %cst_21 = arith.constant 1.000000e+00 : f32
    %68 = vector.broadcast %cst_21 : f32 to vector<16x256xf32>
    %69 = arith.subf %68, %67 : vector<16x256xf32>
    %70 = vector.extract_strided_slice %69 {offsets = [0, 0], sizes = [8, 256], strides = [1, 1]} : vector<16x256xf32> to vector<8x256xf32>
    %71 = vector.extract_strided_slice %69 {offsets = [8, 0], sizes = [8, 256], strides = [1, 1]} : vector<16x256xf32> to vector<8x256xf32>
    %72 = arith.mulf %70, %71 : vector<8x256xf32>
    %c4_i32_22 = arith.constant 4 : i32
    %73 = tpu.dynamic_rotate %72 by %c4_i32_22 dim 0 : vector<8x256xf32>, i32 -> vector<8x256xf32>
    %74 = arith.mulf %72, %73 : vector<8x256xf32>
    %c2_i32_23 = arith.constant 2 : i32
    %75 = tpu.dynamic_rotate %74 by %c2_i32_23 dim 0 : vector<8x256xf32>, i32 -> vector<8x256xf32>
    %76 = arith.mulf %74, %75 : vector<8x256xf32>
    %c1_i32_24 = arith.constant 1 : i32
    %77 = tpu.dynamic_rotate %76 by %c1_i32_24 dim 0 : vector<8x256xf32>, i32 -> vector<8x256xf32>
    %78 = arith.mulf %76, %77 : vector<8x256xf32>
    %79 = vector.extract_strided_slice %78 {offsets = [0, 0], sizes = [1, 256], strides = [1, 1]} : vector<8x256xf32> to vector<1x256xf32>
    %80 = vector.extract_strided_slice %16 {offsets = [0, 4], sizes = [16, 1], strides = [1, 1]} : vector<16x8xf32> to vector<16x1xf32>
    %81 = vector.broadcast %80 : vector<16x1xf32> to vector<16x256xf32>
    %82 = arith.mulf %81, %19 : vector<16x256xf32>
    %cst_25 = arith.constant 1.000000e+00 : f32
    %83 = vector.broadcast %cst_25 : f32 to vector<16x256xf32>
    %84 = arith.subf %83, %82 : vector<16x256xf32>
    %85 = vector.extract_strided_slice %84 {offsets = [0, 0], sizes = [8, 256], strides = [1, 1]} : vector<16x256xf32> to vector<8x256xf32>
    %86 = vector.extract_strided_slice %84 {offsets = [8, 0], sizes = [8, 256], strides = [1, 1]} : vector<16x256xf32> to vector<8x256xf32>
    %87 = arith.mulf %85, %86 : vector<8x256xf32>
    %c4_i32_26 = arith.constant 4 : i32
    %88 = tpu.dynamic_rotate %87 by %c4_i32_26 dim 0 : vector<8x256xf32>, i32 -> vector<8x256xf32>
    %89 = arith.mulf %87, %88 : vector<8x256xf32>
    %c2_i32_27 = arith.constant 2 : i32
    %90 = tpu.dynamic_rotate %89 by %c2_i32_27 dim 0 : vector<8x256xf32>, i32 -> vector<8x256xf32>
    %91 = arith.mulf %89, %90 : vector<8x256xf32>
    %c1_i32_28 = arith.constant 1 : i32
    %92 = tpu.dynamic_rotate %91 by %c1_i32_28 dim 0 : vector<8x256xf32>, i32 -> vector<8x256xf32>
    %93 = arith.mulf %91, %92 : vector<8x256xf32>
    %94 = vector.extract_strided_slice %93 {offsets = [0, 0], sizes = [1, 256], strides = [1, 1]} : vector<8x256xf32> to vector<1x256xf32>
    %95 = vector.extract_strided_slice %16 {offsets = [0, 5], sizes = [16, 1], strides = [1, 1]} : vector<16x8xf32> to vector<16x1xf32>
    %96 = vector.broadcast %95 : vector<16x1xf32> to vector<16x256xf32>
    %97 = arith.mulf %96, %19 : vector<16x256xf32>
    %cst_29 = arith.constant 1.000000e+00 : f32
    %98 = vector.broadcast %cst_29 : f32 to vector<16x256xf32>
    %99 = arith.subf %98, %97 : vector<16x256xf32>
    %100 = vector.extract_strided_slice %99 {offsets = [0, 0], sizes = [8, 256], strides = [1, 1]} : vector<16x256xf32> to vector<8x256xf32>
    %101 = vector.extract_strided_slice %99 {offsets = [8, 0], sizes = [8, 256], strides = [1, 1]} : vector<16x256xf32> to vector<8x256xf32>
    %102 = arith.mulf %100, %101 : vector<8x256xf32>
    %c4_i32_30 = arith.constant 4 : i32
    %103 = tpu.dynamic_rotate %102 by %c4_i32_30 dim 0 : vector<8x256xf32>, i32 -> vector<8x256xf32>
    %104 = arith.mulf %102, %103 : vector<8x256xf32>
    %c2_i32_31 = arith.constant 2 : i32
    %105 = tpu.dynamic_rotate %104 by %c2_i32_31 dim 0 : vector<8x256xf32>, i32 -> vector<8x256xf32>
    %106 = arith.mulf %104, %105 : vector<8x256xf32>
    %c1_i32_32 = arith.constant 1 : i32
    %107 = tpu.dynamic_rotate %106 by %c1_i32_32 dim 0 : vector<8x256xf32>, i32 -> vector<8x256xf32>
    %108 = arith.mulf %106, %107 : vector<8x256xf32>
    %109 = vector.extract_strided_slice %108 {offsets = [0, 0], sizes = [1, 256], strides = [1, 1]} : vector<8x256xf32> to vector<1x256xf32>
    %110 = vector.extract_strided_slice %16 {offsets = [0, 6], sizes = [16, 1], strides = [1, 1]} : vector<16x8xf32> to vector<16x1xf32>
    %111 = vector.broadcast %110 : vector<16x1xf32> to vector<16x256xf32>
    %112 = arith.mulf %111, %19 : vector<16x256xf32>
    %cst_33 = arith.constant 1.000000e+00 : f32
    %113 = vector.broadcast %cst_33 : f32 to vector<16x256xf32>
    %114 = arith.subf %113, %112 : vector<16x256xf32>
    %115 = vector.extract_strided_slice %114 {offsets = [0, 0], sizes = [8, 256], strides = [1, 1]} : vector<16x256xf32> to vector<8x256xf32>
    %116 = vector.extract_strided_slice %114 {offsets = [8, 0], sizes = [8, 256], strides = [1, 1]} : vector<16x256xf32> to vector<8x256xf32>
    %117 = arith.mulf %115, %116 : vector<8x256xf32>
    %c4_i32_34 = arith.constant 4 : i32
    %118 = tpu.dynamic_rotate %117 by %c4_i32_34 dim 0 : vector<8x256xf32>, i32 -> vector<8x256xf32>
    %119 = arith.mulf %117, %118 : vector<8x256xf32>
    %c2_i32_35 = arith.constant 2 : i32
    %120 = tpu.dynamic_rotate %119 by %c2_i32_35 dim 0 : vector<8x256xf32>, i32 -> vector<8x256xf32>
    %121 = arith.mulf %119, %120 : vector<8x256xf32>
    %c1_i32_36 = arith.constant 1 : i32
    %122 = tpu.dynamic_rotate %121 by %c1_i32_36 dim 0 : vector<8x256xf32>, i32 -> vector<8x256xf32>
    %123 = arith.mulf %121, %122 : vector<8x256xf32>
    %124 = vector.extract_strided_slice %123 {offsets = [0, 0], sizes = [1, 256], strides = [1, 1]} : vector<8x256xf32> to vector<1x256xf32>
    %125 = vector.extract_strided_slice %16 {offsets = [0, 7], sizes = [16, 1], strides = [1, 1]} : vector<16x8xf32> to vector<16x1xf32>
    %126 = vector.broadcast %125 : vector<16x1xf32> to vector<16x256xf32>
    %127 = arith.mulf %126, %19 : vector<16x256xf32>
    %cst_37 = arith.constant 1.000000e+00 : f32
    %128 = vector.broadcast %cst_37 : f32 to vector<16x256xf32>
    %129 = arith.subf %128, %127 : vector<16x256xf32>
    %130 = vector.extract_strided_slice %129 {offsets = [0, 0], sizes = [8, 256], strides = [1, 1]} : vector<16x256xf32> to vector<8x256xf32>
    %131 = vector.extract_strided_slice %129 {offsets = [8, 0], sizes = [8, 256], strides = [1, 1]} : vector<16x256xf32> to vector<8x256xf32>
    %132 = arith.mulf %130, %131 : vector<8x256xf32>
    %c4_i32_38 = arith.constant 4 : i32
    %133 = tpu.dynamic_rotate %132 by %c4_i32_38 dim 0 : vector<8x256xf32>, i32 -> vector<8x256xf32>
    %134 = arith.mulf %132, %133 : vector<8x256xf32>
    %c2_i32_39 = arith.constant 2 : i32
    %135 = tpu.dynamic_rotate %134 by %c2_i32_39 dim 0 : vector<8x256xf32>, i32 -> vector<8x256xf32>
    %136 = arith.mulf %134, %135 : vector<8x256xf32>
    %c1_i32_40 = arith.constant 1 : i32
    %137 = tpu.dynamic_rotate %136 by %c1_i32_40 dim 0 : vector<8x256xf32>, i32 -> vector<8x256xf32>
    %138 = arith.mulf %136, %137 : vector<8x256xf32>
    %139 = vector.extract_strided_slice %138 {offsets = [0, 0], sizes = [1, 256], strides = [1, 1]} : vector<8x256xf32> to vector<1x256xf32>
    %140 = vector.extract_strided_slice %17 {offsets = [0, 0], sizes = [16, 1], strides = [1, 1]} : vector<16x8xf32> to vector<16x1xf32>
    %141 = vector.broadcast %140 : vector<16x1xf32> to vector<16x256xf32>
    %142 = arith.mulf %141, %15 : vector<16x256xf32>
    %cst_41 = arith.constant 1.000000e+00 : f32
    %143 = vector.broadcast %cst_41 : f32 to vector<16x256xf32>
    %144 = arith.subf %143, %142 : vector<16x256xf32>
    %145 = vector.extract_strided_slice %144 {offsets = [0, 0], sizes = [8, 256], strides = [1, 1]} : vector<16x256xf32> to vector<8x256xf32>
    %146 = vector.extract_strided_slice %144 {offsets = [8, 0], sizes = [8, 256], strides = [1, 1]} : vector<16x256xf32> to vector<8x256xf32>
    %147 = arith.mulf %145, %146 : vector<8x256xf32>
    %c4_i32_42 = arith.constant 4 : i32
    %148 = tpu.dynamic_rotate %147 by %c4_i32_42 dim 0 : vector<8x256xf32>, i32 -> vector<8x256xf32>
    %149 = arith.mulf %147, %148 : vector<8x256xf32>
    %c2_i32_43 = arith.constant 2 : i32
    %150 = tpu.dynamic_rotate %149 by %c2_i32_43 dim 0 : vector<8x256xf32>, i32 -> vector<8x256xf32>
    %151 = arith.mulf %149, %150 : vector<8x256xf32>
    %c1_i32_44 = arith.constant 1 : i32
    %152 = tpu.dynamic_rotate %151 by %c1_i32_44 dim 0 : vector<8x256xf32>, i32 -> vector<8x256xf32>
    %153 = arith.mulf %151, %152 : vector<8x256xf32>
    %154 = vector.extract_strided_slice %153 {offsets = [0, 0], sizes = [1, 256], strides = [1, 1]} : vector<8x256xf32> to vector<1x256xf32>
    %cst_45 = arith.constant 1.000000e+00 : f32
    %155 = vector.broadcast %cst_45 : f32 to vector<1x256xf32>
    %156 = arith.subf %155, %154 : vector<1x256xf32>
    %157 = vector.extract_strided_slice %17 {offsets = [0, 1], sizes = [16, 1], strides = [1, 1]} : vector<16x8xf32> to vector<16x1xf32>
    %158 = vector.broadcast %157 : vector<16x1xf32> to vector<16x256xf32>
    %159 = arith.mulf %158, %15 : vector<16x256xf32>
    %cst_46 = arith.constant 1.000000e+00 : f32
    %160 = vector.broadcast %cst_46 : f32 to vector<16x256xf32>
    %161 = arith.subf %160, %159 : vector<16x256xf32>
    %162 = vector.extract_strided_slice %161 {offsets = [0, 0], sizes = [8, 256], strides = [1, 1]} : vector<16x256xf32> to vector<8x256xf32>
    %163 = vector.extract_strided_slice %161 {offsets = [8, 0], sizes = [8, 256], strides = [1, 1]} : vector<16x256xf32> to vector<8x256xf32>
    %164 = arith.mulf %162, %163 : vector<8x256xf32>
    %c4_i32_47 = arith.constant 4 : i32
    %165 = tpu.dynamic_rotate %164 by %c4_i32_47 dim 0 : vector<8x256xf32>, i32 -> vector<8x256xf32>
    %166 = arith.mulf %164, %165 : vector<8x256xf32>
    %c2_i32_48 = arith.constant 2 : i32
    %167 = tpu.dynamic_rotate %166 by %c2_i32_48 dim 0 : vector<8x256xf32>, i32 -> vector<8x256xf32>
    %168 = arith.mulf %166, %167 : vector<8x256xf32>
    %c1_i32_49 = arith.constant 1 : i32
    %169 = tpu.dynamic_rotate %168 by %c1_i32_49 dim 0 : vector<8x256xf32>, i32 -> vector<8x256xf32>
    %170 = arith.mulf %168, %169 : vector<8x256xf32>
    %171 = vector.extract_strided_slice %170 {offsets = [0, 0], sizes = [1, 256], strides = [1, 1]} : vector<8x256xf32> to vector<1x256xf32>
    %cst_50 = arith.constant 1.000000e+00 : f32
    %172 = vector.broadcast %cst_50 : f32 to vector<1x256xf32>
    %173 = arith.subf %172, %171 : vector<1x256xf32>
    %174 = vector.extract_strided_slice %17 {offsets = [0, 2], sizes = [16, 1], strides = [1, 1]} : vector<16x8xf32> to vector<16x1xf32>
    %175 = vector.broadcast %174 : vector<16x1xf32> to vector<16x256xf32>
    %176 = arith.mulf %175, %15 : vector<16x256xf32>
    %cst_51 = arith.constant 1.000000e+00 : f32
    %177 = vector.broadcast %cst_51 : f32 to vector<16x256xf32>
    %178 = arith.subf %177, %176 : vector<16x256xf32>
    %179 = vector.extract_strided_slice %178 {offsets = [0, 0], sizes = [8, 256], strides = [1, 1]} : vector<16x256xf32> to vector<8x256xf32>
    %180 = vector.extract_strided_slice %178 {offsets = [8, 0], sizes = [8, 256], strides = [1, 1]} : vector<16x256xf32> to vector<8x256xf32>
    %181 = arith.mulf %179, %180 : vector<8x256xf32>
    %c4_i32_52 = arith.constant 4 : i32
    %182 = tpu.dynamic_rotate %181 by %c4_i32_52 dim 0 : vector<8x256xf32>, i32 -> vector<8x256xf32>
    %183 = arith.mulf %181, %182 : vector<8x256xf32>
    %c2_i32_53 = arith.constant 2 : i32
    %184 = tpu.dynamic_rotate %183 by %c2_i32_53 dim 0 : vector<8x256xf32>, i32 -> vector<8x256xf32>
    %185 = arith.mulf %183, %184 : vector<8x256xf32>
    %c1_i32_54 = arith.constant 1 : i32
    %186 = tpu.dynamic_rotate %185 by %c1_i32_54 dim 0 : vector<8x256xf32>, i32 -> vector<8x256xf32>
    %187 = arith.mulf %185, %186 : vector<8x256xf32>
    %188 = vector.extract_strided_slice %187 {offsets = [0, 0], sizes = [1, 256], strides = [1, 1]} : vector<8x256xf32> to vector<1x256xf32>
    %cst_55 = arith.constant 1.000000e+00 : f32
    %189 = vector.broadcast %cst_55 : f32 to vector<1x256xf32>
    %190 = arith.subf %189, %188 : vector<1x256xf32>
    %191 = vector.extract_strided_slice %17 {offsets = [0, 3], sizes = [16, 1], strides = [1, 1]} : vector<16x8xf32> to vector<16x1xf32>
    %192 = vector.broadcast %191 : vector<16x1xf32> to vector<16x256xf32>
    %193 = arith.mulf %192, %15 : vector<16x256xf32>
    %cst_56 = arith.constant 1.000000e+00 : f32
    %194 = vector.broadcast %cst_56 : f32 to vector<16x256xf32>
    %195 = arith.subf %194, %193 : vector<16x256xf32>
    %196 = vector.extract_strided_slice %195 {offsets = [0, 0], sizes = [8, 256], strides = [1, 1]} : vector<16x256xf32> to vector<8x256xf32>
    %197 = vector.extract_strided_slice %195 {offsets = [8, 0], sizes = [8, 256], strides = [1, 1]} : vector<16x256xf32> to vector<8x256xf32>
    %198 = arith.mulf %196, %197 : vector<8x256xf32>
    %c4_i32_57 = arith.constant 4 : i32
    %199 = tpu.dynamic_rotate %198 by %c4_i32_57 dim 0 : vector<8x256xf32>, i32 -> vector<8x256xf32>
    %200 = arith.mulf %198, %199 : vector<8x256xf32>
    %c2_i32_58 = arith.constant 2 : i32
    %201 = tpu.dynamic_rotate %200 by %c2_i32_58 dim 0 : vector<8x256xf32>, i32 -> vector<8x256xf32>
    %202 = arith.mulf %200, %201 : vector<8x256xf32>
    %c1_i32_59 = arith.constant 1 : i32
    %203 = tpu.dynamic_rotate %202 by %c1_i32_59 dim 0 : vector<8x256xf32>, i32 -> vector<8x256xf32>
    %204 = arith.mulf %202, %203 : vector<8x256xf32>
    %205 = vector.extract_strided_slice %204 {offsets = [0, 0], sizes = [1, 256], strides = [1, 1]} : vector<8x256xf32> to vector<1x256xf32>
    %cst_60 = arith.constant 1.000000e+00 : f32
    %206 = vector.broadcast %cst_60 : f32 to vector<1x256xf32>
    %207 = arith.subf %206, %205 : vector<1x256xf32>
    %208 = vector.extract_strided_slice %17 {offsets = [0, 4], sizes = [16, 1], strides = [1, 1]} : vector<16x8xf32> to vector<16x1xf32>
    %209 = vector.broadcast %208 : vector<16x1xf32> to vector<16x256xf32>
    %210 = arith.mulf %209, %15 : vector<16x256xf32>
    %cst_61 = arith.constant 1.000000e+00 : f32
    %211 = vector.broadcast %cst_61 : f32 to vector<16x256xf32>
    %212 = arith.subf %211, %210 : vector<16x256xf32>
    %213 = vector.extract_strided_slice %212 {offsets = [0, 0], sizes = [8, 256], strides = [1, 1]} : vector<16x256xf32> to vector<8x256xf32>
    %214 = vector.extract_strided_slice %212 {offsets = [8, 0], sizes = [8, 256], strides = [1, 1]} : vector<16x256xf32> to vector<8x256xf32>
    %215 = arith.mulf %213, %214 : vector<8x256xf32>
    %c4_i32_62 = arith.constant 4 : i32
    %216 = tpu.dynamic_rotate %215 by %c4_i32_62 dim 0 : vector<8x256xf32>, i32 -> vector<8x256xf32>
    %217 = arith.mulf %215, %216 : vector<8x256xf32>
    %c2_i32_63 = arith.constant 2 : i32
    %218 = tpu.dynamic_rotate %217 by %c2_i32_63 dim 0 : vector<8x256xf32>, i32 -> vector<8x256xf32>
    %219 = arith.mulf %217, %218 : vector<8x256xf32>
    %c1_i32_64 = arith.constant 1 : i32
    %220 = tpu.dynamic_rotate %219 by %c1_i32_64 dim 0 : vector<8x256xf32>, i32 -> vector<8x256xf32>
    %221 = arith.mulf %219, %220 : vector<8x256xf32>
    %222 = vector.extract_strided_slice %221 {offsets = [0, 0], sizes = [1, 256], strides = [1, 1]} : vector<8x256xf32> to vector<1x256xf32>
    %cst_65 = arith.constant 1.000000e+00 : f32
    %223 = vector.broadcast %cst_65 : f32 to vector<1x256xf32>
    %224 = arith.subf %223, %222 : vector<1x256xf32>
    %225 = vector.extract_strided_slice %17 {offsets = [0, 5], sizes = [16, 1], strides = [1, 1]} : vector<16x8xf32> to vector<16x1xf32>
    %226 = vector.broadcast %225 : vector<16x1xf32> to vector<16x256xf32>
    %227 = arith.mulf %226, %15 : vector<16x256xf32>
    %cst_66 = arith.constant 1.000000e+00 : f32
    %228 = vector.broadcast %cst_66 : f32 to vector<16x256xf32>
    %229 = arith.subf %228, %227 : vector<16x256xf32>
    %230 = vector.extract_strided_slice %229 {offsets = [0, 0], sizes = [8, 256], strides = [1, 1]} : vector<16x256xf32> to vector<8x256xf32>
    %231 = vector.extract_strided_slice %229 {offsets = [8, 0], sizes = [8, 256], strides = [1, 1]} : vector<16x256xf32> to vector<8x256xf32>
    %232 = arith.mulf %230, %231 : vector<8x256xf32>
    %c4_i32_67 = arith.constant 4 : i32
    %233 = tpu.dynamic_rotate %232 by %c4_i32_67 dim 0 : vector<8x256xf32>, i32 -> vector<8x256xf32>
    %234 = arith.mulf %232, %233 : vector<8x256xf32>
    %c2_i32_68 = arith.constant 2 : i32
    %235 = tpu.dynamic_rotate %234 by %c2_i32_68 dim 0 : vector<8x256xf32>, i32 -> vector<8x256xf32>
    %236 = arith.mulf %234, %235 : vector<8x256xf32>
    %c1_i32_69 = arith.constant 1 : i32
    %237 = tpu.dynamic_rotate %236 by %c1_i32_69 dim 0 : vector<8x256xf32>, i32 -> vector<8x256xf32>
    %238 = arith.mulf %236, %237 : vector<8x256xf32>
    %239 = vector.extract_strided_slice %238 {offsets = [0, 0], sizes = [1, 256], strides = [1, 1]} : vector<8x256xf32> to vector<1x256xf32>
    %cst_70 = arith.constant 1.000000e+00 : f32
    %240 = vector.broadcast %cst_70 : f32 to vector<1x256xf32>
    %241 = arith.subf %240, %239 : vector<1x256xf32>
    %242 = vector.extract_strided_slice %17 {offsets = [0, 6], sizes = [16, 1], strides = [1, 1]} : vector<16x8xf32> to vector<16x1xf32>
    %243 = vector.broadcast %242 : vector<16x1xf32> to vector<16x256xf32>
    %244 = arith.mulf %243, %15 : vector<16x256xf32>
    %cst_71 = arith.constant 1.000000e+00 : f32
    %245 = vector.broadcast %cst_71 : f32 to vector<16x256xf32>
    %246 = arith.subf %245, %244 : vector<16x256xf32>
    %247 = vector.extract_strided_slice %246 {offsets = [0, 0], sizes = [8, 256], strides = [1, 1]} : vector<16x256xf32> to vector<8x256xf32>
    %248 = vector.extract_strided_slice %246 {offsets = [8, 0], sizes = [8, 256], strides = [1, 1]} : vector<16x256xf32> to vector<8x256xf32>
    %249 = arith.mulf %247, %248 : vector<8x256xf32>
    %c4_i32_72 = arith.constant 4 : i32
    %250 = tpu.dynamic_rotate %249 by %c4_i32_72 dim 0 : vector<8x256xf32>, i32 -> vector<8x256xf32>
    %251 = arith.mulf %249, %250 : vector<8x256xf32>
    %c2_i32_73 = arith.constant 2 : i32
    %252 = tpu.dynamic_rotate %251 by %c2_i32_73 dim 0 : vector<8x256xf32>, i32 -> vector<8x256xf32>
    %253 = arith.mulf %251, %252 : vector<8x256xf32>
    %c1_i32_74 = arith.constant 1 : i32
    %254 = tpu.dynamic_rotate %253 by %c1_i32_74 dim 0 : vector<8x256xf32>, i32 -> vector<8x256xf32>
    %255 = arith.mulf %253, %254 : vector<8x256xf32>
    %256 = vector.extract_strided_slice %255 {offsets = [0, 0], sizes = [1, 256], strides = [1, 1]} : vector<8x256xf32> to vector<1x256xf32>
    %cst_75 = arith.constant 1.000000e+00 : f32
    %257 = vector.broadcast %cst_75 : f32 to vector<1x256xf32>
    %258 = arith.subf %257, %256 : vector<1x256xf32>
    %259 = vector.extract_strided_slice %17 {offsets = [0, 7], sizes = [16, 1], strides = [1, 1]} : vector<16x8xf32> to vector<16x1xf32>
    %260 = vector.broadcast %259 : vector<16x1xf32> to vector<16x256xf32>
    %261 = arith.mulf %260, %15 : vector<16x256xf32>
    %cst_76 = arith.constant 1.000000e+00 : f32
    %262 = vector.broadcast %cst_76 : f32 to vector<16x256xf32>
    %263 = arith.subf %262, %261 : vector<16x256xf32>
    %264 = vector.extract_strided_slice %263 {offsets = [0, 0], sizes = [8, 256], strides = [1, 1]} : vector<16x256xf32> to vector<8x256xf32>
    %265 = vector.extract_strided_slice %263 {offsets = [8, 0], sizes = [8, 256], strides = [1, 1]} : vector<16x256xf32> to vector<8x256xf32>
    %266 = arith.mulf %264, %265 : vector<8x256xf32>
    %c4_i32_77 = arith.constant 4 : i32
    %267 = tpu.dynamic_rotate %266 by %c4_i32_77 dim 0 : vector<8x256xf32>, i32 -> vector<8x256xf32>
    %268 = arith.mulf %266, %267 : vector<8x256xf32>
    %c2_i32_78 = arith.constant 2 : i32
    %269 = tpu.dynamic_rotate %268 by %c2_i32_78 dim 0 : vector<8x256xf32>, i32 -> vector<8x256xf32>
    %270 = arith.mulf %268, %269 : vector<8x256xf32>
    %c1_i32_79 = arith.constant 1 : i32
    %271 = tpu.dynamic_rotate %270 by %c1_i32_79 dim 0 : vector<8x256xf32>, i32 -> vector<8x256xf32>
    %272 = arith.mulf %270, %271 : vector<8x256xf32>
    %273 = vector.extract_strided_slice %272 {offsets = [0, 0], sizes = [1, 256], strides = [1, 1]} : vector<8x256xf32> to vector<1x256xf32>
    %cst_80 = arith.constant 1.000000e+00 : f32
    %274 = vector.broadcast %cst_80 : f32 to vector<1x256xf32>
    %275 = arith.subf %274, %273 : vector<1x256xf32>
    %276 = tpu.concatenate %34, %49, %64, %79, %94, %109, %124, %139, %156, %173, %190, %207, %224, %241, %258, %275 in 0 : vector<1x256xf32>, vector<1x256xf32>, vector<1x256xf32>, vector<1x256xf32>, vector<1x256xf32>, vector<1x256xf32>, vector<1x256xf32>, vector<1x256xf32>, vector<1x256xf32>, vector<1x256xf32>, vector<1x256xf32>, vector<1x256xf32>, vector<1x256xf32>, vector<1x256xf32>, vector<1x256xf32>, vector<1x256xf32> -> vector<16x256xf32>
    %c0_81 = arith.constant 0 : index
    %c0_82 = arith.constant 0 : index
    %277 = vector.load %arg5[%c0_81, %c0_82] : memref<16x8xf32, #tpu.memory_space<vmem>>, vector<16x8xf32>
    %c0_83 = arith.constant 0 : index
    %c0_84 = arith.constant 0 : index
    %278 = vector.load %arg6[%c0_83, %c0_84] : memref<16x8xf32, #tpu.memory_space<vmem>>, vector<16x8xf32>
    %cst_85 = arith.constant 1.000000e+00 : f32
    %279 = vector.broadcast %cst_85 : f32 to vector<16x256xf32>
    %280 = arith.subf %279, %276 : vector<16x256xf32>
    %281 = vector.extract_strided_slice %277 {offsets = [0, 0], sizes = [16, 1], strides = [1, 1]} : vector<16x8xf32> to vector<16x1xf32>
    %282 = vector.broadcast %281 : vector<16x1xf32> to vector<16x256xf32>
    %283 = arith.mulf %282, %280 : vector<16x256xf32>
    %cst_86 = arith.constant 1.000000e+00 : f32
    %284 = vector.broadcast %cst_86 : f32 to vector<16x256xf32>
    %285 = arith.subf %284, %283 : vector<16x256xf32>
    %286 = vector.extract_strided_slice %285 {offsets = [0, 0], sizes = [8, 256], strides = [1, 1]} : vector<16x256xf32> to vector<8x256xf32>
    %287 = vector.extract_strided_slice %285 {offsets = [8, 0], sizes = [8, 256], strides = [1, 1]} : vector<16x256xf32> to vector<8x256xf32>
    %288 = arith.mulf %286, %287 : vector<8x256xf32>
    %c4_i32_87 = arith.constant 4 : i32
    %289 = tpu.dynamic_rotate %288 by %c4_i32_87 dim 0 : vector<8x256xf32>, i32 -> vector<8x256xf32>
    %290 = arith.mulf %288, %289 : vector<8x256xf32>
    %c2_i32_88 = arith.constant 2 : i32
    %291 = tpu.dynamic_rotate %290 by %c2_i32_88 dim 0 : vector<8x256xf32>, i32 -> vector<8x256xf32>
    %292 = arith.mulf %290, %291 : vector<8x256xf32>
    %c1_i32_89 = arith.constant 1 : i32
    %293 = tpu.dynamic_rotate %292 by %c1_i32_89 dim 0 : vector<8x256xf32>, i32 -> vector<8x256xf32>
    %294 = arith.mulf %292, %293 : vector<8x256xf32>
    %295 = vector.extract_strided_slice %294 {offsets = [0, 0], sizes = [1, 256], strides = [1, 1]} : vector<8x256xf32> to vector<1x256xf32>
    %296 = vector.extract_strided_slice %277 {offsets = [0, 1], sizes = [16, 1], strides = [1, 1]} : vector<16x8xf32> to vector<16x1xf32>
    %297 = vector.broadcast %296 : vector<16x1xf32> to vector<16x256xf32>
    %298 = arith.mulf %297, %280 : vector<16x256xf32>
    %cst_90 = arith.constant 1.000000e+00 : f32
    %299 = vector.broadcast %cst_90 : f32 to vector<16x256xf32>
    %300 = arith.subf %299, %298 : vector<16x256xf32>
    %301 = vector.extract_strided_slice %300 {offsets = [0, 0], sizes = [8, 256], strides = [1, 1]} : vector<16x256xf32> to vector<8x256xf32>
    %302 = vector.extract_strided_slice %300 {offsets = [8, 0], sizes = [8, 256], strides = [1, 1]} : vector<16x256xf32> to vector<8x256xf32>
    %303 = arith.mulf %301, %302 : vector<8x256xf32>
    %c4_i32_91 = arith.constant 4 : i32
    %304 = tpu.dynamic_rotate %303 by %c4_i32_91 dim 0 : vector<8x256xf32>, i32 -> vector<8x256xf32>
    %305 = arith.mulf %303, %304 : vector<8x256xf32>
    %c2_i32_92 = arith.constant 2 : i32
    %306 = tpu.dynamic_rotate %305 by %c2_i32_92 dim 0 : vector<8x256xf32>, i32 -> vector<8x256xf32>
    %307 = arith.mulf %305, %306 : vector<8x256xf32>
    %c1_i32_93 = arith.constant 1 : i32
    %308 = tpu.dynamic_rotate %307 by %c1_i32_93 dim 0 : vector<8x256xf32>, i32 -> vector<8x256xf32>
    %309 = arith.mulf %307, %308 : vector<8x256xf32>
    %310 = vector.extract_strided_slice %309 {offsets = [0, 0], sizes = [1, 256], strides = [1, 1]} : vector<8x256xf32> to vector<1x256xf32>
    %311 = vector.extract_strided_slice %277 {offsets = [0, 2], sizes = [16, 1], strides = [1, 1]} : vector<16x8xf32> to vector<16x1xf32>
    %312 = vector.broadcast %311 : vector<16x1xf32> to vector<16x256xf32>
    %313 = arith.mulf %312, %280 : vector<16x256xf32>
    %cst_94 = arith.constant 1.000000e+00 : f32
    %314 = vector.broadcast %cst_94 : f32 to vector<16x256xf32>
    %315 = arith.subf %314, %313 : vector<16x256xf32>
    %316 = vector.extract_strided_slice %315 {offsets = [0, 0], sizes = [8, 256], strides = [1, 1]} : vector<16x256xf32> to vector<8x256xf32>
    %317 = vector.extract_strided_slice %315 {offsets = [8, 0], sizes = [8, 256], strides = [1, 1]} : vector<16x256xf32> to vector<8x256xf32>
    %318 = arith.mulf %316, %317 : vector<8x256xf32>
    %c4_i32_95 = arith.constant 4 : i32
    %319 = tpu.dynamic_rotate %318 by %c4_i32_95 dim 0 : vector<8x256xf32>, i32 -> vector<8x256xf32>
    %320 = arith.mulf %318, %319 : vector<8x256xf32>
    %c2_i32_96 = arith.constant 2 : i32
    %321 = tpu.dynamic_rotate %320 by %c2_i32_96 dim 0 : vector<8x256xf32>, i32 -> vector<8x256xf32>
    %322 = arith.mulf %320, %321 : vector<8x256xf32>
    %c1_i32_97 = arith.constant 1 : i32
    %323 = tpu.dynamic_rotate %322 by %c1_i32_97 dim 0 : vector<8x256xf32>, i32 -> vector<8x256xf32>
    %324 = arith.mulf %322, %323 : vector<8x256xf32>
    %325 = vector.extract_strided_slice %324 {offsets = [0, 0], sizes = [1, 256], strides = [1, 1]} : vector<8x256xf32> to vector<1x256xf32>
    %326 = vector.extract_strided_slice %277 {offsets = [0, 3], sizes = [16, 1], strides = [1, 1]} : vector<16x8xf32> to vector<16x1xf32>
    %327 = vector.broadcast %326 : vector<16x1xf32> to vector<16x256xf32>
    %328 = arith.mulf %327, %280 : vector<16x256xf32>
    %cst_98 = arith.constant 1.000000e+00 : f32
    %329 = vector.broadcast %cst_98 : f32 to vector<16x256xf32>
    %330 = arith.subf %329, %328 : vector<16x256xf32>
    %331 = vector.extract_strided_slice %330 {offsets = [0, 0], sizes = [8, 256], strides = [1, 1]} : vector<16x256xf32> to vector<8x256xf32>
    %332 = vector.extract_strided_slice %330 {offsets = [8, 0], sizes = [8, 256], strides = [1, 1]} : vector<16x256xf32> to vector<8x256xf32>
    %333 = arith.mulf %331, %332 : vector<8x256xf32>
    %c4_i32_99 = arith.constant 4 : i32
    %334 = tpu.dynamic_rotate %333 by %c4_i32_99 dim 0 : vector<8x256xf32>, i32 -> vector<8x256xf32>
    %335 = arith.mulf %333, %334 : vector<8x256xf32>
    %c2_i32_100 = arith.constant 2 : i32
    %336 = tpu.dynamic_rotate %335 by %c2_i32_100 dim 0 : vector<8x256xf32>, i32 -> vector<8x256xf32>
    %337 = arith.mulf %335, %336 : vector<8x256xf32>
    %c1_i32_101 = arith.constant 1 : i32
    %338 = tpu.dynamic_rotate %337 by %c1_i32_101 dim 0 : vector<8x256xf32>, i32 -> vector<8x256xf32>
    %339 = arith.mulf %337, %338 : vector<8x256xf32>
    %340 = vector.extract_strided_slice %339 {offsets = [0, 0], sizes = [1, 256], strides = [1, 1]} : vector<8x256xf32> to vector<1x256xf32>
    %341 = vector.extract_strided_slice %277 {offsets = [0, 4], sizes = [16, 1], strides = [1, 1]} : vector<16x8xf32> to vector<16x1xf32>
    %342 = vector.broadcast %341 : vector<16x1xf32> to vector<16x256xf32>
    %343 = arith.mulf %342, %280 : vector<16x256xf32>
    %cst_102 = arith.constant 1.000000e+00 : f32
    %344 = vector.broadcast %cst_102 : f32 to vector<16x256xf32>
    %345 = arith.subf %344, %343 : vector<16x256xf32>
    %346 = vector.extract_strided_slice %345 {offsets = [0, 0], sizes = [8, 256], strides = [1, 1]} : vector<16x256xf32> to vector<8x256xf32>
    %347 = vector.extract_strided_slice %345 {offsets = [8, 0], sizes = [8, 256], strides = [1, 1]} : vector<16x256xf32> to vector<8x256xf32>
    %348 = arith.mulf %346, %347 : vector<8x256xf32>
    %c4_i32_103 = arith.constant 4 : i32
    %349 = tpu.dynamic_rotate %348 by %c4_i32_103 dim 0 : vector<8x256xf32>, i32 -> vector<8x256xf32>
    %350 = arith.mulf %348, %349 : vector<8x256xf32>
    %c2_i32_104 = arith.constant 2 : i32
    %351 = tpu.dynamic_rotate %350 by %c2_i32_104 dim 0 : vector<8x256xf32>, i32 -> vector<8x256xf32>
    %352 = arith.mulf %350, %351 : vector<8x256xf32>
    %c1_i32_105 = arith.constant 1 : i32
    %353 = tpu.dynamic_rotate %352 by %c1_i32_105 dim 0 : vector<8x256xf32>, i32 -> vector<8x256xf32>
    %354 = arith.mulf %352, %353 : vector<8x256xf32>
    %355 = vector.extract_strided_slice %354 {offsets = [0, 0], sizes = [1, 256], strides = [1, 1]} : vector<8x256xf32> to vector<1x256xf32>
    %356 = vector.extract_strided_slice %277 {offsets = [0, 5], sizes = [16, 1], strides = [1, 1]} : vector<16x8xf32> to vector<16x1xf32>
    %357 = vector.broadcast %356 : vector<16x1xf32> to vector<16x256xf32>
    %358 = arith.mulf %357, %280 : vector<16x256xf32>
    %cst_106 = arith.constant 1.000000e+00 : f32
    %359 = vector.broadcast %cst_106 : f32 to vector<16x256xf32>
    %360 = arith.subf %359, %358 : vector<16x256xf32>
    %361 = vector.extract_strided_slice %360 {offsets = [0, 0], sizes = [8, 256], strides = [1, 1]} : vector<16x256xf32> to vector<8x256xf32>
    %362 = vector.extract_strided_slice %360 {offsets = [8, 0], sizes = [8, 256], strides = [1, 1]} : vector<16x256xf32> to vector<8x256xf32>
    %363 = arith.mulf %361, %362 : vector<8x256xf32>
    %c4_i32_107 = arith.constant 4 : i32
    %364 = tpu.dynamic_rotate %363 by %c4_i32_107 dim 0 : vector<8x256xf32>, i32 -> vector<8x256xf32>
    %365 = arith.mulf %363, %364 : vector<8x256xf32>
    %c2_i32_108 = arith.constant 2 : i32
    %366 = tpu.dynamic_rotate %365 by %c2_i32_108 dim 0 : vector<8x256xf32>, i32 -> vector<8x256xf32>
    %367 = arith.mulf %365, %366 : vector<8x256xf32>
    %c1_i32_109 = arith.constant 1 : i32
    %368 = tpu.dynamic_rotate %367 by %c1_i32_109 dim 0 : vector<8x256xf32>, i32 -> vector<8x256xf32>
    %369 = arith.mulf %367, %368 : vector<8x256xf32>
    %370 = vector.extract_strided_slice %369 {offsets = [0, 0], sizes = [1, 256], strides = [1, 1]} : vector<8x256xf32> to vector<1x256xf32>
    %371 = vector.extract_strided_slice %277 {offsets = [0, 6], sizes = [16, 1], strides = [1, 1]} : vector<16x8xf32> to vector<16x1xf32>
    %372 = vector.broadcast %371 : vector<16x1xf32> to vector<16x256xf32>
    %373 = arith.mulf %372, %280 : vector<16x256xf32>
    %cst_110 = arith.constant 1.000000e+00 : f32
    %374 = vector.broadcast %cst_110 : f32 to vector<16x256xf32>
    %375 = arith.subf %374, %373 : vector<16x256xf32>
    %376 = vector.extract_strided_slice %375 {offsets = [0, 0], sizes = [8, 256], strides = [1, 1]} : vector<16x256xf32> to vector<8x256xf32>
    %377 = vector.extract_strided_slice %375 {offsets = [8, 0], sizes = [8, 256], strides = [1, 1]} : vector<16x256xf32> to vector<8x256xf32>
    %378 = arith.mulf %376, %377 : vector<8x256xf32>
    %c4_i32_111 = arith.constant 4 : i32
    %379 = tpu.dynamic_rotate %378 by %c4_i32_111 dim 0 : vector<8x256xf32>, i32 -> vector<8x256xf32>
    %380 = arith.mulf %378, %379 : vector<8x256xf32>
    %c2_i32_112 = arith.constant 2 : i32
    %381 = tpu.dynamic_rotate %380 by %c2_i32_112 dim 0 : vector<8x256xf32>, i32 -> vector<8x256xf32>
    %382 = arith.mulf %380, %381 : vector<8x256xf32>
    %c1_i32_113 = arith.constant 1 : i32
    %383 = tpu.dynamic_rotate %382 by %c1_i32_113 dim 0 : vector<8x256xf32>, i32 -> vector<8x256xf32>
    %384 = arith.mulf %382, %383 : vector<8x256xf32>
    %385 = vector.extract_strided_slice %384 {offsets = [0, 0], sizes = [1, 256], strides = [1, 1]} : vector<8x256xf32> to vector<1x256xf32>
    %386 = vector.extract_strided_slice %277 {offsets = [0, 7], sizes = [16, 1], strides = [1, 1]} : vector<16x8xf32> to vector<16x1xf32>
    %387 = vector.broadcast %386 : vector<16x1xf32> to vector<16x256xf32>
    %388 = arith.mulf %387, %280 : vector<16x256xf32>
    %cst_114 = arith.constant 1.000000e+00 : f32
    %389 = vector.broadcast %cst_114 : f32 to vector<16x256xf32>
    %390 = arith.subf %389, %388 : vector<16x256xf32>
    %391 = vector.extract_strided_slice %390 {offsets = [0, 0], sizes = [8, 256], strides = [1, 1]} : vector<16x256xf32> to vector<8x256xf32>
    %392 = vector.extract_strided_slice %390 {offsets = [8, 0], sizes = [8, 256], strides = [1, 1]} : vector<16x256xf32> to vector<8x256xf32>
    %393 = arith.mulf %391, %392 : vector<8x256xf32>
    %c4_i32_115 = arith.constant 4 : i32
    %394 = tpu.dynamic_rotate %393 by %c4_i32_115 dim 0 : vector<8x256xf32>, i32 -> vector<8x256xf32>
    %395 = arith.mulf %393, %394 : vector<8x256xf32>
    %c2_i32_116 = arith.constant 2 : i32
    %396 = tpu.dynamic_rotate %395 by %c2_i32_116 dim 0 : vector<8x256xf32>, i32 -> vector<8x256xf32>
    %397 = arith.mulf %395, %396 : vector<8x256xf32>
    %c1_i32_117 = arith.constant 1 : i32
    %398 = tpu.dynamic_rotate %397 by %c1_i32_117 dim 0 : vector<8x256xf32>, i32 -> vector<8x256xf32>
    %399 = arith.mulf %397, %398 : vector<8x256xf32>
    %400 = vector.extract_strided_slice %399 {offsets = [0, 0], sizes = [1, 256], strides = [1, 1]} : vector<8x256xf32> to vector<1x256xf32>
    %401 = vector.extract_strided_slice %278 {offsets = [0, 0], sizes = [16, 1], strides = [1, 1]} : vector<16x8xf32> to vector<16x1xf32>
    %402 = vector.broadcast %401 : vector<16x1xf32> to vector<16x256xf32>
    %403 = arith.mulf %402, %276 : vector<16x256xf32>
    %cst_118 = arith.constant 1.000000e+00 : f32
    %404 = vector.broadcast %cst_118 : f32 to vector<16x256xf32>
    %405 = arith.subf %404, %403 : vector<16x256xf32>
    %406 = vector.extract_strided_slice %405 {offsets = [0, 0], sizes = [8, 256], strides = [1, 1]} : vector<16x256xf32> to vector<8x256xf32>
    %407 = vector.extract_strided_slice %405 {offsets = [8, 0], sizes = [8, 256], strides = [1, 1]} : vector<16x256xf32> to vector<8x256xf32>
    %408 = arith.mulf %406, %407 : vector<8x256xf32>
    %c4_i32_119 = arith.constant 4 : i32
    %409 = tpu.dynamic_rotate %408 by %c4_i32_119 dim 0 : vector<8x256xf32>, i32 -> vector<8x256xf32>
    %410 = arith.mulf %408, %409 : vector<8x256xf32>
    %c2_i32_120 = arith.constant 2 : i32
    %411 = tpu.dynamic_rotate %410 by %c2_i32_120 dim 0 : vector<8x256xf32>, i32 -> vector<8x256xf32>
    %412 = arith.mulf %410, %411 : vector<8x256xf32>
    %c1_i32_121 = arith.constant 1 : i32
    %413 = tpu.dynamic_rotate %412 by %c1_i32_121 dim 0 : vector<8x256xf32>, i32 -> vector<8x256xf32>
    %414 = arith.mulf %412, %413 : vector<8x256xf32>
    %415 = vector.extract_strided_slice %414 {offsets = [0, 0], sizes = [1, 256], strides = [1, 1]} : vector<8x256xf32> to vector<1x256xf32>
    %cst_122 = arith.constant 1.000000e+00 : f32
    %416 = vector.broadcast %cst_122 : f32 to vector<1x256xf32>
    %417 = arith.subf %416, %415 : vector<1x256xf32>
    %418 = vector.extract_strided_slice %278 {offsets = [0, 1], sizes = [16, 1], strides = [1, 1]} : vector<16x8xf32> to vector<16x1xf32>
    %419 = vector.broadcast %418 : vector<16x1xf32> to vector<16x256xf32>
    %420 = arith.mulf %419, %276 : vector<16x256xf32>
    %cst_123 = arith.constant 1.000000e+00 : f32
    %421 = vector.broadcast %cst_123 : f32 to vector<16x256xf32>
    %422 = arith.subf %421, %420 : vector<16x256xf32>
    %423 = vector.extract_strided_slice %422 {offsets = [0, 0], sizes = [8, 256], strides = [1, 1]} : vector<16x256xf32> to vector<8x256xf32>
    %424 = vector.extract_strided_slice %422 {offsets = [8, 0], sizes = [8, 256], strides = [1, 1]} : vector<16x256xf32> to vector<8x256xf32>
    %425 = arith.mulf %423, %424 : vector<8x256xf32>
    %c4_i32_124 = arith.constant 4 : i32
    %426 = tpu.dynamic_rotate %425 by %c4_i32_124 dim 0 : vector<8x256xf32>, i32 -> vector<8x256xf32>
    %427 = arith.mulf %425, %426 : vector<8x256xf32>
    %c2_i32_125 = arith.constant 2 : i32
    %428 = tpu.dynamic_rotate %427 by %c2_i32_125 dim 0 : vector<8x256xf32>, i32 -> vector<8x256xf32>
    %429 = arith.mulf %427, %428 : vector<8x256xf32>
    %c1_i32_126 = arith.constant 1 : i32
    %430 = tpu.dynamic_rotate %429 by %c1_i32_126 dim 0 : vector<8x256xf32>, i32 -> vector<8x256xf32>
    %431 = arith.mulf %429, %430 : vector<8x256xf32>
    %432 = vector.extract_strided_slice %431 {offsets = [0, 0], sizes = [1, 256], strides = [1, 1]} : vector<8x256xf32> to vector<1x256xf32>
    %cst_127 = arith.constant 1.000000e+00 : f32
    %433 = vector.broadcast %cst_127 : f32 to vector<1x256xf32>
    %434 = arith.subf %433, %432 : vector<1x256xf32>
    %435 = vector.extract_strided_slice %278 {offsets = [0, 2], sizes = [16, 1], strides = [1, 1]} : vector<16x8xf32> to vector<16x1xf32>
    %436 = vector.broadcast %435 : vector<16x1xf32> to vector<16x256xf32>
    %437 = arith.mulf %436, %276 : vector<16x256xf32>
    %cst_128 = arith.constant 1.000000e+00 : f32
    %438 = vector.broadcast %cst_128 : f32 to vector<16x256xf32>
    %439 = arith.subf %438, %437 : vector<16x256xf32>
    %440 = vector.extract_strided_slice %439 {offsets = [0, 0], sizes = [8, 256], strides = [1, 1]} : vector<16x256xf32> to vector<8x256xf32>
    %441 = vector.extract_strided_slice %439 {offsets = [8, 0], sizes = [8, 256], strides = [1, 1]} : vector<16x256xf32> to vector<8x256xf32>
    %442 = arith.mulf %440, %441 : vector<8x256xf32>
    %c4_i32_129 = arith.constant 4 : i32
    %443 = tpu.dynamic_rotate %442 by %c4_i32_129 dim 0 : vector<8x256xf32>, i32 -> vector<8x256xf32>
    %444 = arith.mulf %442, %443 : vector<8x256xf32>
    %c2_i32_130 = arith.constant 2 : i32
    %445 = tpu.dynamic_rotate %444 by %c2_i32_130 dim 0 : vector<8x256xf32>, i32 -> vector<8x256xf32>
    %446 = arith.mulf %444, %445 : vector<8x256xf32>
    %c1_i32_131 = arith.constant 1 : i32
    %447 = tpu.dynamic_rotate %446 by %c1_i32_131 dim 0 : vector<8x256xf32>, i32 -> vector<8x256xf32>
    %448 = arith.mulf %446, %447 : vector<8x256xf32>
    %449 = vector.extract_strided_slice %448 {offsets = [0, 0], sizes = [1, 256], strides = [1, 1]} : vector<8x256xf32> to vector<1x256xf32>
    %cst_132 = arith.constant 1.000000e+00 : f32
    %450 = vector.broadcast %cst_132 : f32 to vector<1x256xf32>
    %451 = arith.subf %450, %449 : vector<1x256xf32>
    %452 = vector.extract_strided_slice %278 {offsets = [0, 3], sizes = [16, 1], strides = [1, 1]} : vector<16x8xf32> to vector<16x1xf32>
    %453 = vector.broadcast %452 : vector<16x1xf32> to vector<16x256xf32>
    %454 = arith.mulf %453, %276 : vector<16x256xf32>
    %cst_133 = arith.constant 1.000000e+00 : f32
    %455 = vector.broadcast %cst_133 : f32 to vector<16x256xf32>
    %456 = arith.subf %455, %454 : vector<16x256xf32>
    %457 = vector.extract_strided_slice %456 {offsets = [0, 0], sizes = [8, 256], strides = [1, 1]} : vector<16x256xf32> to vector<8x256xf32>
    %458 = vector.extract_strided_slice %456 {offsets = [8, 0], sizes = [8, 256], strides = [1, 1]} : vector<16x256xf32> to vector<8x256xf32>
    %459 = arith.mulf %457, %458 : vector<8x256xf32>
    %c4_i32_134 = arith.constant 4 : i32
    %460 = tpu.dynamic_rotate %459 by %c4_i32_134 dim 0 : vector<8x256xf32>, i32 -> vector<8x256xf32>
    %461 = arith.mulf %459, %460 : vector<8x256xf32>
    %c2_i32_135 = arith.constant 2 : i32
    %462 = tpu.dynamic_rotate %461 by %c2_i32_135 dim 0 : vector<8x256xf32>, i32 -> vector<8x256xf32>
    %463 = arith.mulf %461, %462 : vector<8x256xf32>
    %c1_i32_136 = arith.constant 1 : i32
    %464 = tpu.dynamic_rotate %463 by %c1_i32_136 dim 0 : vector<8x256xf32>, i32 -> vector<8x256xf32>
    %465 = arith.mulf %463, %464 : vector<8x256xf32>
    %466 = vector.extract_strided_slice %465 {offsets = [0, 0], sizes = [1, 256], strides = [1, 1]} : vector<8x256xf32> to vector<1x256xf32>
    %cst_137 = arith.constant 1.000000e+00 : f32
    %467 = vector.broadcast %cst_137 : f32 to vector<1x256xf32>
    %468 = arith.subf %467, %466 : vector<1x256xf32>
    %469 = vector.extract_strided_slice %278 {offsets = [0, 4], sizes = [16, 1], strides = [1, 1]} : vector<16x8xf32> to vector<16x1xf32>
    %470 = vector.broadcast %469 : vector<16x1xf32> to vector<16x256xf32>
    %471 = arith.mulf %470, %276 : vector<16x256xf32>
    %cst_138 = arith.constant 1.000000e+00 : f32
    %472 = vector.broadcast %cst_138 : f32 to vector<16x256xf32>
    %473 = arith.subf %472, %471 : vector<16x256xf32>
    %474 = vector.extract_strided_slice %473 {offsets = [0, 0], sizes = [8, 256], strides = [1, 1]} : vector<16x256xf32> to vector<8x256xf32>
    %475 = vector.extract_strided_slice %473 {offsets = [8, 0], sizes = [8, 256], strides = [1, 1]} : vector<16x256xf32> to vector<8x256xf32>
    %476 = arith.mulf %474, %475 : vector<8x256xf32>
    %c4_i32_139 = arith.constant 4 : i32
    %477 = tpu.dynamic_rotate %476 by %c4_i32_139 dim 0 : vector<8x256xf32>, i32 -> vector<8x256xf32>
    %478 = arith.mulf %476, %477 : vector<8x256xf32>
    %c2_i32_140 = arith.constant 2 : i32
    %479 = tpu.dynamic_rotate %478 by %c2_i32_140 dim 0 : vector<8x256xf32>, i32 -> vector<8x256xf32>
    %480 = arith.mulf %478, %479 : vector<8x256xf32>
    %c1_i32_141 = arith.constant 1 : i32
    %481 = tpu.dynamic_rotate %480 by %c1_i32_141 dim 0 : vector<8x256xf32>, i32 -> vector<8x256xf32>
    %482 = arith.mulf %480, %481 : vector<8x256xf32>
    %483 = vector.extract_strided_slice %482 {offsets = [0, 0], sizes = [1, 256], strides = [1, 1]} : vector<8x256xf32> to vector<1x256xf32>
    %cst_142 = arith.constant 1.000000e+00 : f32
    %484 = vector.broadcast %cst_142 : f32 to vector<1x256xf32>
    %485 = arith.subf %484, %483 : vector<1x256xf32>
    %486 = vector.extract_strided_slice %278 {offsets = [0, 5], sizes = [16, 1], strides = [1, 1]} : vector<16x8xf32> to vector<16x1xf32>
    %487 = vector.broadcast %486 : vector<16x1xf32> to vector<16x256xf32>
    %488 = arith.mulf %487, %276 : vector<16x256xf32>
    %cst_143 = arith.constant 1.000000e+00 : f32
    %489 = vector.broadcast %cst_143 : f32 to vector<16x256xf32>
    %490 = arith.subf %489, %488 : vector<16x256xf32>
    %491 = vector.extract_strided_slice %490 {offsets = [0, 0], sizes = [8, 256], strides = [1, 1]} : vector<16x256xf32> to vector<8x256xf32>
    %492 = vector.extract_strided_slice %490 {offsets = [8, 0], sizes = [8, 256], strides = [1, 1]} : vector<16x256xf32> to vector<8x256xf32>
    %493 = arith.mulf %491, %492 : vector<8x256xf32>
    %c4_i32_144 = arith.constant 4 : i32
    %494 = tpu.dynamic_rotate %493 by %c4_i32_144 dim 0 : vector<8x256xf32>, i32 -> vector<8x256xf32>
    %495 = arith.mulf %493, %494 : vector<8x256xf32>
    %c2_i32_145 = arith.constant 2 : i32
    %496 = tpu.dynamic_rotate %495 by %c2_i32_145 dim 0 : vector<8x256xf32>, i32 -> vector<8x256xf32>
    %497 = arith.mulf %495, %496 : vector<8x256xf32>
    %c1_i32_146 = arith.constant 1 : i32
    %498 = tpu.dynamic_rotate %497 by %c1_i32_146 dim 0 : vector<8x256xf32>, i32 -> vector<8x256xf32>
    %499 = arith.mulf %497, %498 : vector<8x256xf32>
    %500 = vector.extract_strided_slice %499 {offsets = [0, 0], sizes = [1, 256], strides = [1, 1]} : vector<8x256xf32> to vector<1x256xf32>
    %cst_147 = arith.constant 1.000000e+00 : f32
    %501 = vector.broadcast %cst_147 : f32 to vector<1x256xf32>
    %502 = arith.subf %501, %500 : vector<1x256xf32>
    %503 = vector.extract_strided_slice %278 {offsets = [0, 6], sizes = [16, 1], strides = [1, 1]} : vector<16x8xf32> to vector<16x1xf32>
    %504 = vector.broadcast %503 : vector<16x1xf32> to vector<16x256xf32>
    %505 = arith.mulf %504, %276 : vector<16x256xf32>
    %cst_148 = arith.constant 1.000000e+00 : f32
    %506 = vector.broadcast %cst_148 : f32 to vector<16x256xf32>
    %507 = arith.subf %506, %505 : vector<16x256xf32>
    %508 = vector.extract_strided_slice %507 {offsets = [0, 0], sizes = [8, 256], strides = [1, 1]} : vector<16x256xf32> to vector<8x256xf32>
    %509 = vector.extract_strided_slice %507 {offsets = [8, 0], sizes = [8, 256], strides = [1, 1]} : vector<16x256xf32> to vector<8x256xf32>
    %510 = arith.mulf %508, %509 : vector<8x256xf32>
    %c4_i32_149 = arith.constant 4 : i32
    %511 = tpu.dynamic_rotate %510 by %c4_i32_149 dim 0 : vector<8x256xf32>, i32 -> vector<8x256xf32>
    %512 = arith.mulf %510, %511 : vector<8x256xf32>
    %c2_i32_150 = arith.constant 2 : i32
    %513 = tpu.dynamic_rotate %512 by %c2_i32_150 dim 0 : vector<8x256xf32>, i32 -> vector<8x256xf32>
    %514 = arith.mulf %512, %513 : vector<8x256xf32>
    %c1_i32_151 = arith.constant 1 : i32
    %515 = tpu.dynamic_rotate %514 by %c1_i32_151 dim 0 : vector<8x256xf32>, i32 -> vector<8x256xf32>
    %516 = arith.mulf %514, %515 : vector<8x256xf32>
    %517 = vector.extract_strided_slice %516 {offsets = [0, 0], sizes = [1, 256], strides = [1, 1]} : vector<8x256xf32> to vector<1x256xf32>
    %cst_152 = arith.constant 1.000000e+00 : f32
    %518 = vector.broadcast %cst_152 : f32 to vector<1x256xf32>
    %519 = arith.subf %518, %517 : vector<1x256xf32>
    %520 = vector.extract_strided_slice %278 {offsets = [0, 7], sizes = [16, 1], strides = [1, 1]} : vector<16x8xf32> to vector<16x1xf32>
    %521 = vector.broadcast %520 : vector<16x1xf32> to vector<16x256xf32>
    %522 = arith.mulf %521, %276 : vector<16x256xf32>
    %cst_153 = arith.constant 1.000000e+00 : f32
    %523 = vector.broadcast %cst_153 : f32 to vector<16x256xf32>
    %524 = arith.subf %523, %522 : vector<16x256xf32>
    %525 = vector.extract_strided_slice %524 {offsets = [0, 0], sizes = [8, 256], strides = [1, 1]} : vector<16x256xf32> to vector<8x256xf32>
    %526 = vector.extract_strided_slice %524 {offsets = [8, 0], sizes = [8, 256], strides = [1, 1]} : vector<16x256xf32> to vector<8x256xf32>
    %527 = arith.mulf %525, %526 : vector<8x256xf32>
    %c4_i32_154 = arith.constant 4 : i32
    %528 = tpu.dynamic_rotate %527 by %c4_i32_154 dim 0 : vector<8x256xf32>, i32 -> vector<8x256xf32>
    %529 = arith.mulf %527, %528 : vector<8x256xf32>
    %c2_i32_155 = arith.constant 2 : i32
    %530 = tpu.dynamic_rotate %529 by %c2_i32_155 dim 0 : vector<8x256xf32>, i32 -> vector<8x256xf32>
    %531 = arith.mulf %529, %530 : vector<8x256xf32>
    %c1_i32_156 = arith.constant 1 : i32
    %532 = tpu.dynamic_rotate %531 by %c1_i32_156 dim 0 : vector<8x256xf32>, i32 -> vector<8x256xf32>
    %533 = arith.mulf %531, %532 : vector<8x256xf32>
    %534 = vector.extract_strided_slice %533 {offsets = [0, 0], sizes = [1, 256], strides = [1, 1]} : vector<8x256xf32> to vector<1x256xf32>
    %cst_157 = arith.constant 1.000000e+00 : f32
    %535 = vector.broadcast %cst_157 : f32 to vector<1x256xf32>
    %536 = arith.subf %535, %534 : vector<1x256xf32>
    %537 = tpu.concatenate %295, %310, %325, %340, %355, %370, %385, %400, %417, %434, %451, %468, %485, %502, %519, %536 in 0 : vector<1x256xf32>, vector<1x256xf32>, vector<1x256xf32>, vector<1x256xf32>, vector<1x256xf32>, vector<1x256xf32>, vector<1x256xf32>, vector<1x256xf32>, vector<1x256xf32>, vector<1x256xf32>, vector<1x256xf32>, vector<1x256xf32>, vector<1x256xf32>, vector<1x256xf32>, vector<1x256xf32>, vector<1x256xf32> -> vector<16x256xf32>
    %c0_158 = arith.constant 0 : index
    %c0_159 = arith.constant 0 : index
    %538 = vector.load %arg7[%c0_158, %c0_159] : memref<16x4xf32, #tpu.memory_space<vmem>>, vector<16x4xf32>
    %c0_160 = arith.constant 0 : index
    %c0_161 = arith.constant 0 : index
    %539 = vector.load %arg8[%c0_160, %c0_161] : memref<16x4xf32, #tpu.memory_space<vmem>>, vector<16x4xf32>
    %c0_162 = arith.constant 0 : index
    %c0_163 = arith.constant 0 : index
    %540 = vector.load %arg9[%c0_162, %c0_163] : memref<4x1xf32, #tpu.memory_space<vmem>>, vector<4x1xf32>
    %541 = vector.extract_strided_slice %538 {offsets = [0, 0], sizes = [16, 1], strides = [1, 1]} : vector<16x4xf32> to vector<16x1xf32>
    %542 = vector.broadcast %541 : vector<16x1xf32> to vector<16x256xf32>
    %543 = arith.mulf %542, %537 : vector<16x256xf32>
    %544 = vector.extract_strided_slice %543 {offsets = [0, 0], sizes = [8, 256], strides = [1, 1]} : vector<16x256xf32> to vector<8x256xf32>
    %545 = vector.extract_strided_slice %543 {offsets = [8, 0], sizes = [8, 256], strides = [1, 1]} : vector<16x256xf32> to vector<8x256xf32>
    %546 = arith.addf %544, %545 : vector<8x256xf32>
    %c4_i32_164 = arith.constant 4 : i32
    %547 = tpu.dynamic_rotate %546 by %c4_i32_164 dim 0 : vector<8x256xf32>, i32 -> vector<8x256xf32>
    %548 = arith.addf %546, %547 : vector<8x256xf32>
    %c2_i32_165 = arith.constant 2 : i32
    %549 = tpu.dynamic_rotate %548 by %c2_i32_165 dim 0 : vector<8x256xf32>, i32 -> vector<8x256xf32>
    %550 = arith.addf %548, %549 : vector<8x256xf32>
    %c1_i32_166 = arith.constant 1 : i32
    %551 = tpu.dynamic_rotate %550 by %c1_i32_166 dim 0 : vector<8x256xf32>, i32 -> vector<8x256xf32>
    %552 = arith.addf %550, %551 : vector<8x256xf32>
    %553 = vector.extract_strided_slice %552 {offsets = [0, 0], sizes = [1, 256], strides = [1, 1]} : vector<8x256xf32> to vector<1x256xf32>
    %554 = vector.extract_strided_slice %539 {offsets = [0, 0], sizes = [16, 1], strides = [1, 1]} : vector<16x4xf32> to vector<16x1xf32>
    %555 = vector.broadcast %554 : vector<16x1xf32> to vector<16x256xf32>
    %556 = arith.mulf %555, %276 : vector<16x256xf32>
    %557 = vector.extract_strided_slice %556 {offsets = [0, 0], sizes = [8, 256], strides = [1, 1]} : vector<16x256xf32> to vector<8x256xf32>
    %558 = vector.extract_strided_slice %556 {offsets = [8, 0], sizes = [8, 256], strides = [1, 1]} : vector<16x256xf32> to vector<8x256xf32>
    %559 = arith.addf %557, %558 : vector<8x256xf32>
    %c4_i32_167 = arith.constant 4 : i32
    %560 = tpu.dynamic_rotate %559 by %c4_i32_167 dim 0 : vector<8x256xf32>, i32 -> vector<8x256xf32>
    %561 = arith.addf %559, %560 : vector<8x256xf32>
    %c2_i32_168 = arith.constant 2 : i32
    %562 = tpu.dynamic_rotate %561 by %c2_i32_168 dim 0 : vector<8x256xf32>, i32 -> vector<8x256xf32>
    %563 = arith.addf %561, %562 : vector<8x256xf32>
    %c1_i32_169 = arith.constant 1 : i32
    %564 = tpu.dynamic_rotate %563 by %c1_i32_169 dim 0 : vector<8x256xf32>, i32 -> vector<8x256xf32>
    %565 = arith.addf %563, %564 : vector<8x256xf32>
    %566 = vector.extract_strided_slice %565 {offsets = [0, 0], sizes = [1, 256], strides = [1, 1]} : vector<8x256xf32> to vector<1x256xf32>
    %567 = arith.addf %553, %566 : vector<1x256xf32>
    %568 = vector.extract_strided_slice %538 {offsets = [0, 1], sizes = [16, 1], strides = [1, 1]} : vector<16x4xf32> to vector<16x1xf32>
    %569 = vector.broadcast %568 : vector<16x1xf32> to vector<16x256xf32>
    %570 = arith.mulf %569, %537 : vector<16x256xf32>
    %571 = vector.extract_strided_slice %570 {offsets = [0, 0], sizes = [8, 256], strides = [1, 1]} : vector<16x256xf32> to vector<8x256xf32>
    %572 = vector.extract_strided_slice %570 {offsets = [8, 0], sizes = [8, 256], strides = [1, 1]} : vector<16x256xf32> to vector<8x256xf32>
    %573 = arith.addf %571, %572 : vector<8x256xf32>
    %c4_i32_170 = arith.constant 4 : i32
    %574 = tpu.dynamic_rotate %573 by %c4_i32_170 dim 0 : vector<8x256xf32>, i32 -> vector<8x256xf32>
    %575 = arith.addf %573, %574 : vector<8x256xf32>
    %c2_i32_171 = arith.constant 2 : i32
    %576 = tpu.dynamic_rotate %575 by %c2_i32_171 dim 0 : vector<8x256xf32>, i32 -> vector<8x256xf32>
    %577 = arith.addf %575, %576 : vector<8x256xf32>
    %c1_i32_172 = arith.constant 1 : i32
    %578 = tpu.dynamic_rotate %577 by %c1_i32_172 dim 0 : vector<8x256xf32>, i32 -> vector<8x256xf32>
    %579 = arith.addf %577, %578 : vector<8x256xf32>
    %580 = vector.extract_strided_slice %579 {offsets = [0, 0], sizes = [1, 256], strides = [1, 1]} : vector<8x256xf32> to vector<1x256xf32>
    %581 = vector.extract_strided_slice %539 {offsets = [0, 1], sizes = [16, 1], strides = [1, 1]} : vector<16x4xf32> to vector<16x1xf32>
    %582 = vector.broadcast %581 : vector<16x1xf32> to vector<16x256xf32>
    %583 = arith.mulf %582, %276 : vector<16x256xf32>
    %584 = vector.extract_strided_slice %583 {offsets = [0, 0], sizes = [8, 256], strides = [1, 1]} : vector<16x256xf32> to vector<8x256xf32>
    %585 = vector.extract_strided_slice %583 {offsets = [8, 0], sizes = [8, 256], strides = [1, 1]} : vector<16x256xf32> to vector<8x256xf32>
    %586 = arith.addf %584, %585 : vector<8x256xf32>
    %c4_i32_173 = arith.constant 4 : i32
    %587 = tpu.dynamic_rotate %586 by %c4_i32_173 dim 0 : vector<8x256xf32>, i32 -> vector<8x256xf32>
    %588 = arith.addf %586, %587 : vector<8x256xf32>
    %c2_i32_174 = arith.constant 2 : i32
    %589 = tpu.dynamic_rotate %588 by %c2_i32_174 dim 0 : vector<8x256xf32>, i32 -> vector<8x256xf32>
    %590 = arith.addf %588, %589 : vector<8x256xf32>
    %c1_i32_175 = arith.constant 1 : i32
    %591 = tpu.dynamic_rotate %590 by %c1_i32_175 dim 0 : vector<8x256xf32>, i32 -> vector<8x256xf32>
    %592 = arith.addf %590, %591 : vector<8x256xf32>
    %593 = vector.extract_strided_slice %592 {offsets = [0, 0], sizes = [1, 256], strides = [1, 1]} : vector<8x256xf32> to vector<1x256xf32>
    %594 = arith.addf %580, %593 : vector<1x256xf32>
    %595 = vector.extract_strided_slice %538 {offsets = [0, 2], sizes = [16, 1], strides = [1, 1]} : vector<16x4xf32> to vector<16x1xf32>
    %596 = vector.broadcast %595 : vector<16x1xf32> to vector<16x256xf32>
    %597 = arith.mulf %596, %537 : vector<16x256xf32>
    %598 = vector.extract_strided_slice %597 {offsets = [0, 0], sizes = [8, 256], strides = [1, 1]} : vector<16x256xf32> to vector<8x256xf32>
    %599 = vector.extract_strided_slice %597 {offsets = [8, 0], sizes = [8, 256], strides = [1, 1]} : vector<16x256xf32> to vector<8x256xf32>
    %600 = arith.addf %598, %599 : vector<8x256xf32>
    %c4_i32_176 = arith.constant 4 : i32
    %601 = tpu.dynamic_rotate %600 by %c4_i32_176 dim 0 : vector<8x256xf32>, i32 -> vector<8x256xf32>
    %602 = arith.addf %600, %601 : vector<8x256xf32>
    %c2_i32_177 = arith.constant 2 : i32
    %603 = tpu.dynamic_rotate %602 by %c2_i32_177 dim 0 : vector<8x256xf32>, i32 -> vector<8x256xf32>
    %604 = arith.addf %602, %603 : vector<8x256xf32>
    %c1_i32_178 = arith.constant 1 : i32
    %605 = tpu.dynamic_rotate %604 by %c1_i32_178 dim 0 : vector<8x256xf32>, i32 -> vector<8x256xf32>
    %606 = arith.addf %604, %605 : vector<8x256xf32>
    %607 = vector.extract_strided_slice %606 {offsets = [0, 0], sizes = [1, 256], strides = [1, 1]} : vector<8x256xf32> to vector<1x256xf32>
    %608 = vector.extract_strided_slice %539 {offsets = [0, 2], sizes = [16, 1], strides = [1, 1]} : vector<16x4xf32> to vector<16x1xf32>
    %609 = vector.broadcast %608 : vector<16x1xf32> to vector<16x256xf32>
    %610 = arith.mulf %609, %276 : vector<16x256xf32>
    %611 = vector.extract_strided_slice %610 {offsets = [0, 0], sizes = [8, 256], strides = [1, 1]} : vector<16x256xf32> to vector<8x256xf32>
    %612 = vector.extract_strided_slice %610 {offsets = [8, 0], sizes = [8, 256], strides = [1, 1]} : vector<16x256xf32> to vector<8x256xf32>
    %613 = arith.addf %611, %612 : vector<8x256xf32>
    %c4_i32_179 = arith.constant 4 : i32
    %614 = tpu.dynamic_rotate %613 by %c4_i32_179 dim 0 : vector<8x256xf32>, i32 -> vector<8x256xf32>
    %615 = arith.addf %613, %614 : vector<8x256xf32>
    %c2_i32_180 = arith.constant 2 : i32
    %616 = tpu.dynamic_rotate %615 by %c2_i32_180 dim 0 : vector<8x256xf32>, i32 -> vector<8x256xf32>
    %617 = arith.addf %615, %616 : vector<8x256xf32>
    %c1_i32_181 = arith.constant 1 : i32
    %618 = tpu.dynamic_rotate %617 by %c1_i32_181 dim 0 : vector<8x256xf32>, i32 -> vector<8x256xf32>
    %619 = arith.addf %617, %618 : vector<8x256xf32>
    %620 = vector.extract_strided_slice %619 {offsets = [0, 0], sizes = [1, 256], strides = [1, 1]} : vector<8x256xf32> to vector<1x256xf32>
    %621 = arith.addf %607, %620 : vector<1x256xf32>
    %622 = vector.extract_strided_slice %538 {offsets = [0, 3], sizes = [16, 1], strides = [1, 1]} : vector<16x4xf32> to vector<16x1xf32>
    %623 = vector.broadcast %622 : vector<16x1xf32> to vector<16x256xf32>
    %624 = arith.mulf %623, %537 : vector<16x256xf32>
    %625 = vector.extract_strided_slice %624 {offsets = [0, 0], sizes = [8, 256], strides = [1, 1]} : vector<16x256xf32> to vector<8x256xf32>
    %626 = vector.extract_strided_slice %624 {offsets = [8, 0], sizes = [8, 256], strides = [1, 1]} : vector<16x256xf32> to vector<8x256xf32>
    %627 = arith.addf %625, %626 : vector<8x256xf32>
    %c4_i32_182 = arith.constant 4 : i32
    %628 = tpu.dynamic_rotate %627 by %c4_i32_182 dim 0 : vector<8x256xf32>, i32 -> vector<8x256xf32>
    %629 = arith.addf %627, %628 : vector<8x256xf32>
    %c2_i32_183 = arith.constant 2 : i32
    %630 = tpu.dynamic_rotate %629 by %c2_i32_183 dim 0 : vector<8x256xf32>, i32 -> vector<8x256xf32>
    %631 = arith.addf %629, %630 : vector<8x256xf32>
    %c1_i32_184 = arith.constant 1 : i32
    %632 = tpu.dynamic_rotate %631 by %c1_i32_184 dim 0 : vector<8x256xf32>, i32 -> vector<8x256xf32>
    %633 = arith.addf %631, %632 : vector<8x256xf32>
    %634 = vector.extract_strided_slice %633 {offsets = [0, 0], sizes = [1, 256], strides = [1, 1]} : vector<8x256xf32> to vector<1x256xf32>
    %635 = vector.extract_strided_slice %539 {offsets = [0, 3], sizes = [16, 1], strides = [1, 1]} : vector<16x4xf32> to vector<16x1xf32>
    %636 = vector.broadcast %635 : vector<16x1xf32> to vector<16x256xf32>
    %637 = arith.mulf %636, %276 : vector<16x256xf32>
    %638 = vector.extract_strided_slice %637 {offsets = [0, 0], sizes = [8, 256], strides = [1, 1]} : vector<16x256xf32> to vector<8x256xf32>
    %639 = vector.extract_strided_slice %637 {offsets = [8, 0], sizes = [8, 256], strides = [1, 1]} : vector<16x256xf32> to vector<8x256xf32>
    %640 = arith.addf %638, %639 : vector<8x256xf32>
    %c4_i32_185 = arith.constant 4 : i32
    %641 = tpu.dynamic_rotate %640 by %c4_i32_185 dim 0 : vector<8x256xf32>, i32 -> vector<8x256xf32>
    %642 = arith.addf %640, %641 : vector<8x256xf32>
    %c2_i32_186 = arith.constant 2 : i32
    %643 = tpu.dynamic_rotate %642 by %c2_i32_186 dim 0 : vector<8x256xf32>, i32 -> vector<8x256xf32>
    %644 = arith.addf %642, %643 : vector<8x256xf32>
    %c1_i32_187 = arith.constant 1 : i32
    %645 = tpu.dynamic_rotate %644 by %c1_i32_187 dim 0 : vector<8x256xf32>, i32 -> vector<8x256xf32>
    %646 = arith.addf %644, %645 : vector<8x256xf32>
    %647 = vector.extract_strided_slice %646 {offsets = [0, 0], sizes = [1, 256], strides = [1, 1]} : vector<8x256xf32> to vector<1x256xf32>
    %648 = arith.addf %634, %647 : vector<1x256xf32>
    %649 = tpu.concatenate %567, %594, %621, %648 in 0 : vector<1x256xf32>, vector<1x256xf32>, vector<1x256xf32>, vector<1x256xf32> -> vector<4x256xf32>
    %650 = vector.broadcast %540 : vector<4x1xf32> to vector<4x256xf32>
    %651 = arith.addf %649, %650 : vector<4x256xf32>
    %c0_188 = arith.constant 0 : index
    %c0_189 = arith.constant 0 : index
    %652 = vector.load %arg10[%c0_188, %c0_189] : memref<4x256xf32, #tpu.memory_space<vmem>>, vector<4x256xf32>
    tpu.vector_store %arg10[%c0_188, %c0_189], %651 {strides = array<i32>} : memref<4x256xf32, #tpu.memory_space<vmem>>, vector<4x256xf32>,
    return
  }
  func.func @transform_0(%arg0: i32) -> (i32, i32) {
    %c0_i32 = arith.constant 0 : i32
    %c0_i32_0 = arith.constant 0 : i32
    return %c0_i32, %arg0 : i32, i32
  }
  func.func @transform_1(%arg0: i32) -> (i32, i32) {
    %c0_i32 = arith.constant 0 : i32
    %c0_i32_0 = arith.constant 0 : i32
    %c0_i32_1 = arith.constant 0 : i32
    return %c0_i32, %c0_i32_0 : i32, i32
  }
  func.func @transform_2(%arg0: i32) -> (i32, i32) {
    %c0_i32 = arith.constant 0 : i32
    %c0_i32_0 = arith.constant 0 : i32
    %c0_i32_1 = arith.constant 0 : i32
    return %c0_i32, %c0_i32_0 : i32, i32
  }
  func.func @transform_3(%arg0: i32) -> (i32, i32) {
    %c0_i32 = arith.constant 0 : i32
    %c0_i32_0 = arith.constant 0 : i32
    %c0_i32_1 = arith.constant 0 : i32
    return %c0_i32, %c0_i32_0 : i32, i32
  }
  func.func @transform_4(%arg0: i32) -> (i32, i32) {
    %c0_i32 = arith.constant 0 : i32
    %c0_i32_0 = arith.constant 0 : i32
    %c0_i32_1 = arith.constant 0 : i32
    return %c0_i32, %c0_i32_0 : i32, i32
  }
  func.func @transform_5(%arg0: i32) -> (i32, i32) {
    %c0_i32 = arith.constant 0 : i32
    %c0_i32_0 = arith.constant 0 : i32
    %c0_i32_1 = arith.constant 0 : i32
    return %c0_i32, %c0_i32_0 : i32, i32
  }
  func.func @transform_6(%arg0: i32) -> (i32, i32) {
    %c0_i32 = arith.constant 0 : i32
    %c0_i32_0 = arith.constant 0 : i32
    %c0_i32_1 = arith.constant 0 : i32
    return %c0_i32, %c0_i32_0 : i32, i32
  }
  func.func @transform_7(%arg0: i32) -> (i32, i32) {
    %c0_i32 = arith.constant 0 : i32
    %c0_i32_0 = arith.constant 0 : i32
    %c0_i32_1 = arith.constant 0 : i32
    return %c0_i32, %c0_i32_0 : i32, i32
  }
  func.func @transform_8(%arg0: i32) -> (i32, i32) {
    %c0_i32 = arith.constant 0 : i32
    %c0_i32_0 = arith.constant 0 : i32
    %c0_i32_1 = arith.constant 0 : i32
    return %c0_i32, %c0_i32_0 : i32, i32
  }
  func.func @transform_9(%arg0: i32) -> (i32, i32) {
    %c0_i32 = arith.constant 0 : i32
    %c0_i32_0 = arith.constant 0 : i32
    return %c0_i32, %arg0 : i32, i32
  }
}

</mosaic_0001>

<bundles_post_ra>
// kernel: tpu_custom_call.1
= control target key start
LH: loop header
LB: loop body
LE: loop exit
PB: predicated region body
PF: predicated region fallthrough
CT: control target
= control target key end

     0   :  { %14 = vsyncpa [#allocation3], 0  ;;  %s3149_s0 = inlined_call_operand.vmem [shape: f32[8,512], index: 0, kind: input, shape index: {}]   ;;  %s3150_s1 = inlined_call_operand.vmem [shape: f32[16,1], index: 1, kind: input, shape index: {}]   ;;  %s3151_s2 = inlined_call_operand.vmem [shape: f32[16,8], index: 2, kind: input, shape index: {}]   ;;  %s3152_s3 = inlined_call_operand.vmem [shape: f32[16,8], index: 3, kind: input, shape index: {}]   ;;  %s3153_s4 = inlined_call_operand.vmem [shape: f32[16,8], index: 4, kind: input, shape index: {}]   ;;  %s3154_s5 = inlined_call_operand.vmem [shape: f32[16,8], index: 5, kind: input, shape index: {}]   ;;  %s3155_s6 = inlined_call_operand.vmem [shape: f32[16,4], index: 6, kind: input, shape index: {}]   ;;  %s3156_s7 = inlined_call_operand.vmem [shape: f32[16,4], index: 7, kind: input, shape index: {}]   ;;  %s3157_s8 = inlined_call_operand.vmem [shape: f32[4,1], index: 8, kind: input, shape index: {}]   ;;  %s3158_s9 = inlined_call_operand.hbm [shape: f32[4,512], index: 9, kind: output, shape index: {}]  }
   0x1   :  { %16 = vsyncpa [#allocation3 + $0x1], 0  ;;  %s2227_s30 = smov 0   ;;  %s2229_s10 = smov 0  }
   0x2   :  { %s2231_s11 = smov 0   ;;  %s2233_s12 = smov 0  }
   0x3 LB: > { %s2248_s13 = sadd.s32 4294967295, %s2167_s12   ;;  %s1957_s14 = sadd.s32 4294967294, %s2167_s12   ;;  %s2167_s12 = sphi %s2233_s12, %s3174_s12   ;;  %s2163_s11 = sphi %s2231_s11, %s3173_s11   ;;  %s2159_s10 = sphi %s2229_s10, %s3172_s10   ;;  %s2155_s30 = sphi %s2227_s30, %s3171_s30  }
   0x4   : > { %s2252_s15 = sadd.s32 1, %s2167_s12   ;;  %s223_s16 = sadd.s32 1, %s2163_s11 }
   0x5   : > { %s220_s17 = ssub.s32 %s2167_s12, %s2252_s15  ;;  %p233_p0 = scmp.ne.s32.totalorder %s2163_s11, %s2159_s10 }
   0x6   : > { %p221_p1 = scmp.eq.s32.totalorder %s220_s17, 0  ;;  %p234_p2 = scmp.eq.s32.totalorder %s2248_s13, 1 }
   0x7   : > { %p239_p3 = scmp.ne.s32.totalorder %s2159_s10, %s2155_s30  ;;  %p240_p4 = scmp.eq.s32.totalorder %s1957_s14, 1 }
   0x8   : > { %s2263_s18 = scalar_select %p221_p1, %s2163_s11, %s223_s16  }
   0x9   : > { %p2265_p5 = por %p234_p2, %p233_p0  ;;  %p2269_p6 = por %p240_p4, %p239_p3 }
   0xa   : > { %p1960_p7 = scmp.ge.s32.totalorder %s2167_s12, 1  ;;  %p291_p8 = scmp.lt.s32.totalorder %s2167_s12, 3 }
   0xc   : > { %p292_p9 = pnand %p1960_p7, %p291_p8 }
   0xd   : > { %s1962_s27 = sshll.u32 (!%p292_p9), %s2248_s13, 1  ;;  %s324_s17 = sand.u32 (!%p292_p9), 1, %s2159_s10  }
   0xe   : > { %295 = sbr.rel (%p292_p9) target bundleno = 446 (0x1be), region = 56  ;;  %p328_p10 = scmp.lt.s32.totalorder (!%p292_p9), %s1962_s27, 3 }
   0xf   : > { %s1971_s22 = sshll.u32 (!%p292_p9), %s2248_s13, 3  ;;  %s1882_s13 = scalar_lea.sflag (!%p292_p9), [#allocation3], %s324_s17 }
  0x10   : > { %s1893_s25 = scalar_lea.hbm (!%p292_p9), %s3158_s9, %s1971_s22 }
  0x11   : > { %s1897_s28 = sshll.u32 (!%p292_p9), %s1893_s25, 4  ;;  %s1898_s28 = int_to_ptr.hbm [resolvable:$true] %s1897_s28 }
  0x12   : > { %s2119_s29 = sshra.s32 (!%p292_p9), %s1898_s28, 4  ;;  %s2120_s29 = int_to_ptr.hbm [resolvable:$true] %s2119_s29 }
  0x13   : > { %v372_v0 = vld [vmem:[%s3151_s2] sm:$0xff]  ;;  %v2169_v2 = vmov 1   ;;  %v2170_v3 = vmov 0   ;;  %v373_v4 = vld [vmem:[%s3151_s2 + $0x8] sm:$0xff]  ;;  %v3159_v6 = vmov 3   ;;  %v3161_v7 = vmov 2   ;;  %p2126_p0 = scmp.lt.s32.totalorder %s2120_s29, %s3158_s9 }
  0x14   : > { %v336_v1 = vld [vmem:[%s3150_s1] sm:$0xff]  ;;  %2021 = vset.pattern.permute.xlu2 %v2169_v2  ;;  %2020 = vset.pattern.permute.xlu1 %v2170_v3  ;;  %v337_v5 = vld [vmem:[%s3150_s1 + $0x8] sm:$0xff]  ;;  %v2173_v8 = vmov 4   ;;  %v2174_v9 = vmov 7   ;;  %v2175_v10 = vmov 5   ;;  %v2176_v12 = vmov 6  }
  0x15   : > { %2019 = vset.pattern.permute.xlu0 %v2170_v3  ;;  %413 = vperm.xlu2 %2021, %v372_v0   ;;  %v2300_v11 = vld [vmem:[%s3152_s3 + $0x8] sm:$0xff]  ;;  %v374_v13 = vld [vmem:[%s3152_s3] sm:$0xff]  ;;  %s3176_s27 = smov (!%p328_p10, %s1962_s27), 3  ;;  %vm964_vm0 = vcmask 1040384   ;;  %vm967_vm1 = vcmask 1041408   ;;  %vm970_vm2 = vcmask 1042432  }
  0x16   : > { %382 = vperm.xlu1 %2020, %v372_v0   ;;  %344 = vperm.xlu0 %2019, %v336_v1   ;;  %v2321_v14 = vld [vmem:[%s3153_s4] sm:$0xff]  ;;  %v2330_v15 = vld [vmem:[%s3153_s4 + $0x8] sm:$0xff]  ;;  %s1963_s14 = sshll.u32 %s3176_s27, 3  ;;  %vm973_vm3 = vcmask 1043456   ;;  %vm976_vm4 = vcmask 1044480   ;;  %vm979_vm5 = vcmask 1045504  }
  0x17   : > { %v2340_v16 = vld [vmem:[%s3154_s5] sm:$0xff]  ;;  %v2352_v18 = vld [vmem:[%s3154_s5 + $0x8] sm:$0xff]  ;;  %s331_s21 = scalar_lea.vmem %s3149_s0, %s1963_s14  ;;  %vm982_vm6 = vcmask 1046528   ;;  %s2121_s14 = scalar_lea.hbm %s2120_s29, 8 }
  0x18   : > { %v334_v21 = vld [vmem:[%s331_s21] sm:$0xff]  ;;  %v335_v22 = vld [vmem:[%s331_s21 + $0x8] sm:$0xff]  ;;  %s1961_s21 = sshll.u32 %s324_s17, 3  ;;  %p2122_p11 = scmp.ne.s32.totalorder %s2120_s29, %s2121_s14 }
  0x19   : > { %v1964_v23 = vclamps-f32 %v334_v21, 3.0  ;;  %v1965_v24 = vclamps-f32 %v335_v22, 3.0  ;;  %v1619_v25 = vld [vmem:[%s3155_s6] sm:$0xff]  ;;  %v2393_v46 = vld [vmem:[%s3155_s6 + $0x8] sm:$0xff]  ;;  %s326_s26 = scalar_lea.vmem [#allocation2], %s1961_s21  ;;  %s2125_s21 = scalar_lea.hbm %s3158_s9, 16 }
  0x1a   : > { %v2440_v21 = vld [vmem:[%s3156_s7] sm:$0xff]  ;;  %s1895_s27 = sshll.u32 %s326_s26, 4  ;;  %p2123_p12 = pnand %p2122_p11, %p2265_p5  ;;  %s1896_s27 = int_to_ptr.vmem [resolvable:$true] %s1895_s27 }
  0x1b   : > { %p2127_p1 = scmp.lt.s32.totalorder %s2125_s21, %s2121_s14 }
  0x1c   : > { %p2124_p13 = pneg %p2123_p12 }
  0x1d   : > { %417 = vperm.xlu2 %2021, %v373_v4   ;;  %p2128_p2 = por %p2127_p1, %p2126_p0 }
  0x1e   : > { %387 = vperm.xlu1 %2020, %v373_v4   ;;  %349 = vperm.xlu0 %2019, %v337_v5  }
  0x1f   : > { %p2129_p3 = pnand %p2128_p2, %p2124_p13 }
  0x25   : > { %2024 = vset.pattern.permute.xlu2 %v3159_v6 }
  0x26   : > { %2023 = vset.pattern.permute.xlu1 %v3161_v7  ;;  %2022 = vset.pattern.permute.xlu0 %v3161_v7 }
  0x27   : > { %473 = vperm.xlu2 %2024, %v372_v0   ;;  %447 = vperm.xlu1 %2023, %v373_v4  }
  0x28   : > { %443 = vperm.xlu0 %2022, %v372_v0  }
  0x2f   : > { %2026 = vset.pattern.permute.xlu2 %v2173_v8  ;;  %2025 = vset.pattern.permute.xlu1 %v3159_v6 }
  0x30   : > { %2031 = vset.pattern.permute.xlu0 %v2174_v9  ;;  %503 = vperm.xlu2 %2026, %v372_v0  }
  0x31   : > { %477 = vperm.xlu1 %2025, %v373_v4   ;;  %593 = vperm.xlu0 %2031, %v372_v0  }
  0x38   : > { %2028 = vset.pattern.permute.xlu2 %v2175_v10 }
  0x39   : > { %2027 = vset.pattern.permute.xlu1 %v2175_v10  ;;  %2036 = vset.pattern.permute.xlu0 %v2169_v2 }
  0x3a   : > { %537 = vperm.xlu2 %2028, %v373_v4   ;;  %533 = vperm.xlu1 %2027, %v372_v0  }
  0x3b   : > { %661 = vperm.xlu0 %2036, %v2300_v11  }
  0x42   : > { %2030 = vset.pattern.permute.xlu2 %v2176_v12  ;;  %2029 = vset.pattern.permute.xlu1 %v2176_v12 }
  0x43   : > { %2037 = vset.pattern.permute.xlu0 %v2173_v8  ;;  %567 = vperm.xlu2 %2030, %v373_v4  }
  0x44   : > { %563 = vperm.xlu1 %2029, %v372_v0   ;;  %507 = vperm.xlu0 %2037, %v373_v4  }
  0x4b   : > { %2033 = vset.pattern.permute.xlu2 %v2170_v3 }
  0x4c   : > { %2032 = vset.pattern.permute.xlu1 %v2174_v9  ;;  %753 = vperm.xlu0 %2037, %v374_v13  }
  0x4d   : > { %624 = vperm.xlu2 %2033, %v374_v13   ;;  %597 = vperm.xlu1 %2032, %v373_v4  }
  0x54   : > { %2046 = vset.pattern.permute.xlu0 %v2176_v12 }
  0x55   : > { %2035 = vset.pattern.permute.xlu2 %v2169_v2  ;;  %2034 = vset.pattern.permute.xlu1 %v2170_v3 }
  0x56   : > { %821 = vperm.xlu0 %2046, %v2300_v11   ;;  %657 = vperm.xlu2 %2035, %v374_v13  }
  0x57   : > { %629 = vperm.xlu1 %2034, %v2300_v11  }
  0x5e   : > { %1190 = vperm.xlu0 %2046, %v2321_v14   ;;  %2039 = vset.pattern.permute.xlu2 %v3161_v7 }
  0x5f   : > { %2038 = vset.pattern.permute.xlu1 %v3161_v7  ;;  %693 = vperm.xlu2 %2039, %v2300_v11  }
  0x60   : > { %689 = vperm.xlu1 %2038, %v374_v13  }
  0x66   : > { %2059 = vset.pattern.permute.xlu0 %v3159_v6 }
  0x67   : > { %1104 = vperm.xlu0 %2059, %v2330_v15   ;;  %2041 = vset.pattern.permute.xlu2 %v3159_v6 }
  0x68   : > { %2040 = vset.pattern.permute.xlu1 %v3159_v6  ;;  %725 = vperm.xlu2 %2041, %v2300_v11  }
  0x69   : > { %721 = vperm.xlu1 %2040, %v374_v13  }
  0x6f   : > { %1348 = vperm.xlu0 %2059, %v2340_v16   ;;  %v2343_v17 = vpop.permute.xlu2 %413 }
  0x70   : > { %2043 = vset.pattern.permute.xlu2 %v2175_v10 }
  0x71   : > { %2042 = vset.pattern.permute.xlu1 %v2173_v8  ;;  %785 = vperm.xlu2 %2043, %v374_v13  }
  0x72   : > { %757 = vperm.xlu1 %2042, %v2300_v11  }
  0x77   : > { %2072 = vset.pattern.permute.xlu0 %v2175_v10  ;;  %v2355_v19 = vpop.permute.xlu2 %417 }
  0x78   : > { %1416 = vperm.xlu0 %2072, %v2352_v18  }
  0x79   : > { %2045 = vset.pattern.permute.xlu2 %v2176_v12 }
  0x7a   : > { %2044 = vset.pattern.permute.xlu1 %v2175_v10  ;;  %817 = vperm.xlu2 %2045, %v374_v13  }
  0x7b   : > { %789 = vperm.xlu1 %2044, %v2300_v11  }
  0x80   : > { %2073 = vset.pattern.permute.xlu0 %v2170_v3 }
  0x81   : > { %1256 = vperm.xlu0 %2073, %v2352_v18   ;;  %v474_v20 = vpop.permute.xlu2 %473 }
  0x82   : > { %2048 = vset.pattern.permute.xlu2 %v2174_v9 }
  0x83   : > { %2047 = vset.pattern.permute.xlu1 %v2174_v9  ;;  %853 = vperm.xlu2 %2048, %v2300_v11  }
  0x84   : > { %849 = vperm.xlu1 %2047, %v374_v13  }
  0x88   : > { %v383_v26 = vpop.permute.xlu1 %382  ;;  %v345_v27 = vpop.permute.xlu0 %344 }
  0x89   : > { %1626 = vperm.xlu0 %2073, %v1619_v25   ;;  %v352_v28 = vsub.f32 %v1964_v23, %v345_v27  ;;  %v353_v29 = vsub.f32 %v1965_v24, %v345_v27 }
  0x8a   : > { %v504_v30 = vpop.permute.xlu2 %503 }
  0x8b   : > { %v356_v31 = vmul.f32 0.5, %v352_v28  ;;  %v357_v32 = vmul.f32 0.5, %v353_v29  ;;  %2050 = vset.pattern.permute.xlu2 %v2170_v3 }
  0x8c   : > { %2049 = vset.pattern.permute.xlu1 %v2170_v3  ;;  %1014 = vperm.xlu2 %2050, %v2330_v15  }
  0x8d   : > { %2091 = vtanh.f32 %v356_v31  ;;  %1009 = vperm.xlu1 %2049, %v2321_v14  }
  0x8e   : > { %2093 = vtanh.f32 %v357_v32 }
  0x90   : > { %v2376_v33 = vpop.permute.xlu1 %387  ;;  %v350_v34 = vpop.permute.xlu0 %349 }
  0x91   : > { %2078 = vset.pattern.permute.xlu0 %v2169_v2  ;;  %v354_v35 = vsub.f32 %v1964_v23, %v350_v34  ;;  %v355_v36 = vsub.f32 %v1965_v24, %v350_v34 }
  0x92   : > { %1040 = vperm.xlu0 %2078, %v2321_v14  }
  0x93   : > { %v2092_v37 = vpop.eup %2091  ;;  %v358_v38 = vmul.f32 0.5, %v354_v35  ;;  %v359_v39 = vmul.f32 0.5, %v355_v36 }
  0x94   : > { %v2094_v40 = vpop.eup %2093  ;;  %v364_v41 = vmul.f32 0.5, %v2092_v37  ;;  %2052 = vset.pattern.permute.xlu2 %v3161_v7  ;;  %v2381_v42 = vpop.permute.xlu2 %537 }
  0x95   : > { %v365_v43 = vmul.f32 0.5, %v2094_v40  ;;  %2095 = vtanh.f32 %v358_v38  ;;  %2051 = vset.pattern.permute.xlu1 %v2169_v2  ;;  %1070 = vperm.xlu2 %2052, %v2321_v14  }
  0x96   : > { %v2385_v44 = vadd.f32 0.5, %v364_v41  ;;  %2097 = vtanh.f32 %v359_v39  ;;  %1044 = vperm.xlu1 %2051, %v2330_v15  }
  0x97   : > { %v2388_v45 = vadd.f32 0.5, %v365_v43 }
  0x98   : > { %v2396_v47 = vsub.f32 1.0, %v2385_v44 }
  0x99   : > { %v2399_v48 = vsub.f32 1.0, %v2388_v45  ;;  %v448_v49 = vpop.permute.xlu1 %447 }
  0x9a   : > { %v2402_v50 = vmul.f32 %v474_v20, %v2396_v47  ;;  %v2405_v51 = vmul.f32 %v504_v30, %v2396_v47  ;;  %1687 = vperm.xlu0 %2078, %v2393_v46   ;;  %v444_v52 = vpop.permute.xlu0 %443  ;;  %v390_v53 = vmul.f32 %v383_v26, %v2396_v47  ;;  %v420_v54 = vmul.f32 %v2343_v17, %v2396_v47 }
  0x9b   : > { %v2096_v55 = vpop.eup %2095  ;;  %v2412_v56 = vmul.f32 %v474_v20, %v2399_v48  ;;  %v2415_v57 = vmul.f32 %v504_v30, %v2399_v48  ;;  %v391_v58 = vmul.f32 %v383_v26, %v2399_v48  ;;  %v421_v59 = vmul.f32 %v2343_v17, %v2399_v48 }
  0x9c   : > { %v2098_v60 = vpop.eup %2097  ;;  %v366_v61 = vmul.f32 0.5, %v2096_v55  ;;  %v450_v1 = vmul.f32 %v444_v52, %v2396_v47  ;;  %v451_v5 = vmul.f32 %v444_v52, %v2399_v48  ;;  %v484_v11 = vsub.f32 1.0, %v2402_v50 }
  0x9d   : > { %v367_v62 = vmul.f32 0.5, %v2098_v60  ;;  %2054 = vset.pattern.permute.xlu2 %v3159_v6  ;;  %v2421_v63 = vpop.permute.xlu2 %567  ;;  %v485_v13 = vsub.f32 1.0, %v2412_v56  ;;  %v394_v20 = vsub.f32 1.0, %v390_v53  ;;  %v395_v23 = vsub.f32 1.0, %v391_v58 }
  0x9e   : > { %v2423_v0 = vadd.f32 0.5, %v366_v61  ;;  %2053 = vset.pattern.permute.xlu1 %v3161_v7  ;;  %1100 = vperm.xlu2 %2054, %v2321_v14   ;;  %v424_v24 = vsub.f32 1.0, %v420_v54  ;;  %v425_v25 = vsub.f32 1.0, %v421_v59  ;;  %v454_v29 = vsub.f32 1.0, %v450_v1 }
  0x9f   : > { %v2428_v4 = vadd.f32 0.5, %v367_v62  ;;  %1074 = vperm.xlu1 %2053, %v2330_v15   ;;  %v455_v34 = vsub.f32 1.0, %v451_v5 }
  0xa0   : > { %v2435_v17 = vsub.f32 1.0, %v2423_v0 }
  0xa1   : > { %v2443_v22 = vsub.f32 1.0, %v2428_v4 }
  0xa2   : > { %v452_v26 = vmul.f32 %v448_v49, %v2435_v17  ;;  %v392_v27 = vmul.f32 %v2376_v33, %v2435_v17  ;;  %v422_v28 = vmul.f32 %v2355_v19, %v2435_v17  ;;  %2085 = vset.pattern.permute.xlu0 %v3161_v7  ;;  %v2459_v39 = vmul.f32 %v2381_v42, %v2435_v17 }
  0xa3   : > { %v453_v30 = vmul.f32 %v448_v49, %v2443_v22  ;;  %v393_v31 = vmul.f32 %v2376_v33, %v2443_v22  ;;  %v423_v32 = vmul.f32 %v2355_v19, %v2443_v22  ;;  %1763 = vperm.xlu0 %2085, %v2440_v21   ;;  %v478_v35 = vpop.permute.xlu1 %477  ;;  %v2461_v40 = vpop.permute.xlu0 %593  ;;  %v2465_v33 = vmul.f32 %v2381_v42, %v2443_v22 }
  0xa4   : > { %v456_v36 = vsub.f32 1.0, %v452_v26  ;;  %v396_v37 = vsub.f32 1.0, %v392_v27  ;;  %v426_v38 = vsub.f32 1.0, %v422_v28  ;;  %v482_v53 = vmul.f32 %v478_v35, %v2435_v17 }
  0xa5   : > { %v457_v41 = vsub.f32 1.0, %v453_v30  ;;  %v397_v43 = vsub.f32 1.0, %v393_v31  ;;  %v427_v49 = vsub.f32 1.0, %v423_v32  ;;  %v483_v58 = vmul.f32 %v478_v35, %v2443_v22 }
  0xa6   : > { %v398_v19 = vmul.f32 %v396_v37, %v394_v20  ;;  %v428_v50 = vmul.f32 %v426_v38, %v424_v24  ;;  %v458_v52 = vmul.f32 %v456_v36, %v454_v29  ;;  %2056 = vset.pattern.permute.xlu2 %v2173_v8  ;;  %v486_v62 = vsub.f32 1.0, %v482_v53  ;;  %v2478_v24 = vld [vmem:[%s3156_s7 + $0x8] sm:$0xff] }
  0xa7   : > { %v399_v54 = vmul.f32 %v397_v43, %v395_v23  ;;  %v429_v55 = vmul.f32 %v427_v49, %v425_v25  ;;  %v459_v56 = vmul.f32 %v457_v41, %v455_v34  ;;  %2055 = vset.pattern.permute.xlu1 %v2173_v8  ;;  %v2471_v59 = vpop.permute.xlu2 %624  ;;  %1134 = vperm.xlu2 %2056, %v2330_v15   ;;  %v487_v23 = vsub.f32 1.0, %v483_v58 }
  0xa8   : > { %v400_v60 = vrot.slane %v398_v19, 4  ;;  %v430_v61 = vrot.slane %v428_v50, 4  ;;  %v460_v42 = vrot.slane %v458_v52, 4  ;;  %1130 = vperm.xlu1 %2055, %v2321_v14   ;;  %v488_v28 = vmul.f32 %v486_v62, %v484_v11 }
  0xa9   : > { %v401_v1 = vrot.slane %v399_v54, 4  ;;  %v431_v5 = vrot.slane %v429_v55, 4  ;;  %v461_v20 = vrot.slane %v459_v56, 4  ;;  %v489_v32 = vmul.f32 %v487_v23, %v485_v13 }
  0xaa   : > { %v402_v25 = vmul.f32 %v400_v60, %v398_v19  ;;  %v432_v26 = vmul.f32 %v430_v61, %v428_v50  ;;  %v462_v27 = vmul.f32 %v460_v42, %v458_v52  ;;  %v490_v37 = vrot.slane %v488_v28, 4 }
  0xab   : > { %v403_v29 = vmul.f32 %v401_v1, %v399_v54  ;;  %v433_v30 = vmul.f32 %v431_v5, %v429_v55  ;;  %v463_v31 = vmul.f32 %v461_v20, %v459_v56  ;;  %2088 = vset.pattern.permute.xlu0 %v3159_v6  ;;  %v491_v19 = vrot.slane %v489_v32, 4 }
  0xac   : > { %v404_v34 = vrot.slane %v402_v25, 6  ;;  %v434_v35 = vrot.slane %v432_v26, 6  ;;  %v464_v36 = vrot.slane %v462_v27, 6  ;;  %1821 = vperm.xlu0 %2088, %v2478_v24   ;;  %v534_v38 = vpop.permute.xlu1 %533  ;;  %v492_v53 = vmul.f32 %v490_v37, %v488_v28 }
  0xad   : > { %v405_v41 = vrot.slane %v403_v29, 6  ;;  %v435_v43 = vrot.slane %v433_v30, 6  ;;  %v465_v49 = vrot.slane %v463_v31, 6  ;;  %v662_v54 = vpop.permute.xlu0 %661  ;;  %v493_v58 = vmul.f32 %v491_v19, %v489_v32 }
  0xae   : > { %v406_v11 = vmul.f32 %v404_v34, %v402_v25  ;;  %v436_v50 = vmul.f32 %v434_v35, %v432_v26  ;;  %v466_v52 = vmul.f32 %v464_v36, %v462_v27  ;;  %v494_v62 = vrot.slane %v492_v53, 6 }
  0xaf   : > { %v407_v13 = vmul.f32 %v405_v41, %v403_v29  ;;  %v437_v55 = vmul.f32 %v435_v43, %v433_v30  ;;  %v467_v56 = vmul.f32 %v465_v49, %v463_v31  ;;  %2058 = vset.pattern.permute.xlu2 %v2175_v10  ;;  %v495_v25 = vrot.slane %v493_v58, 6 }
  0xb0   : > { %v408_v60 = vrot.slane %v406_v11, 7  ;;  %v438_v61 = vrot.slane %v436_v50, 7  ;;  %v468_v42 = vrot.slane %v466_v52, 7  ;;  %2057 = vset.pattern.permute.xlu1 %v2175_v10  ;;  %v2484_v1 = vpop.permute.xlu2 %657  ;;  %1164 = vperm.xlu2 %2058, %v2330_v15   ;;  %v496_v29 = vmul.f32 %v494_v62, %v492_v53 }
  0xb1   : > { %v409_v5 = vrot.slane %v407_v13, 7  ;;  %v439_v20 = vrot.slane %v437_v55, 7  ;;  %v469_v23 = vrot.slane %v467_v56, 7  ;;  %1160 = vperm.xlu1 %2057, %v2321_v14   ;;  %v497_v34 = vmul.f32 %v495_v25, %v493_v58 }
  0xb2   : > { %v410_v26 = vmul.f32 %v408_v60, %v406_v11  ;;  %v440_v27 = vmul.f32 %v438_v61, %v436_v50  ;;  %v470_v28 = vmul.f32 %v468_v42, %v466_v52  ;;  %v498_v37 = vrot.slane %v496_v29, 7 }
  0xb3   : > { %v411_v30 = vmul.f32 %v409_v5, %v407_v13  ;;  %v441_v31 = vmul.f32 %v439_v20, %v437_v55  ;;  %v471_v32 = vmul.f32 %v469_v23, %v467_v56  ;;  %v2490_v41 = vmul.f32 %v2461_v40, %v2396_v47 }
  0xb4   : > { %v882_v35 = vrot.slane %v440_v27, 7  ;;  %v888_v36 = vrot.slane %v470_v28, 6  ;;  %2090 = vset.pattern.permute.xlu0 %v2170_v3  ;;  %v499_v19 = vrot.slane %v497_v34, 7  ;;  %v2495_v11 = vmul.f32 %v2461_v40, %v2399_v48 }
  0xb5   : > { %v883_v43 = vrot.slane %v441_v31, 7  ;;  %v889_v49 = vrot.slane %v471_v32, 6  ;;  %v546_v52 = vsub.f32 1.0, %v2459_v39  ;;  %v500_v53 = vmul.f32 %v498_v37, %v496_v29 }
  0xb6   : > { %v965_v50 = vsel %vm964_vm0, %v410_v26, %v882_v35  ;;  %v564_v13 = vpop.permute.xlu1 %563  ;;  %v547_v58 = vsub.f32 1.0, %v2465_v33  ;;  %v501_v60 = vmul.f32 %v499_v19, %v497_v34  ;;  %v572_v40 = vmul.f32 %v2421_v63, %v2435_v17  ;;  %v508_v39 = vpop.permute.xlu0 %507 }
  0xb7   : > { %v966_v55 = vsel %vm964_vm0, %v411_v30, %v883_v43  ;;  %v968_v56 = vsel %vm967_vm1, %v965_v50, %v888_v36  ;;  %v894_v42 = vrot.slane %v500_v53, 5  ;;  %v573_v62 = vmul.f32 %v2421_v63, %v2443_v22 }
  0xb8   : > { %v969_v61 = vsel %vm967_vm1, %v966_v55, %v889_v49  ;;  %v895_v5 = vrot.slane %v501_v60, 5  ;;  %v540_v20 = vmul.f32 %v534_v38, %v2396_v47  ;;  %v541_v23 = vmul.f32 %v534_v38, %v2399_v48  ;;  %2061 = vset.pattern.permute.xlu2 %v2174_v9 }
  0xb9   : > { %v666_v25 = vmul.f32 %v662_v54, %v2423_v0  ;;  %2060 = vset.pattern.permute.xlu1 %v2176_v12  ;;  %v2512_v33 = vpop.permute.xlu2 %693  ;;  %v2515_v26 = vsel %vm970_vm2, %v968_v56, %v894_v42  ;;  %v667_v27 = vmul.f32 %v662_v54, %v2428_v4  ;;  %v2520_v63 = vmul.f32 %v2471_v59, %v2385_v44 }
  0xba   : > { %1220 = vperm.xlu2 %2061, %v2321_v14   ;;  %1194 = vperm.xlu1 %2060, %v2330_v15   ;;  %v2525_v38 = vsel %vm970_vm2, %v969_v61, %v895_v5  ;;  %v544_v28 = vsub.f32 1.0, %v540_v20  ;;  %v545_v29 = vsub.f32 1.0, %v541_v23  ;;  %v514_v30 = vsub.f32 1.0, %v2405_v51 }
  0xbb   : > { %v576_v31 = vsub.f32 1.0, %v572_v40  ;;  %v2530_v32 = vmul.f32 %v2471_v59, %v2388_v45  ;;  %v570_v54 = vmul.f32 %v564_v13, %v2396_v47  ;;  %v577_v34 = vsub.f32 1.0, %v573_v62 }
  0xbc   : > { %v548_v35 = vmul.f32 %v546_v52, %v544_v28  ;;  %v549_v36 = vmul.f32 %v547_v58, %v545_v29  ;;  %v571_v14 = vmul.f32 %v564_v13, %v2399_v48  ;;  %v515_v37 = vsub.f32 1.0, %v2415_v57 }
  0xbd   : > { %v670_v43 = vsub.f32 1.0, %v666_v25  ;;  %v671_v49 = vsub.f32 1.0, %v667_v27  ;;  %v574_v19 = vsub.f32 1.0, %v570_v54  ;;  %v512_v55 = vmul.f32 %v508_v39, %v2435_v17 }
  0xbe   : > { %v550_v50 = vrot.slane %v548_v35, 4  ;;  %v551_v53 = vrot.slane %v549_v36, 4  ;;  %v575_v51 = vsub.f32 1.0, %v571_v14  ;;  %v513_v47 = vmul.f32 %v508_v39, %v2443_v22  ;;  %v2543_v57 = vpop.permute.xlu0 %753 }
  0xbf   : > { %v2536_v56 = vpop.permute.xlu1 %597  ;;  %v578_v59 = vmul.f32 %v576_v31, %v574_v19  ;;  %v664_v52 = vmul.f32 %v2484_v1, %v2385_v44  ;;  %v665_v48 = vmul.f32 %v2484_v1, %v2388_v45  ;;  %v516_v61 = vsub.f32 1.0, %v512_v55 }
  0xc0   : > { %v552_v13 = vmul.f32 %v550_v50, %v548_v35  ;;  %v553_v58 = vmul.f32 %v551_v53, %v549_v36  ;;  %v579_v60 = vmul.f32 %v577_v34, %v575_v51  ;;  %v517_v40 = vsub.f32 1.0, %v513_v47 }
  0xc1   : > { %v580_v42 = vrot.slane %v578_v59, 4  ;;  %v668_v62 = vsub.f32 1.0, %v664_v52  ;;  %v669_v5 = vsub.f32 1.0, %v665_v48  ;;  %v518_v1 = vmul.f32 %v516_v61, %v514_v30 }
  0xc2   : > { %2063 = vset.pattern.permute.xlu2 %v2170_v3  ;;  %2062 = vset.pattern.permute.xlu1 %v2174_v9  ;;  %v2547_v39 = vpop.permute.xlu2 %725  ;;  %v554_v20 = vrot.slane %v552_v13, 6  ;;  %v555_v23 = vrot.slane %v553_v58, 6  ;;  %v581_v25 = vrot.slane %v579_v60, 4  ;;  %v519_v28 = vmul.f32 %v517_v40, %v515_v37 }
  0xc3   : > { %1251 = vperm.xlu2 %2063, %v2340_v16   ;;  %1224 = vperm.xlu1 %2062, %v2330_v15   ;;  %v582_v27 = vmul.f32 %v580_v42, %v578_v59  ;;  %v672_v29 = vmul.f32 %v670_v43, %v668_v62  ;;  %v673_v31 = vmul.f32 %v671_v49, %v669_v5  ;;  %v520_v36 = vrot.slane %v518_v1, 4 }
  0xc4   : > { %v556_v54 = vmul.f32 %v554_v20, %v552_v13  ;;  %v557_v34 = vmul.f32 %v555_v23, %v553_v58  ;;  %v583_v35 = vmul.f32 %v581_v25, %v579_v60  ;;  %v521_v19 = vrot.slane %v519_v28, 4 }
  0xc5   : > { %v584_v14 = vrot.slane %v582_v27, 6  ;;  %v674_v50 = vrot.slane %v672_v29, 4  ;;  %v675_v53 = vrot.slane %v673_v31, 4  ;;  %v522_v47 = vmul.f32 %v520_v36, %v518_v1 }
  0xc6   : > { %v558_v51 = vrot.slane %v556_v54, 7  ;;  %v585_v55 = vrot.slane %v583_v35, 6  ;;  %v523_v52 = vmul.f32 %v521_v19, %v519_v28  ;;  %v559_v15 = vrot.slane %v557_v34, 7 }
  0xc7   : > { %v586_v30 = vmul.f32 %v584_v14, %v582_v27  ;;  %v676_v48 = vmul.f32 %v674_v50, %v672_v29  ;;  %v677_v61 = vmul.f32 %v675_v53, %v673_v31  ;;  %v524_v37 = vrot.slane %v522_v47, 6 }
  0xc8   : > { %v587_v59 = vmul.f32 %v585_v55, %v583_v35  ;;  %v525_v49 = vrot.slane %v523_v52, 6  ;;  %v2553_v60 = vpop.permute.xlu0 %821  ;;  %v604_v42 = vsub.f32 1.0, %v2490_v41  ;;  %v560_v20 = vmul.f32 %v558_v51, %v556_v54 }
  0xc9   : > { %v2551_v43 = vpop.permute.xlu1 %629  ;;  %v678_v13 = vrot.slane %v676_v48, 6  ;;  %v679_v58 = vrot.slane %v677_v61, 6  ;;  %v588_v40 = vrot.slane %v586_v30, 7  ;;  %v526_v62 = vmul.f32 %v524_v37, %v522_v47 }
  0xca   : > { %v589_v23 = vrot.slane %v587_v59, 7  ;;  %v527_v25 = vmul.f32 %v525_v49, %v523_v52  ;;  %v605_v27 = vsub.f32 1.0, %v2495_v11  ;;  %v561_v28 = vmul.f32 %v559_v15, %v557_v34 }
  0xcb   : > { %2065 = vset.pattern.permute.xlu2 %v2169_v2  ;;  %2064 = vset.pattern.permute.xlu1 %v2169_v2  ;;  %v2558_v5 = vpop.permute.xlu2 %785  ;;  %v680_v1 = vmul.f32 %v678_v13, %v676_v48  ;;  %v636_v29 = vsub.f32 1.0, %v2520_v63  ;;  %v528_v41 = vrot.slane %v526_v62, 7  ;;  %v637_v31 = vsub.f32 1.0, %v2530_v32 }
  0xcc   : > { %1288 = vperm.xlu2 %2065, %v2352_v18   ;;  %1284 = vperm.xlu1 %2064, %v2340_v16   ;;  %v529_v35 = vrot.slane %v527_v25, 7  ;;  %v681_v36 = vmul.f32 %v679_v58, %v677_v61  ;;  %v590_v14 = vmul.f32 %v588_v40, %v586_v30  ;;  %v906_v19 = vrot.slane %v560_v20, 3 }
  0xcd   : > { %v530_v54 = vmul.f32 %v528_v41, %v526_v62  ;;  %v591_v50 = vmul.f32 %v589_v23, %v587_v59  ;;  %v682_v51 = vrot.slane %v680_v1, 7  ;;  %v907_v11 = vrot.slane %v561_v28, 3 }
  0xce   : > { %v531_v53 = vmul.f32 %v529_v35, %v527_v25  ;;  %v602_v55 = vmul.f32 %v2536_v56, %v2435_v17  ;;  %v603_v47 = vmul.f32 %v2536_v56, %v2443_v22  ;;  %v683_v48 = vrot.slane %v681_v36, 7 }
  0xcf   : > { %v900_v34 = vrot.slane %v530_v54, 4  ;;  %v2571_v30 = vmul.f32 %v2512_v33, %v2423_v0  ;;  %v2575_v61 = vmul.f32 %v2512_v33, %v2428_v4  ;;  %v912_v59 = vrot.slane %v590_v14, 2 }
  0xd0   : > { %v901_v52 = vrot.slane %v531_v53, 4  ;;  %v606_v49 = vsub.f32 1.0, %v602_v55  ;;  %v607_v17 = vsub.f32 1.0, %v603_v47  ;;  %v913_v13 = vrot.slane %v591_v50, 2  ;;  %v2584_v40 = vpop.permute.xlu0 %1190 }
  0xd1   : > { %v974_v37 = vsel %vm973_vm3, %v2515_v26, %v900_v34  ;;  %v2582_v58 = vmul.f32 %v682_v51, %v680_v1  ;;  %v2595_v25 = vmul.f32 %v683_v48, %v681_v36  ;;  %v702_v1 = vsub.f32 1.0, %v2571_v30 }
  0xd2   : > { %v690_v15 = vpop.permute.xlu1 %689  ;;  %v975_v22 = vsel %vm973_vm3, %v2525_v38, %v901_v52  ;;  %v977_v56 = vsel %vm976_vm4, %v974_v37, %v906_v19  ;;  %v608_v26 = vmul.f32 %v606_v49, %v604_v42  ;;  %v609_v23 = vmul.f32 %v607_v17, %v605_v27 }
  0xd3   : > { %v978_v62 = vsel %vm976_vm4, %v975_v22, %v907_v11  ;;  %v2589_v20 = vsel %vm979_vm5, %v977_v56, %v912_v59  ;;  %v703_v28 = vsub.f32 1.0, %v2575_v61  ;;  %v634_v42 = vmul.f32 %v2551_v43, %v2423_v0 }
  0xd4   : > { %2067 = vset.pattern.permute.xlu2 %v3161_v7  ;;  %v818_v33 = vpop.permute.xlu2 %817  ;;  %2066 = vset.pattern.permute.xlu1 %v3161_v7  ;;  %v2593_v38 = vsel %vm979_vm5, %v978_v62, %v913_v13  ;;  %v610_v41 = vrot.slane %v608_v26, 4  ;;  %v611_v35 = vrot.slane %v609_v23, 4  ;;  %v635_v27 = vmul.f32 %v2551_v43, %v2428_v4 }
  0xd5   : > { %1320 = vperm.xlu2 %2067, %v2352_v18   ;;  %1316 = vperm.xlu1 %2066, %v2340_v16   ;;  %v686_v14 = vsub.f32 1.0, %v2582_v58  ;;  %v2608_v36 = vmul.f32 %v2543_v57, %v2385_v44  ;;  %v826_v54 = vmul.f32 %v2553_v60, %v2423_v0  ;;  %v827_v19 = vmul.f32 %v2553_v60, %v2428_v4 }
  0xd6   : > { %v612_v50 = vmul.f32 %v610_v41, %v608_v26  ;;  %v613_v53 = vmul.f32 %v611_v35, %v609_v23  ;;  %v638_v51 = vsub.f32 1.0, %v634_v42  ;;  %v639_v11 = vsub.f32 1.0, %v635_v27 }
  0xd7   : > { %v687_v34 = vsub.f32 1.0, %v2595_v25  ;;  %v2617_v43 = vmul.f32 %v2543_v57, %v2388_v45  ;;  %v2621_v55 = vmul.f32 %v2558_v5, %v2385_v44  ;;  %v2625_v47 = vmul.f32 %v2558_v5, %v2388_v45 }
  0xd8   : > { %v614_v60 = vrot.slane %v612_v50, 6  ;;  %v615_v52 = vrot.slane %v613_v53, 6  ;;  %v640_v48 = vmul.f32 %v638_v51, %v636_v29  ;;  %v641_v30 = vmul.f32 %v639_v11, %v637_v31 }
  0xd9   : > { %v830_v57 = vsub.f32 1.0, %v826_v54  ;;  %v831_v59 = vsub.f32 1.0, %v827_v19  ;;  %v696_v37 = vmul.f32 %v690_v15, %v2385_v44  ;;  %v697_v49 = vmul.f32 %v690_v15, %v2388_v45  ;;  %v2639_v31 = vpop.permute.xlu0 %1104 }
  0xda   : > { %v616_v17 = vmul.f32 %v614_v60, %v612_v50  ;;  %v617_v13 = vmul.f32 %v615_v52, %v613_v53  ;;  %v642_v5 = vrot.slane %v640_v48, 4  ;;  %v643_v22 = vrot.slane %v641_v30, 4 }
  0xdb   : > { %v2631_v61 = vpop.permute.xlu1 %721  ;;  %v700_v62 = vsub.f32 1.0, %v696_v37  ;;  %v701_v63 = vsub.f32 1.0, %v697_v49  ;;  %v824_v29 = vmul.f32 %v818_v33, %v2385_v44  ;;  %v825_v32 = vmul.f32 %v818_v33, %v2388_v45 }
  0xdc   : > { %v618_v26 = vrot.slane %v616_v17, 7  ;;  %v619_v15 = vrot.slane %v617_v13, 7  ;;  %v644_v23 = vmul.f32 %v642_v5, %v640_v48  ;;  %v645_v41 = vmul.f32 %v643_v22, %v641_v30 }
  0xdd   : > { %v2635_v56 = vpop.permute.xlu2 %853  ;;  %2069 = vset.pattern.permute.xlu2 %v2173_v8  ;;  %2068 = vset.pattern.permute.xlu1 %v3159_v6  ;;  %v704_v35 = vmul.f32 %v702_v1, %v700_v62  ;;  %v705_v42 = vmul.f32 %v703_v28, %v701_v63  ;;  %v828_v27 = vsub.f32 1.0, %v824_v29  ;;  %v829_v54 = vsub.f32 1.0, %v825_v32 }
  0xde   : > { %1380 = vperm.xlu2 %2069, %v2340_v16   ;;  %1352 = vperm.xlu1 %2068, %v2352_v18   ;;  %v620_v19 = vmul.f32 %v618_v26, %v616_v17  ;;  %v621_v33 = vmul.f32 %v619_v15, %v617_v13  ;;  %v646_v50 = vrot.slane %v644_v23, 6  ;;  %v647_v53 = vrot.slane %v645_v41, 6 }
  0xdf   : > { %v706_v51 = vrot.slane %v704_v35, 4  ;;  %v707_v11 = vrot.slane %v705_v42, 4  ;;  %v832_v60 = vmul.f32 %v830_v57, %v828_v27  ;;  %v833_v52 = vmul.f32 %v831_v59, %v829_v54 }
  0xe0   : > { %v918_v37 = vrot.slane %v620_v19, 1  ;;  %v919_v49 = vrot.slane %v621_v33, 1  ;;  %v648_v48 = vmul.f32 %v646_v50, %v644_v23  ;;  %v649_v30 = vmul.f32 %v647_v53, %v645_v41 }
  0xe1   : > { %v708_v5 = vmul.f32 %v706_v51, %v704_v35  ;;  %v709_v22 = vmul.f32 %v707_v11, %v705_v42  ;;  %v834_v6 = vrot.slane %v832_v60, 4  ;;  %v835_v7 = vrot.slane %v833_v52, 4  ;;  %v2666_v27 = vpop.permute.xlu0 %1348 }
  0xe2   : > { %v2649_v28 = vsel %vm982_vm6, %v2589_v20, %v918_v37  ;;  %v2653_v17 = vsel %vm982_vm6, %v2593_v38, %v919_v49  ;;  %v650_v57 = vrot.slane %v648_v48, 7  ;;  %v651_v59 = vrot.slane %v649_v30, 7 }
  0xe3   : > { %v730_v13 = vmul.f32 %v2547_v39, %v2423_v0  ;;  %v731_v62 = vmul.f32 %v2547_v39, %v2428_v4  ;;  %v710_v63 = vrot.slane %v708_v5, 6  ;;  %v711_v29 = vrot.slane %v709_v22, 6 }
  0xe4   : > { %v2645_v1 = vpop.permute.xlu1 %757  ;;  %v652_v26 = vmul.f32 %v650_v57, %v648_v48  ;;  %v653_v15 = vmul.f32 %v651_v59, %v649_v30  ;;  %v836_v20 = vmul.f32 %v834_v6, %v832_v60  ;;  %v837_v23 = vmul.f32 %v835_v7, %v833_v52 }
  0xe5   : > { %v924_v38 = vrot.slane %v686_v14, 7  ;;  %v925_v41 = vrot.slane %v687_v34, 7  ;;  %v712_v35 = vmul.f32 %v710_v63, %v708_v5  ;;  %v713_v42 = vmul.f32 %v711_v29, %v709_v22 }
  0xe6   : > { %v2659_v32 = vpop.permute.xlu2 %1014  ;;  %2071 = vset.pattern.permute.xlu2 %v2175_v10  ;;  %2070 = vset.pattern.permute.xlu1 %v2173_v8  ;;  %v654_v39 = vsub.f32 1.0, %v652_v26  ;;  %v655_v54 = vsub.f32 1.0, %v653_v15  ;;  %v838_v19 = vrot.slane %v836_v20, 6  ;;  %v839_v33 = vrot.slane %v837_v23, 6 }
  0xe7   : > { %1412 = vperm.xlu2 %2071, %v2340_v16   ;;  %1384 = vperm.xlu1 %2070, %v2352_v18   ;;  %v734_v6 = vsub.f32 1.0, %v730_v13  ;;  %v735_v7 = vsub.f32 1.0, %v731_v62  ;;  %v714_v10 = vrot.slane %v712_v35, 7  ;;  %v715_v58 = vrot.slane %v713_v42, 7 }
  0xe8   : > { %v985_v25 = vsel %vm964_vm0, %v654_v39, %v924_v38  ;;  %v986_v14 = vsel %vm964_vm0, %v655_v54, %v925_v41  ;;  %v840_v34 = vmul.f32 %v838_v19, %v836_v20  ;;  %v841_v50 = vmul.f32 %v839_v33, %v837_v23 }
  0xe9   : > { %v716_v53 = vmul.f32 %v714_v10, %v712_v35  ;;  %v717_v8 = vmul.f32 %v715_v58, %v713_v42  ;;  %v728_v51 = vmul.f32 %v2631_v61, %v2385_v44  ;;  %v729_v11 = vmul.f32 %v2631_v61, %v2388_v45 }
  0xea   : > { %v764_v30 = vsub.f32 1.0, %v2608_v36  ;;  %v765_v5 = vsub.f32 1.0, %v2617_v43  ;;  %v842_v22 = vrot.slane %v840_v34, 7  ;;  %v843_v57 = vrot.slane %v841_v50, 7  ;;  %v2679_v29 = vpop.permute.xlu0 %1416 }
  0xeb   : > { %v718_v52 = vsub.f32 1.0, %v716_v53  ;;  %v719_v37 = vsub.f32 1.0, %v717_v8  ;;  %v732_v49 = vsub.f32 1.0, %v728_v51  ;;  %v733_v48 = vsub.f32 1.0, %v729_v11 }
  0xec   : > { %v796_v61 = vsub.f32 1.0, %v2621_v55  ;;  %v797_v15 = vsub.f32 1.0, %v2625_v47  ;;  %v2684_v20 = vsub.f32 1.0, %v2649_v28  ;;  %v2687_v36 = vsub.f32 1.0, %v2653_v17 }
  0xed   : > { %v790_v60 = vpop.permute.xlu1 %789  ;;  %v930_v59 = vrot.slane %v718_v52, 6  ;;  %v931_v13 = vrot.slane %v719_v37, 6  ;;  %v736_v62 = vmul.f32 %v734_v6, %v732_v49  ;;  %v737_v63 = vmul.f32 %v735_v7, %v733_v48 }
  0xee   : > { %v2699_v47 = vmul.f32 %v842_v22, %v840_v34  ;;  %v2701_v41 = vmul.f32 %v843_v57, %v841_v50  ;;  %v858_v35 = vmul.f32 %v2635_v56, %v2423_v0  ;;  %v762_v54 = vmul.f32 %v2645_v1, %v2423_v0 }
  0xef   : > { %v1071_v26 = vpop.permute.xlu2 %1070  ;;  %2075 = vset.pattern.permute.xlu2 %v2176_v12  ;;  %2074 = vset.pattern.permute.xlu1 %v2176_v12  ;;  %v2692_v43 = vsel %vm967_vm1, %v985_v25, %v930_v59  ;;  %v2695_v23 = vsel %vm967_vm1, %v986_v14, %v931_v13  ;;  %v738_v38 = vrot.slane %v736_v62, 4  ;;  %v739_v55 = vrot.slane %v737_v63, 4 }
  0xf0   : > { %1448 = vperm.xlu2 %2075, %v2352_v18   ;;  %1444 = vperm.xlu1 %2074, %v2340_v16   ;;  %v859_v12 = vmul.f32 %v2635_v56, %v2428_v4  ;;  %v763_v18 = vmul.f32 %v2645_v1, %v2428_v4  ;;  %v794_v16 = vmul.f32 %v790_v60, %v2423_v0  ;;  %v766_v10 = vsub.f32 1.0, %v762_v54 }
  0xf1   : > { %v740_v42 = vmul.f32 %v738_v38, %v736_v62  ;;  %v741_v39 = vmul.f32 %v739_v55, %v737_v63  ;;  %v795_v19 = vmul.f32 %v790_v60, %v2428_v4  ;;  %v2714_v33 = vmul.f32 %v1071_v26, %v2684_v20 }
  0xf2   : > { %v2717_v6 = vmul.f32 %v1071_v26, %v2687_v36  ;;  %v767_v58 = vsub.f32 1.0, %v763_v18  ;;  %v862_v14 = vsub.f32 1.0, %v858_v35  ;;  %v863_v34 = vsub.f32 1.0, %v859_v12 }
  0xf3   : > { %v742_v7 = vrot.slane %v740_v42, 6  ;;  %v743_v56 = vrot.slane %v741_v39, 6  ;;  %v798_v50 = vsub.f32 1.0, %v794_v16  ;;  %v799_v53 = vsub.f32 1.0, %v795_v19  ;;  %v2721_v57 = vpop.permute.xlu0 %1256 }
  0xf4   : > { %v768_v0 = vmul.f32 %v766_v10, %v764_v30  ;;  %v769_v51 = vmul.f32 %v767_v58, %v765_v5 }
  0xf5   : > { %v744_v1 = vmul.f32 %v742_v7, %v740_v42  ;;  %v745_v8 = vmul.f32 %v743_v56, %v741_v39  ;;  %v800_v4 = vmul.f32 %v798_v50, %v796_v61  ;;  %v801_v11 = vmul.f32 %v799_v53, %v797_v15 }
  0xf6   : > { %v850_v25 = vpop.permute.xlu1 %849  ;;  %v770_v48 = vrot.slane %v768_v0, 4  ;;  %v771_v22 = vrot.slane %v769_v51, 4 }
  0xf7   : > { %v856_v60 = vmul.f32 %v850_v25, %v2385_v44  ;;  %v857_v52 = vmul.f32 %v850_v25, %v2388_v45  ;;  %v746_v37 = vrot.slane %v744_v1, 7  ;;  %v747_v49 = vrot.slane %v745_v8, 7  ;;  %v2099_v44 = vld [vmem:[%s3154_s5 + $0x8] sm:$0xff]  ;;  %v2100_v45 = vld [vmem:[%s3154_s5] sm:$0xff] }
  0xf8   : > { %2077 = vset.pattern.permute.xlu2 %v2174_v9  ;;  %2076 = vset.pattern.permute.xlu1 %v2174_v9  ;;  %v1101_v59 = vpop.permute.xlu2 %1100  ;;  %v802_v13 = vrot.slane %v800_v4, 4  ;;  %v803_v30 = vrot.slane %v801_v11, 4  ;;  %v772_v61 = vmul.f32 %v770_v48, %v768_v0  ;;  %v773_v15 = vmul.f32 %v771_v22, %v769_v51 }
  0xf9   : > { %v860_v5 = vsub.f32 1.0, %v856_v60  ;;  %v861_v62 = vsub.f32 1.0, %v857_v52  ;;  %1480 = vperm.xlu2 %2077, %v2099_v44   ;;  %1476 = vperm.xlu1 %2076, %v2100_v45   ;;  %v748_v63 = vmul.f32 %v746_v37, %v744_v1  ;;  %v749_v26 = vmul.f32 %v747_v49, %v745_v8 }
  0xfa   : > { %v804_v9 = vmul.f32 %v802_v13, %v800_v4  ;;  %v805_v38 = vmul.f32 %v803_v30, %v801_v11  ;;  %v774_v39 = vrot.slane %v772_v61, 6  ;;  %v775_v54 = vrot.slane %v773_v15, 6 }
  0xfb   : > { %v864_v55 = vmul.f32 %v862_v14, %v860_v5  ;;  %v865_v35 = vmul.f32 %v863_v34, %v861_v62  ;;  %v750_v12 = vsub.f32 1.0, %v748_v63  ;;  %v751_v42 = vsub.f32 1.0, %v749_v26 }
  0xfc   : > { %v806_v18 = vrot.slane %v804_v9, 6  ;;  %v807_v16 = vrot.slane %v805_v38, 6  ;;  %v776_v25 = vmul.f32 %v774_v39, %v772_v61  ;;  %v777_v50 = vmul.f32 %v775_v54, %v773_v15 }
  0xfd   : > { %v866_v19 = vrot.slane %v864_v55, 4  ;;  %v867_v7 = vrot.slane %v865_v35, 4  ;;  %v936_v10 = vrot.slane %v750_v12, 5  ;;  %v937_v58 = vrot.slane %v751_v42, 5 }
  0xfe   : > { %v808_v53 = vmul.f32 %v806_v18, %v804_v9  ;;  %v809_v1 = vmul.f32 %v807_v16, %v805_v38  ;;  %v778_v51 = vrot.slane %v776_v25, 7  ;;  %v779_v4 = vrot.slane %v777_v50, 7 }
  0xff   : > { %v1010_v56 = vpop.permute.xlu1 %1009  ;;  %v868_v8 = vmul.f32 %v866_v19, %v864_v55  ;;  %v869_v0 = vmul.f32 %v867_v7, %v865_v35  ;;  %v989_v14 = vsel %vm970_vm2, %v2692_v43, %v936_v10  ;;  %v990_v34 = vsel %vm970_vm2, %v2695_v23, %v937_v58  ;;  %v2745_v23 = vpop.permute.xlu0 %1626 }
 0x100   : > { %v810_v60 = vrot.slane %v808_v53, 7  ;;  %v811_v52 = vrot.slane %v809_v1, 7  ;;  %v780_v48 = vmul.f32 %v778_v51, %v776_v25  ;;  %v781_v22 = vmul.f32 %v779_v4, %v777_v50 }
 0x101   : > { %v2735_v11 = vpop.permute.xlu2 %1134  ;;  %v870_v37 = vrot.slane %v868_v8, 6  ;;  %v871_v49 = vrot.slane %v869_v0, 6  ;;  %2080 = vset.pattern.permute.xlu2 %v2170_v3  ;;  %2079 = vset.pattern.permute.xlu1 %v2170_v3  ;;  %v2740_v13 = vmul.f32 %v1101_v59, %v2684_v20  ;;  %v2743_v43 = vmul.f32 %v1101_v59, %v2687_v36 }
 0x102   : > { %1654 = vperm.xlu2 %2080, %v2440_v21   ;;  %v812_v30 = vmul.f32 %v810_v60, %v808_v53  ;;  %v813_v5 = vmul.f32 %v811_v52, %v809_v1  ;;  %1631 = vperm.xlu1 %2079, %v2393_v46   ;;  %v846_v45 = vsub.f32 1.0, %v2699_v47  ;;  %v847_v63 = vsub.f32 1.0, %v2701_v41 }
 0x103   : > { %v872_v62 = vmul.f32 %v870_v37, %v868_v8  ;;  %v873_v44 = vmul.f32 %v871_v49, %v869_v0  ;;  %v782_v26 = vsub.f32 1.0, %v780_v48  ;;  %v783_v61 = vsub.f32 1.0, %v781_v22  ;;  %v2764_v0 = vld [vmem:[%s3155_s6] sm:$0xff] }
 0x104   : > { %v814_v15 = vsub.f32 1.0, %v812_v30  ;;  %v815_v9 = vsub.f32 1.0, %v813_v5  ;;  %v1017_v21 = vmul.f32 %v1010_v56, %v2684_v20  ;;  %v1018_v12 = vmul.f32 %v1010_v56, %v2687_v36 }
 0x105   : > { %v874_v59 = vrot.slane %v872_v62, 7  ;;  %v875_v38 = vrot.slane %v873_v44, 7  ;;  %v942_v55 = vrot.slane %v782_v26, 4  ;;  %v943_v35 = vrot.slane %v783_v61, 4 }
 0x106   : > { %v948_v39 = vrot.slane %v814_v15, 3  ;;  %v949_v54 = vrot.slane %v815_v9, 3  ;;  %v954_v47 = vrot.slane %v846_v45, 2  ;;  %v955_v16 = vrot.slane %v847_v63, 2 }
 0x107   : > { %v876_v46 = vmul.f32 %v874_v59, %v872_v62  ;;  %v877_v18 = vmul.f32 %v875_v38, %v873_v44  ;;  %v991_v41 = vsel %vm973_vm3, %v989_v14, %v942_v55  ;;  %v992_v19 = vsel %vm973_vm3, %v990_v34, %v943_v35  ;;  %v1041_v14 = vpop.permute.xlu0 %1040 }
 0x108   : > { %v1045_v42 = vpop.permute.xlu1 %1044  ;;  %v993_v7 = vsel %vm976_vm4, %v991_v41, %v948_v39  ;;  %v994_v10 = vsel %vm976_vm4, %v992_v19, %v949_v54  ;;  %v1111_v52 = vsub.f32 1.0, %v2740_v13  ;;  %v1112_v37 = vsub.f32 1.0, %v2743_v43 }
 0x109   : > { %v878_v58 = vsub.f32 1.0, %v876_v46  ;;  %v879_v25 = vsub.f32 1.0, %v877_v18  ;;  %v995_v56 = vsel %vm979_vm5, %v993_v7, %v954_v47  ;;  %v996_v53 = vsel %vm979_vm5, %v994_v10, %v955_v16 }
 0x10a   : > { %v1165_v50 = vpop.permute.xlu2 %1164  ;;  %2081 = vset.pattern.permute.xlu2 %v2169_v2  ;;  %1659 = vperm.xlu1 %2079, %v2478_v24   ;;  %v1021_v49 = vsub.f32 1.0, %v1017_v21  ;;  %v1022_v48 = vsub.f32 1.0, %v1018_v12  ;;  %v1047_v22 = vmul.f32 %v1041_v14, %v2684_v20  ;;  %v1048_v30 = vmul.f32 %v1041_v14, %v2687_v36 }
 0x10b   : > { %v960_v1 = vrot.slane %v878_v58, 1  ;;  %v961_v8 = vrot.slane %v879_v25, 1  ;;  %1683 = vperm.xlu2 %2081, %v2764_v0   ;;  %v2819_v7 = vmul.f32 %v2584_v40, %v2684_v20  ;;  %v2823_v10 = vmul.f32 %v2584_v40, %v2687_v36 }
 0x10c   : > { %v1051_v55 = vsub.f32 1.0, %v1047_v22  ;;  %v1081_v14 = vsub.f32 1.0, %v2714_v33 }
 0x10d   : > { %v2768_v34 = vsel %vm982_vm6, %v995_v56, %v960_v1  ;;  %v2771_v51 = vsel %vm982_vm6, %v996_v53, %v961_v8 }
 0x10e   : > { %v2774_v4 = vsub.f32 1.0, %v2768_v34  ;;  %v2777_v60 = vsub.f32 1.0, %v2771_v51 }
 0x110   : > { %v1109_v62 = vmul.f32 %v2639_v31, %v2774_v4  ;;  %v1110_v44 = vmul.f32 %v2639_v31, %v2777_v60  ;;  %v1019_v45 = vmul.f32 %v2659_v32, %v2774_v4  ;;  %v1020_v13 = vmul.f32 %v2659_v32, %v2777_v60 }
 0x111   : > { %v1075_v5 = vpop.permute.xlu1 %1074  ;;  %v2793_v43 = vmul.f32 %v2735_v11, %v2774_v4  ;;  %v2797_v63 = vmul.f32 %v2735_v11, %v2777_v60  ;;  %v1049_v26 = vmul.f32 %v1045_v42, %v2774_v4  ;;  %v1050_v61 = vmul.f32 %v1045_v42, %v2777_v60  ;;  %v2808_v42 = vld [vmem:[%s3156_s7] sm:$0xff] }
 0x112   : > { %v1113_v15 = vsub.f32 1.0, %v1109_v62  ;;  %v1114_v31 = vsub.f32 1.0, %v1110_v44  ;;  %v1023_v9 = vsub.f32 1.0, %v1019_v45  ;;  %v1024_v59 = vsub.f32 1.0, %v1020_v13  ;;  %2082 = vset.pattern.permute.xlu1 %v2169_v2 }
 0x113   : > { %v1052_v32 = vsub.f32 1.0, %v1048_v30  ;;  %v1053_v35 = vsub.f32 1.0, %v1049_v26  ;;  %v1054_v21 = vsub.f32 1.0, %v1050_v61  ;;  %1713 = vperm.xlu2 %2081, %v2478_v24   ;;  %1709 = vperm.xlu1 %2082, %v2808_v42   ;;  %v2812_v47 = vmul.f32 %v1165_v50, %v2774_v4 }
 0x114   : > { %v2801_v38 = vpop.permute.xlu2 %1220  ;;  %v1115_v11 = vmul.f32 %v1113_v15, %v1111_v52  ;;  %v1116_v12 = vmul.f32 %v1114_v31, %v1112_v37  ;;  %v1025_v39 = vmul.f32 %v1023_v9, %v1021_v49  ;;  %v1026_v54 = vmul.f32 %v1024_v59, %v1022_v48 }
 0x115   : > { %v1055_v46 = vmul.f32 %v1053_v35, %v1051_v55  ;;  %v1056_v18 = vmul.f32 %v1054_v21, %v1052_v32  ;;  %v2815_v2 = vmul.f32 %v1165_v50, %v2777_v60  ;;  %v1079_v50 = vmul.f32 %v1075_v5, %v2774_v4 }
 0x116   : > { %v1027_v24 = vrot.slane %v1025_v39, 4  ;;  %v1028_v16 = vrot.slane %v1026_v54, 4  ;;  %v1080_v8 = vmul.f32 %v1075_v5, %v2777_v60  ;;  %v1082_v52 = vsub.f32 1.0, %v2717_v6  ;;  %v2836_v6 = vld [vmem:[%s3155_s6 + $0x8] sm:$0xff] }
 0x117   : > { %v1057_v41 = vrot.slane %v1055_v46, 4  ;;  %v1058_v19 = vrot.slane %v1056_v18, 4  ;;  %v1083_v40 = vsub.f32 1.0, %v1079_v50  ;;  %v3165_v62 = vmov 2  }
 0x118   : > { %v1029_v58 = vmul.f32 %v1027_v24, %v1025_v39  ;;  %v1030_v25 = vmul.f32 %v1028_v16, %v1026_v54  ;;  %v1084_v30 = vsub.f32 1.0, %v1080_v8  ;;  %v1117_v45 = vrot.slane %v1115_v11, 4 }
 0x119   : > { %v1059_v53 = vmul.f32 %v1057_v41, %v1055_v46  ;;  %v1060_v1 = vmul.f32 %v1058_v19, %v1056_v18  ;;  %v1118_v13 = vrot.slane %v1116_v12, 4  ;;  %v1085_v33 = vmul.f32 %v1083_v40, %v1081_v14 }
 0x11a   : > { %v2825_v56 = vpop.permute.xlu1 %1130  ;;  %v1031_v37 = vrot.slane %v1029_v58, 6  ;;  %v1032_v49 = vrot.slane %v1030_v25, 6  ;;  %v1086_v31 = vmul.f32 %v1084_v30, %v1082_v52  ;;  %v1261_v55 = vmul.f32 %v2721_v57, %v2768_v34 }
 0x11b   : > { %v1061_v48 = vrot.slane %v1059_v53, 6  ;;  %v1062_v22 = vrot.slane %v1060_v1, 6  ;;  %2084 = vset.pattern.permute.xlu2 %v3165_v62  ;;  %2083 = vset.pattern.permute.xlu1 %v3165_v62  ;;  %v1262_v32 = vmul.f32 %v2721_v57, %v2771_v51  ;;  %v1087_v39 = vrot.slane %v1085_v33, 4 }
 0x11c   : > { %v1033_v26 = vmul.f32 %v1031_v37, %v1029_v58  ;;  %v1034_v61 = vmul.f32 %v1032_v49, %v1030_v25  ;;  %1741 = vperm.xlu2 %2084, %v2836_v6   ;;  %1737 = vperm.xlu1 %2083, %v2764_v0   ;;  %v1088_v54 = vrot.slane %v1086_v31, 4  ;;  %v1119_v46 = vmul.f32 %v1117_v45, %v1115_v11 }
 0x11d   : > { %v1252_v44 = vpop.permute.xlu2 %1251  ;;  %v1063_v5 = vmul.f32 %v1061_v48, %v1059_v53  ;;  %v1064_v15 = vmul.f32 %v1062_v22, %v1060_v1  ;;  %v1120_v18 = vmul.f32 %v1118_v13, %v1116_v12  ;;  %v1143_v24 = vsub.f32 1.0, %v2793_v43 }
 0x11e   : > { %v1035_v9 = vrot.slane %v1033_v26, 7  ;;  %v1036_v59 = vrot.slane %v1034_v61, 7  ;;  %v1144_v16 = vsub.f32 1.0, %v2797_v63  ;;  %v1089_v58 = vmul.f32 %v1087_v39, %v1085_v33 }
 0x11f   : > { %v1065_v35 = vrot.slane %v1063_v5, 7  ;;  %v1066_v21 = vrot.slane %v1064_v15, 7  ;;  %v1090_v25 = vmul.f32 %v1088_v54, %v1086_v31  ;;  %v2848_v57 = vmul.f32 %v2801_v38, %v2684_v20 }
 0x120   : > { %v1037_v1 = vmul.f32 %v1035_v9, %v1033_v26  ;;  %v1038_v50 = vmul.f32 %v1036_v59, %v1034_v61  ;;  %v2852_v8 = vmul.f32 %v2801_v38, %v2687_v36  ;;  %v1091_v43 = vrot.slane %v1089_v58, 6  ;;  %v2104_v26 = vld [vmem:[%s3156_s7 + $0x8] sm:$0xff] }
 0x121   : > { %v1067_v41 = vmul.f32 %v1065_v35, %v1063_v5  ;;  %v1068_v19 = vmul.f32 %v1066_v21, %v1064_v15  ;;  %v1092_v14 = vrot.slane %v1090_v25, 6  ;;  %v1121_v63 = vrot.slane %v1119_v46, 6 }
 0x122   : > { %v1122_v52 = vrot.slane %v1120_v18, 6  ;;  %v1173_v37 = vsub.f32 1.0, %v2812_v47  ;;  %v1174_v49 = vsub.f32 1.0, %v2815_v2  ;;  %v1093_v30 = vmul.f32 %v1091_v43, %v1089_v58 }
 0x123   : > { %v1161_v53 = vpop.permute.xlu1 %1160  ;;  %v1509_v11 = vrot.slane %v1067_v41, 7  ;;  %v1510_v12 = vrot.slane %v1068_v19, 7  ;;  %v1094_v62 = vmul.f32 %v1092_v14, %v1090_v25  ;;  %v3166_v38 = vmov 3  }
 0x124   : > { %2086 = vset.pattern.permute.xlu2 %v3166_v38  ;;  %v1137_v45 = vmul.f32 %v2825_v56, %v2684_v20  ;;  %v1138_v13 = vmul.f32 %v2825_v56, %v2687_v36  ;;  %v1259_v47 = vmul.f32 %v1252_v44, %v2649_v28  ;;  %v1260_v2 = vmul.f32 %v1252_v44, %v2653_v17 }
 0x125   : > { %v1591_v22 = vsel %vm964_vm0, %v1037_v1, %v1509_v11  ;;  %v1592_v40 = vsel %vm964_vm0, %v1038_v50, %v1510_v12  ;;  %1767 = vperm.xlu1 %2083, %v2104_v26   ;;  %v1095_v61 = vrot.slane %v1093_v30, 7  ;;  %v1096_v5 = vrot.slane %v1094_v62, 7  ;;  %1791 = vperm.xlu2 %2086, %v2764_v0  }
 0x126   : > { %v2856_v48 = vpop.permute.xlu2 %1288  ;;  %v1265_v15 = vsub.f32 1.0, %v1261_v55  ;;  %v1266_v33 = vsub.f32 1.0, %v1262_v32  ;;  %v1141_v31 = vsub.f32 1.0, %v1137_v45  ;;  %v1142_v9 = vsub.f32 1.0, %v1138_v13 }
 0x127   : > { %v1263_v59 = vsub.f32 1.0, %v1259_v47  ;;  %v1264_v35 = vsub.f32 1.0, %v1260_v2  ;;  %v1123_v56 = vmul.f32 %v1121_v63, %v1119_v46  ;;  %v1124_v21 = vmul.f32 %v1122_v52, %v1120_v18 }
 0x128   : > { %v1097_v39 = vmul.f32 %v1095_v61, %v1093_v30  ;;  %v1098_v54 = vmul.f32 %v1096_v5, %v1094_v62  ;;  %v1145_v44 = vmul.f32 %v1143_v24, %v1141_v31  ;;  %v1146_v41 = vmul.f32 %v1144_v16, %v1142_v9 }
 0x129   : > { %v1267_v19 = vmul.f32 %v1265_v15, %v1263_v59  ;;  %v1268_v58 = vmul.f32 %v1266_v33, %v1264_v35  ;;  %v1167_v55 = vmul.f32 %v1161_v53, %v2684_v20  ;;  %v1168_v32 = vmul.f32 %v1161_v53, %v2687_v36 }
 0x12a   : > { %v1515_v1 = vrot.slane %v1097_v39, 6  ;;  %v1516_v50 = vrot.slane %v1098_v54, 6  ;;  %v1147_v0 = vrot.slane %v1145_v44, 4  ;;  %v1148_v11 = vrot.slane %v1146_v41, 4 }
 0x12b   : > { %v1269_v12 = vrot.slane %v1267_v19, 4  ;;  %v1270_v43 = vrot.slane %v1268_v58, 4  ;;  %v1171_v24 = vsub.f32 1.0, %v1167_v55  ;;  %v1172_v16 = vsub.f32 1.0, %v1168_v32 }
 0x12c   : > { %v1195_v25 = vpop.permute.xlu1 %1194  ;;  %v2874_v46 = vsel %vm967_vm1, %v1591_v22, %v1515_v1  ;;  %v2877_v18 = vsel %vm967_vm1, %v1592_v40, %v1516_v50  ;;  %v1149_v14 = vmul.f32 %v1147_v0, %v1145_v44  ;;  %v1150_v63 = vmul.f32 %v1148_v11, %v1146_v41 }
 0x12d   : > { %v1271_v52 = vmul.f32 %v1269_v12, %v1267_v19  ;;  %v1272_v30 = vmul.f32 %v1270_v43, %v1268_v58  ;;  %2087 = vset.pattern.permute.xlu1 %v3166_v38  ;;  %v1125_v36 = vrot.slane %v1123_v56, 7  ;;  %v1126_v53 = vrot.slane %v1124_v21, 7  ;;  %1817 = vperm.xlu2 %2086, %v2808_v42   ;;  %v1623_v43 = vld [vmem:[%s3157_s8] sm:$0xf] }
 0x12e   : > { %v1175_v62 = vmul.f32 %v1173_v37, %v1171_v24  ;;  %v1176_v45 = vmul.f32 %v1174_v49, %v1172_v16  ;;  %v1151_v22 = vrot.slane %v1149_v14, 6  ;;  %v1152_v13 = vrot.slane %v1150_v63, 6  ;;  %1795 = vperm.xlu1 %2087, %v2836_v6  }
 0x12f   : > { %v2880_v20 = vpop.permute.xlu2 %1320  ;;  %v1273_v40 = vrot.slane %v1271_v52, 6  ;;  %v1274_v47 = vrot.slane %v1272_v30, 6  ;;  %v1201_v2 = vsub.f32 1.0, %v2819_v7  ;;  %v1202_v26 = vsub.f32 1.0, %v2823_v10 }
 0x130   : > { %v1177_v61 = vrot.slane %v1175_v62, 4  ;;  %v1178_v38 = vrot.slane %v1176_v45, 4  ;;  %v2888_v5 = vmul.f32 %v2666_v27, %v2649_v28  ;;  %v2892_v37 = vmul.f32 %v2666_v27, %v2653_v17 }
 0x131   : > { %v1153_v42 = vmul.f32 %v1151_v22, %v1149_v14  ;;  %v1154_v49 = vmul.f32 %v1152_v13, %v1150_v63  ;;  %v1199_v6 = vmul.f32 %v1195_v25, %v2774_v4  ;;  %v1200_v7 = vmul.f32 %v1195_v25, %v2777_v60 }
 0x132   : > { %v1179_v15 = vmul.f32 %v1177_v61, %v1175_v62  ;;  %v1180_v33 = vmul.f32 %v1178_v38, %v1176_v45  ;;  %v2896_v10 = vmul.f32 %v1125_v36, %v1123_v56  ;;  %v2898_v9 = vmul.f32 %v1126_v53, %v1124_v21 }
 0x133   : > { %v1275_v59 = vmul.f32 %v1273_v40, %v1271_v52  ;;  %v1276_v35 = vmul.f32 %v1274_v47, %v1272_v30  ;;  %v1203_v44 = vsub.f32 1.0, %v1199_v6  ;;  %v1204_v27 = vsub.f32 1.0, %v1200_v7 }
 0x134   : > { %v1181_v39 = vrot.slane %v1179_v15, 6  ;;  %v1182_v54 = vrot.slane %v1180_v33, 6  ;;  %v1359_v41 = vsub.f32 1.0, %v2888_v5  ;;  %v1360_v19 = vsub.f32 1.0, %v2892_v37 }
 0x135   : > { %v1225_v31 = vpop.permute.xlu1 %1224  ;;  %v2904_v58 = vmul.f32 %v2679_v29, %v2768_v34  ;;  %v2908_v56 = vmul.f32 %v2679_v29, %v2771_v51  ;;  %v1155_v21 = vrot.slane %v1153_v42, 7  ;;  %v1156_v25 = vrot.slane %v1154_v49, 7 }
 0x136   : > { %v1205_v1 = vmul.f32 %v1203_v44, %v1201_v2  ;;  %v1206_v50 = vmul.f32 %v1204_v27, %v1202_v26  ;;  %v1521_v32 = vrot.slane %v2896_v10, 5  ;;  %v1522_v0 = vrot.slane %v2898_v9, 5  ;;  %2089 = vset.pattern.permute.xlu1 %v2170_v3 }
 0x137   : > { %v1277_v11 = vrot.slane %v1275_v59, 7  ;;  %v1278_v12 = vrot.slane %v1276_v35, 7  ;;  %v1183_v24 = vmul.f32 %v1181_v39, %v1179_v15  ;;  %v1184_v29 = vmul.f32 %v1182_v54, %v1180_v33  ;;  %1870 = vperm.xlu1 %2089, %v1623_v43  }
 0x138   : > { %v1381_v55 = vpop.permute.xlu2 %1380  ;;  %v1293_v16 = vmul.f32 %v2856_v48, %v2768_v34  ;;  %v1294_v14 = vmul.f32 %v2856_v48, %v2771_v51  ;;  %v1207_v63 = vrot.slane %v1205_v1, 4  ;;  %v1208_v52 = vrot.slane %v1206_v50, 4 }
 0x139   : > { %v1229_v30 = vmul.f32 %v1225_v31, %v2774_v4  ;;  %v1230_v36 = vmul.f32 %v1225_v31, %v2777_v60  ;;  %v1231_v3 = vsub.f32 1.0, %v2848_v57  ;;  %v1232_v53 = vsub.f32 1.0, %v2852_v8 }
 0x13a   : > { %v2924_v62 = vmul.f32 %v1155_v21, %v1153_v42  ;;  %v2926_v45 = vmul.f32 %v1156_v25, %v1154_v49  ;;  %v2928_v22 = vmul.f32 %v1277_v11, %v1275_v59  ;;  %v2930_v13 = vmul.f32 %v1278_v12, %v1276_v35 }
 0x13b   : > { %v1233_v48 = vsub.f32 1.0, %v1229_v30  ;;  %v1234_v40 = vsub.f32 1.0, %v1230_v36  ;;  %v1185_v47 = vrot.slane %v1183_v24, 7  ;;  %v1186_v2 = vrot.slane %v1184_v29, 7 }
 0x13c   : > { %v1297_v26 = vsub.f32 1.0, %v1293_v16  ;;  %v1298_v4 = vsub.f32 1.0, %v1294_v14  ;;  %v1209_v60 = vmul.f32 %v1207_v63, %v1205_v1  ;;  %v1210_v38 = vmul.f32 %v1208_v52, %v1206_v50 }
 0x13d   : > { %v1235_v57 = vmul.f32 %v1233_v48, %v1231_v3  ;;  %v1236_v15 = vmul.f32 %v1234_v40, %v1232_v53  ;;  %v1325_v8 = vmul.f32 %v2880_v20, %v2768_v34  ;;  %v1326_v42 = vmul.f32 %v2880_v20, %v2771_v51 }
 0x13e   : > { %v1285_v61 = vpop.permute.xlu1 %1284  ;;  %v1281_v31 = vsub.f32 1.0, %v2928_v22  ;;  %v1282_v59 = vsub.f32 1.0, %v2930_v13  ;;  %v2942_v35 = vmul.f32 %v1185_v47, %v1183_v24  ;;  %v2944_v39 = vmul.f32 %v1186_v2, %v1184_v29 }
 0x13f   : > { %v1291_v49 = vmul.f32 %v1285_v61, %v2649_v28  ;;  %v1292_v33 = vmul.f32 %v1285_v61, %v2653_v17  ;;  %v1211_v20 = vrot.slane %v1209_v60, 6  ;;  %v1212_v21 = vrot.slane %v1210_v38, 6 }
 0x140   : > { %v1329_v50 = vsub.f32 1.0, %v1325_v8  ;;  %v1330_v11 = vsub.f32 1.0, %v1326_v42  ;;  %v1237_v16 = vrot.slane %v1235_v57, 4  ;;  %v1238_v14 = vrot.slane %v1236_v15, 4 }
 0x141   : > { %v1295_v54 = vsub.f32 1.0, %v1291_v49  ;;  %v1296_v44 = vsub.f32 1.0, %v1292_v33  ;;  %v1413_v27 = vpop.permute.xlu2 %1412  ;;  %v2949_v29 = vmul.f32 %v1381_v55, %v2649_v28  ;;  %v2952_v52 = vmul.f32 %v1381_v55, %v2653_v17 }
 0x142   : > { %v1419_v25 = vmul.f32 %v1413_v27, %v2649_v28  ;;  %v1420_v1 = vmul.f32 %v1413_v27, %v2653_v17  ;;  %v1213_v3 = vmul.f32 %v1211_v20, %v1209_v60  ;;  %v1214_v53 = vmul.f32 %v1212_v21, %v1210_v38 }
 0x143   : > { %v1299_v12 = vmul.f32 %v1297_v26, %v1295_v54  ;;  %v1300_v43 = vmul.f32 %v1298_v4, %v1296_v44  ;;  %v1425_v48 = vsub.f32 1.0, %v2904_v58  ;;  %v1426_v40 = vsub.f32 1.0, %v2908_v56 }
 0x144   : > { %v1423_v63 = vsub.f32 1.0, %v1419_v25  ;;  %v1424_v24 = vsub.f32 1.0, %v1420_v1  ;;  %v1239_v8 = vmul.f32 %v1237_v16, %v1235_v57  ;;  %v1240_v42 = vmul.f32 %v1238_v14, %v1236_v15 }
 0x145   : > { %v1301_v30 = vrot.slane %v1299_v12, 4  ;;  %v1302_v36 = vrot.slane %v1300_v43, 4  ;;  %v1215_v56 = vrot.slane %v1213_v3, 7  ;;  %v1216_v27 = vrot.slane %v1214_v53, 7 }
 0x146   : > { %v1427_v49 = vmul.f32 %v1425_v48, %v1423_v63  ;;  %v1428_v55 = vmul.f32 %v1426_v40, %v1424_v24  ;;  %v1242_v57 = vrot.slane %v1240_v42, 6  ;;  %v1391_v15 = vsub.f32 1.0, %v2949_v29 }
 0x147   : > { %v1317_v47 = vpop.permute.xlu1 %1316  ;;  %v1303_v2 = vmul.f32 %v1301_v30, %v1299_v12  ;;  %v1304_v26 = vmul.f32 %v1302_v36, %v1300_v43  ;;  %v1241_v43 = vrot.slane %v1239_v8, 6  ;;  %v1392_v16 = vsub.f32 1.0, %v2952_v52 }
 0x148   : > { %v1323_v4 = vmul.f32 %v1317_v47, %v2649_v28  ;;  %v1324_v61 = vmul.f32 %v1317_v47, %v2653_v17  ;;  %v2962_v36 = vmul.f32 %v1215_v56, %v1213_v3  ;;  %v2964_v48 = vmul.f32 %v1216_v27, %v1214_v53 }
 0x149   : > { %v1305_v33 = vrot.slane %v1303_v2, 6  ;;  %v1306_v54 = vrot.slane %v1304_v26, 6  ;;  %v1429_v40 = vrot.slane %v1427_v49, 4  ;;  %v1430_v47 = vrot.slane %v1428_v55, 4 }
 0x14a   : > { %v1327_v44 = vsub.f32 1.0, %v1323_v4  ;;  %v1328_v60 = vsub.f32 1.0, %v1324_v61  ;;  %v1449_v20 = vpop.permute.xlu2 %1448  ;;  %v1243_v61 = vmul.f32 %v1241_v43, %v1239_v8 }
 0x14b   : > { %v1307_v21 = vmul.f32 %v1305_v33, %v1303_v2  ;;  %v1308_v25 = vmul.f32 %v1306_v54, %v1304_v26  ;;  %v1244_v33 = vmul.f32 %v1242_v57, %v1240_v42  ;;  %v1431_v56 = vmul.f32 %v1429_v40, %v1427_v49 }
 0x14c   : > { %v1331_v1 = vmul.f32 %v1329_v50, %v1327_v44  ;;  %v1332_v12 = vmul.f32 %v1330_v11, %v1328_v60  ;;  %v1432_v53 = vmul.f32 %v1430_v47, %v1428_v55  ;;  %v1245_v8 = vrot.slane %v1243_v61, 7 }
 0x14d   : > { %v1309_v14 = vrot.slane %v1307_v21, 7  ;;  %v1310_v63 = vrot.slane %v1308_v25, 7  ;;  %v1246_v42 = vrot.slane %v1244_v33, 7  ;;  %v1453_v40 = vmul.f32 %v1449_v20, %v2768_v34 }
 0x14e   : > { %v1333_v24 = vrot.slane %v1331_v1, 4  ;;  %v1334_v30 = vrot.slane %v1332_v12, 4  ;;  %v1454_v47 = vmul.f32 %v1449_v20, %v2771_v51 }
 0x14f   : > { %v1311_v2 = vmul.f32 %v1309_v14, %v1307_v21  ;;  %v1312_v26 = vmul.f32 %v1310_v63, %v1308_v25  ;;  %v1539_v14 = vrot.slane %v2962_v36, 2  ;;  %v1540_v63 = vrot.slane %v2964_v48, 2 }
 0x150   : > { %v1335_v50 = vmul.f32 %v1333_v24, %v1331_v1  ;;  %v1336_v11 = vmul.f32 %v1334_v30, %v1332_v12  ;;  %v1353_v4 = vpop.permute.xlu1 %1352  ;;  %v1434_v30 = vrot.slane %v1432_v53, 6  ;;  %v2984_v22 = vmul.f32 %v1246_v42, %v1244_v33 }
 0x151   : > { %v1357_v54 = vmul.f32 %v1353_v4, %v2768_v34  ;;  %v1358_v44 = vmul.f32 %v1353_v4, %v2771_v51  ;;  %v1313_v60 = vsub.f32 1.0, %v1311_v2  ;;  %v1314_v58 = vsub.f32 1.0, %v1312_v26 }
 0x152   : > { %v1337_v38 = vrot.slane %v1335_v50, 6  ;;  %v1338_v3 = vrot.slane %v1336_v11, 6  ;;  %v1458_v42 = vsub.f32 1.0, %v1454_v47  ;;  %v1546_v52 = vrot.slane %v2984_v22, 1 }
 0x153   : > { %v1361_v27 = vsub.f32 1.0, %v1357_v54  ;;  %v1362_v7 = vsub.f32 1.0, %v1358_v44  ;;  %v1551_v6 = vrot.slane %v1313_v60, 7  ;;  %v1552_v21 = vrot.slane %v1314_v58, 7  ;;  %v2968_v12 = vpop.permute.xlu2 %1480 }
 0x154   : > { %v1339_v25 = vmul.f32 %v1337_v38, %v1335_v50  ;;  %v1340_v1 = vmul.f32 %v1338_v3, %v1336_v11 }
 0x155   : > { %v1363_v43 = vmul.f32 %v1361_v27, %v1359_v41  ;;  %v1364_v57 = vmul.f32 %v1362_v7, %v1360_v19  ;;  %v1605_v49 = vsel %vm964_vm0, %v1281_v31, %v1551_v6  ;;  %v1606_v55 = vsel %vm964_vm0, %v1282_v59, %v1552_v21 }
 0x156   : > { %v1341_v38 = vrot.slane %v1339_v25, 7  ;;  %v1342_v58 = vrot.slane %v1340_v1, 7  ;;  %v1433_v41 = vrot.slane %v1431_v56, 6  ;;  %v2982_v7 = vmul.f32 %v1245_v8, %v1243_v61 }
 0x157   : > { %v1365_v24 = vrot.slane %v1363_v43, 4  ;;  %v1366_v5 = vrot.slane %v1364_v57, 4  ;;  %v1436_v61 = vmul.f32 %v1434_v30, %v1432_v53  ;;  %v1457_v8 = vsub.f32 1.0, %v1453_v40 }
 0x158   : > { %v1343_v37 = vmul.f32 %v1341_v38, %v1339_v25  ;;  %v1344_v19 = vmul.f32 %v1342_v58, %v1340_v1  ;;  %v1435_v54 = vmul.f32 %v1433_v41, %v1431_v56  ;;  %v3168_v30 = vrot.slane %v2926_v45, 4 }
 0x159   : > { %v1367_v6 = vmul.f32 %v1365_v24, %v1363_v43  ;;  %v1368_v13 = vmul.f32 %v1366_v5, %v1364_v57  ;;  %v1385_v2 = vpop.permute.xlu1 %1384  ;;  %v1438_v58 = vrot.slane %v1436_v61, 7  ;;  %v1595_v24 = vsel %vm970_vm2, %v2874_v46, %v1521_v32 }
 0x15a   : > { %v1345_v31 = vsub.f32 1.0, %v1343_v37  ;;  %v1346_v59 = vsub.f32 1.0, %v1344_v19  ;;  %v1389_v11 = vmul.f32 %v1385_v2, %v2768_v34  ;;  %v1390_v4 = vmul.f32 %v1385_v2, %v2771_v51 }
 0x15b   : > { %v1369_v26 = vrot.slane %v1367_v6, 6  ;;  %v1370_v50 = vrot.slane %v1368_v13, 6  ;;  %v1437_v38 = vrot.slane %v1435_v54, 7 }
 0x15c   : > { %v1557_v44 = vrot.slane %v1345_v31, 6  ;;  %v1558_v33 = vrot.slane %v1346_v59, 6  ;;  %v1393_v27 = vsub.f32 1.0, %v1389_v11  ;;  %v1394_v21 = vsub.f32 1.0, %v1390_v4  ;;  %v2990_v25 = vpop.permute.xlu2 %1654 }
 0x15d   : > { %v1371_v60 = vmul.f32 %v1369_v26, %v1367_v6  ;;  %v1372_v3 = vmul.f32 %v1370_v50, %v1368_v13 }
 0x15e   : > { %v1607_v1 = vsel %vm967_vm1, %v1605_v49, %v1557_v44  ;;  %v1608_v20 = vsel %vm967_vm1, %v1606_v55, %v1558_v33  ;;  %v1395_v56 = vmul.f32 %v1393_v27, %v1391_v15  ;;  %v1396_v53 = vmul.f32 %v1394_v21, %v1392_v16 }
 0x15f   : > { %v1373_v43 = vrot.slane %v1371_v60, 7  ;;  %v1374_v57 = vrot.slane %v1372_v3, 7  ;;  %v1596_v49 = vsel %vm970_vm2, %v2877_v18, %v1522_v0  ;;  %v1545_v15 = vrot.slane %v2982_v7, 1 }
 0x160   : > { %v1397_v41 = vrot.slane %v1395_v56, 4  ;;  %v1398_v29 = vrot.slane %v1396_v53, 4  ;;  %v3167_v16 = vrot.slane %v2924_v62, 4  ;;  %v1598_v46 = vsel %vm973_vm3, %v1596_v49, %v3168_v30 }
 0x161   : > { %v1375_v55 = vmul.f32 %v1373_v43, %v1371_v60  ;;  %v1376_v5 = vmul.f32 %v1374_v57, %v1372_v3  ;;  %v3169_v7 = vrot.slane %v2942_v35, 3  ;;  %v3170_v62 = vrot.slane %v2944_v39, 3 }
 0x162   : > { %v1597_v10 = vsel %vm973_vm3, %v1595_v24, %v3167_v16  ;;  %v1399_v37 = vmul.f32 %v1397_v41, %v1395_v56  ;;  %v1400_v18 = vmul.f32 %v1398_v29, %v1396_v53  ;;  %v1445_v0 = vpop.permute.xlu1 %1444  ;;  %v1439_v33 = vmul.f32 %v1437_v38, %v1435_v54 }
 0x163   : > { %v1377_v9 = vsub.f32 1.0, %v1375_v55  ;;  %v1378_v32 = vsub.f32 1.0, %v1376_v5  ;;  %v1451_v19 = vmul.f32 %v1445_v0, %v2649_v28  ;;  %v1452_v6 = vmul.f32 %v1445_v0, %v2653_v17 }
 0x164   : > { %v1599_v22 = vsel %vm976_vm4, %v1597_v10, %v3169_v7  ;;  %v1600_v13 = vsel %vm976_vm4, %v1598_v46, %v3170_v62  ;;  %v1401_v59 = vrot.slane %v1399_v37, 6  ;;  %v1402_v40 = vrot.slane %v1400_v18, 6 }
 0x165   : > { %v1563_v45 = vrot.slane %v1377_v9, 5  ;;  %v1564_v31 = vrot.slane %v1378_v32, 5  ;;  %v1455_v47 = vsub.f32 1.0, %v1451_v19  ;;  %v1456_v2 = vsub.f32 1.0, %v1452_v6  ;;  %v3022_v26 = vpop.permute.xlu2 %1683 }
 0x166   : > { %v1601_v50 = vsel %vm979_vm5, %v1599_v22, %v1539_v14  ;;  %v1602_v35 = vsel %vm979_vm5, %v1600_v13, %v1540_v63  ;;  %v1403_v11 = vmul.f32 %v1401_v59, %v1399_v37  ;;  %v1404_v39 = vmul.f32 %v1402_v40, %v1400_v18 }
 0x167   : > { %v3031_v4 = vsel %vm982_vm6, %v1601_v50, %v1545_v15  ;;  %v3034_v44 = vsel %vm982_vm6, %v1602_v35, %v1546_v52  ;;  %v1440_v60 = vmul.f32 %v1438_v58, %v1436_v61  ;;  %v1459_v3 = vmul.f32 %v1457_v8, %v1455_v47 }
 0x168   : > { %v1460_v27 = vmul.f32 %v1458_v42, %v1456_v2  ;;  %v1405_v21 = vrot.slane %v1403_v11, 7  ;;  %v1406_v36 = vrot.slane %v1404_v39, 7  ;;  %v1609_v14 = vsel %vm970_vm2, %v1607_v1, %v1563_v45 }
 0x169   : > { %v1610_v48 = vsel %vm970_vm2, %v1608_v20, %v1564_v31  ;;  %v1485_v63 = vmul.f32 %v2968_v12, %v2768_v34  ;;  %v1486_v43 = vmul.f32 %v2968_v12, %v2771_v51  ;;  %v1461_v57 = vrot.slane %v1459_v3, 4  ;;  %v1688_v31 = vpop.permute.xlu0 %1687 }
 0x16a   : > { %v1462_v56 = vrot.slane %v1460_v27, 4  ;;  %v1407_v53 = vmul.f32 %v1405_v21, %v1403_v11  ;;  %v1408_v24 = vmul.f32 %v1406_v36, %v1404_v39  ;;  %v1441_v54 = vsub.f32 1.0, %v1439_v33 }
 0x16b   : > { %v1442_v61 = vsub.f32 1.0, %v1440_v60  ;;  %v1463_v8 = vmul.f32 %v1461_v57, %v1459_v3  ;;  %v1477_v38 = vpop.permute.xlu1 %1476  ;;  %v1489_v55 = vsub.f32 1.0, %v1485_v63  ;;  %v1490_v5 = vsub.f32 1.0, %v1486_v43 }
 0x16c   : > { %v1464_v42 = vmul.f32 %v1462_v56, %v1460_v27  ;;  %v1409_v58 = vsub.f32 1.0, %v1407_v53  ;;  %v1410_v49 = vsub.f32 1.0, %v1408_v24  ;;  %v1483_v1 = vmul.f32 %v1477_v38, %v2649_v28 }
 0x16d   : > { %v1484_v20 = vmul.f32 %v1477_v38, %v2653_v17  ;;  %v1465_v41 = vrot.slane %v1463_v8, 6  ;;  %v1575_v10 = vrot.slane %v1441_v54, 3  ;;  %v1576_v30 = vrot.slane %v1442_v61, 3  ;;  %v3044_v32 = vpop.permute.xlu2 %1713 }
 0x16e   : > { %v1466_v29 = vrot.slane %v1464_v42, 6  ;;  %v1569_v12 = vrot.slane %v1409_v58, 4  ;;  %v1570_v15 = vrot.slane %v1410_v49, 4  ;;  %v1487_v52 = vsub.f32 1.0, %v1483_v1 }
 0x16f   : > { %v1488_v16 = vsub.f32 1.0, %v1484_v20  ;;  %v1467_v46 = vmul.f32 %v1465_v41, %v1463_v8  ;;  %v1662_v24 = vmul.f32 %v2990_v25, %v2649_v28  ;;  %v1663_v54 = vmul.f32 %v2990_v25, %v2653_v17 }
 0x170   : > { %v1468_v9 = vmul.f32 %v1466_v29, %v1464_v42  ;;  %v1491_v37 = vmul.f32 %v1489_v55, %v1487_v52  ;;  %v1611_v0 = vsel %vm973_vm3, %v1609_v14, %v1569_v12  ;;  %v1612_v19 = vsel %vm973_vm3, %v1610_v48, %v1570_v15 }
 0x171   : > { %v1492_v18 = vmul.f32 %v1490_v5, %v1488_v16  ;;  %v1469_v6 = vrot.slane %v1467_v46, 7  ;;  %v1613_v22 = vsel %vm976_vm4, %v1611_v0, %v1575_v10  ;;  %v1614_v62 = vsel %vm976_vm4, %v1612_v19, %v1576_v30  ;;  %v3054_v53 = vpop.permute.xlu0 %1763 }
 0x172   : > { %v1470_v7 = vrot.slane %v1468_v9, 7  ;;  %v1493_v13 = vrot.slane %v1491_v37, 4  ;;  %v1690_v5 = vmul.f32 %v3022_v26, %v3031_v4  ;;  %v1691_v41 = vmul.f32 %v3022_v26, %v3034_v44 }
 0x173   : > { %v1494_v45 = vrot.slane %v1492_v18, 4  ;;  %v1471_v59 = vmul.f32 %v1469_v6, %v1467_v46  ;;  %v1634_v25 = vmul.f32 %v2745_v23, %v3031_v4  ;;  %v1635_v29 = vmul.f32 %v2745_v23, %v3034_v44 }
 0x174   : > { %v1472_v40 = vmul.f32 %v1470_v7, %v1468_v9  ;;  %v1495_v47 = vmul.f32 %v1493_v13, %v1491_v37  ;;  %v1632_v11 = vpop.permute.xlu1 %1631  ;;  %v1718_v7 = vmul.f32 %v3044_v32, %v2768_v34 }
 0x175   : > { %v1496_v2 = vmul.f32 %v1494_v45, %v1492_v18  ;;  %v1473_v50 = vsub.f32 1.0, %v1471_v59 }
 0x176   : > { %v1474_v35 = vsub.f32 1.0, %v1472_v40  ;;  %v1497_v39 = vrot.slane %v1495_v47, 6  ;;  %v3050_v27 = vpop.permute.xlu2 %1741 }
 0x177   : > { %v1498_v33 = vrot.slane %v1496_v2, 6  ;;  %v1581_v60 = vrot.slane %v1473_v50, 2 }
 0x178   : > { %v1582_v3 = vrot.slane %v1474_v35, 2  ;;  %v1499_v21 = vmul.f32 %v1497_v39, %v1495_v47 }
 0x179   : > { %v1500_v36 = vmul.f32 %v1498_v33, %v1496_v2  ;;  %v1615_v14 = vsel %vm979_vm5, %v1613_v22, %v1581_v60  ;;  %v1719_v22 = vmul.f32 %v3044_v32, %v2771_v51  ;;  %v1822_v59 = vpop.permute.xlu0 %1821 }
 0x17a   : > { %v1616_v48 = vsel %vm979_vm5, %v1614_v62, %v1582_v3  ;;  %v1501_v63 = vrot.slane %v1499_v21, 7  ;;  %v1826_v32 = vmul.f32 %v1822_v59, %v2768_v34 }
 0x17b   : > { %v1502_v43 = vrot.slane %v1500_v36, 7 }
 0x17c   : > { %v1503_v57 = vmul.f32 %v1501_v63, %v1499_v21  ;;  %v1660_v61 = vpop.permute.xlu1 %1659 }
 0x17d   : > { %v1504_v56 = vmul.f32 %v1502_v43, %v1500_v36  ;;  %v1664_v38 = vmul.f32 %v1660_v61, %v2768_v34  ;;  %v1665_v58 = vmul.f32 %v1660_v61, %v2771_v51  ;;  %v1827_v36 = vmul.f32 %v1822_v59, %v2771_v51 }
 0x17e   : > { %v1505_v8 = vsub.f32 1.0, %v1503_v57 }
 0x17f   : > { %v1506_v42 = vsub.f32 1.0, %v1504_v56  ;;  %v1666_v20 = vadd.f32 %v1664_v38, %v1662_v24  ;;  %v1667_v55 = vadd.f32 %v1665_v58, %v1663_v54  ;;  %v3070_v12 = vpop.permute.xlu2 %1791 }
 0x180   : > { %v1587_v49 = vrot.slane %v1505_v8, 1 }
 0x181   : > { %v1588_v1 = vrot.slane %v1506_v42, 1  ;;  %v1668_v16 = vrot.slane %v1666_v20, 4  ;;  %v1669_v10 = vrot.slane %v1667_v55, 4 }
 0x182   : > { %v3073_v15 = vsel %vm982_vm6, %v1615_v14, %v1587_v49 }
 0x183   : > { %v3076_v52 = vsel %vm982_vm6, %v1616_v48, %v1588_v1  ;;  %v1636_v30 = vmul.f32 %v1632_v11, %v3073_v15  ;;  %v1692_v46 = vmul.f32 %v1688_v31, %v3073_v15  ;;  %v1670_v37 = vadd.f32 %v1668_v16, %v1666_v20 }
 0x184   : > { %v1637_v26 = vmul.f32 %v1632_v11, %v3076_v52  ;;  %v1693_v9 = vmul.f32 %v1688_v31, %v3076_v52  ;;  %v1671_v23 = vadd.f32 %v1669_v10, %v1667_v55  ;;  %v1746_v20 = vmul.f32 %v3050_v27, %v3073_v15 }
 0x185   : > { %v1638_v18 = vadd.f32 %v1636_v30, %v1634_v25  ;;  %v1694_v19 = vadd.f32 %v1692_v46, %v1690_v5  ;;  %v1672_v62 = vrot.slane %v1670_v37, 6  ;;  %v1710_v45 = vpop.permute.xlu1 %1709  ;;  %v1747_v55 = vmul.f32 %v3050_v27, %v3076_v52 }
 0x186   : > { %v1639_v0 = vadd.f32 %v1637_v26, %v1635_v29  ;;  %v1695_v6 = vadd.f32 %v1693_v9, %v1691_v41  ;;  %v1673_v13 = vrot.slane %v1671_v23, 6  ;;  %v1716_v11 = vmul.f32 %v1710_v45, %v2649_v28 }
 0x187   : > { %v1640_v40 = vrot.slane %v1638_v18, 4  ;;  %v1696_v2 = vrot.slane %v1694_v19, 4  ;;  %v1674_v50 = vadd.f32 %v1672_v62, %v1670_v37  ;;  %v1717_v39 = vmul.f32 %v1710_v45, %v2653_v17  ;;  %v1818_v63 = vpop.permute.xlu2 %1817 }
 0x188   : > { %v1641_v47 = vrot.slane %v1639_v0, 4  ;;  %v1697_v31 = vrot.slane %v1695_v6, 4  ;;  %v1675_v35 = vadd.f32 %v1673_v13, %v1671_v23  ;;  %v1720_v14 = vadd.f32 %v1718_v7, %v1716_v11 }
 0x189   : > { %v1642_v33 = vadd.f32 %v1640_v40, %v1638_v18  ;;  %v1698_v3 = vadd.f32 %v1696_v2, %v1694_v19  ;;  %v1721_v48 = vadd.f32 %v1719_v22, %v1717_v39  ;;  %v1676_v56 = vrot.slane %v1674_v50, 7 }
 0x18a   : > { %v1643_v60 = vadd.f32 %v1641_v47, %v1639_v0  ;;  %v1699_v21 = vadd.f32 %v1697_v31, %v1695_v6  ;;  %v1677_v24 = vrot.slane %v1675_v35, 7  ;;  %v1722_v8 = vrot.slane %v1720_v14, 4 }
 0x18b   : > { %v1644_v43 = vrot.slane %v1642_v33, 6  ;;  %v1700_v54 = vrot.slane %v1698_v3, 6  ;;  %v1723_v42 = vrot.slane %v1721_v48, 4  ;;  %v1824_v49 = vmul.f32 %v1818_v63, %v2649_v28 }
 0x18c   : > { %v1645_v57 = vrot.slane %v1643_v60, 6  ;;  %v1701_v61 = vrot.slane %v1699_v21, 6  ;;  %v1825_v1 = vmul.f32 %v1818_v63, %v2653_v17  ;;  %v1724_v5 = vadd.f32 %v1722_v8, %v1720_v14 }
 0x18d   : > { %v1646_v38 = vadd.f32 %v1644_v43, %v1642_v33  ;;  %v1725_v41 = vadd.f32 %v1723_v42, %v1721_v48  ;;  %v1828_v16 = vadd.f32 %v1826_v32, %v1824_v49  ;;  %v1678_v30 = vadd.f32 %v1676_v56, %v1674_v50 }
 0x18e   : > { %v1647_v58 = vadd.f32 %v1645_v57, %v1643_v60  ;;  %v1829_v10 = vadd.f32 %v1827_v36, %v1825_v1  ;;  %v1679_v26 = vadd.f32 %v1677_v24, %v1675_v35  ;;  %v1726_v46 = vrot.slane %v1724_v5, 6  ;;  %v1738_v37 = vpop.permute.xlu1 %1737 }
 0x18f   : > { %v1648_v25 = vrot.slane %v1646_v38, 7  ;;  %v1727_v9 = vrot.slane %v1725_v41, 6  ;;  %v1702_v0 = vadd.f32 %v1700_v54, %v1698_v3  ;;  %v1703_v19 = vadd.f32 %v1701_v61, %v1699_v21 }
 0x190   : > { %v1649_v29 = vrot.slane %v1647_v58, 7  ;;  %v1728_v6 = vadd.f32 %v1726_v46, %v1724_v5  ;;  %v1744_v22 = vmul.f32 %v1738_v37, %v3031_v4  ;;  %v1745_v27 = vmul.f32 %v1738_v37, %v3034_v44 }
 0x191   : > { %v1650_v23 = vadd.f32 %v1648_v25, %v1646_v38  ;;  %v1729_v7 = vadd.f32 %v1727_v9, %v1725_v41  ;;  %v1704_v2 = vrot.slane %v1702_v0, 7  ;;  %v1705_v31 = vrot.slane %v1703_v19, 7 }
 0x192   : > { %v1651_v18 = vadd.f32 %v1649_v29, %v1647_v58  ;;  %v1730_v45 = vrot.slane %v1728_v6, 7  ;;  %v1748_v40 = vadd.f32 %v1746_v20, %v1744_v22  ;;  %v1749_v47 = vadd.f32 %v1747_v55, %v1745_v27 }
 0x193   : > { %v1680_v62 = vadd.f32 %v1678_v30, %v1650_v23  ;;  %v1731_v59 = vrot.slane %v1729_v7, 7  ;;  %v1706_v21 = vadd.f32 %v1704_v2, %v1702_v0  ;;  %v1707_v32 = vadd.f32 %v1705_v31, %v1703_v19 }
 0x194   : > { %v1681_v13 = vadd.f32 %v1679_v26, %v1651_v18  ;;  %v1732_v50 = vadd.f32 %v1730_v45, %v1728_v6  ;;  %v1750_v11 = vrot.slane %v1748_v40, 4  ;;  %v1751_v39 = vrot.slane %v1749_v47, 4 }
 0x195   : > { %v1733_v35 = vadd.f32 %v1731_v59, %v1729_v7  ;;  %v1770_v36 = vmul.f32 %v3054_v53, %v2649_v28  ;;  %v1771_v14 = vmul.f32 %v3054_v53, %v2653_v17  ;;  %v1830_v8 = vrot.slane %v1828_v16, 4 }
 0x196   : > { %v1752_v33 = vadd.f32 %v1750_v11, %v1748_v40  ;;  %v1753_v60 = vadd.f32 %v1751_v39, %v1749_v47  ;;  %v1734_v56 = vadd.f32 %v1732_v50, %v1706_v21  ;;  %v1831_v42 = vrot.slane %v1829_v10, 4 }
 0x197   : > { %v1768_v3 = vpop.permute.xlu1 %1767  ;;  %v1735_v24 = vadd.f32 %v1733_v35, %v1707_v32  ;;  %v1832_v55 = vadd.f32 %v1830_v8, %v1828_v16  ;;  %v1798_v29 = vmul.f32 %v3070_v12, %v3031_v4  ;;  %v1799_v30 = vmul.f32 %v3070_v12, %v3034_v44 }
 0x198   : > { %v1772_v48 = vmul.f32 %v1768_v3, %v2768_v34  ;;  %v1773_v63 = vmul.f32 %v1768_v3, %v2771_v51  ;;  %v1754_v43 = vrot.slane %v1752_v33, 6  ;;  %v1755_v57 = vrot.slane %v1753_v60, 6 }
 0x199   : > { %v1846_v38 = vrot.slane %v1734_v56, 7  ;;  %v1847_v58 = vrot.slane %v1735_v24, 7  ;;  %v1833_v5 = vadd.f32 %v1831_v42, %v1829_v10  ;;  %v1834_v19 = vrot.slane %v1832_v55, 6 }
 0x19a   : > { %v1774_v54 = vadd.f32 %v1772_v48, %v1770_v36  ;;  %v1775_v61 = vadd.f32 %v1773_v63, %v1771_v14  ;;  %v1756_v28 = vadd.f32 %v1754_v43, %v1752_v33  ;;  %v1757_v20 = vadd.f32 %v1755_v57, %v1753_v60 }
 0x19b   : > { %v1862_v17 = vsel %vm964_vm0, %v1680_v62, %v1846_v38  ;;  %v1863_v34 = vsel %vm964_vm0, %v1681_v13, %v1847_v58  ;;  %v1835_v16 = vrot.slane %v1833_v5, 6  ;;  %v1836_v45 = vadd.f32 %v1834_v19, %v1832_v55 }
 0x19c   : > { %v1776_v49 = vrot.slane %v1774_v54, 4  ;;  %v1777_v1 = vrot.slane %v1775_v61, 4  ;;  %v1758_v26 = vrot.slane %v1756_v28, 7  ;;  %v1759_v46 = vrot.slane %v1757_v20, 7 }
 0x19d   : > { %v1837_v59 = vadd.f32 %v1835_v16, %v1833_v5  ;;  %v1838_v11 = vrot.slane %v1836_v45, 7 }
 0x19e   : > { %v1778_v53 = vadd.f32 %v1776_v49, %v1774_v54  ;;  %v1779_v51 = vadd.f32 %v1777_v1, %v1775_v61  ;;  %v1760_v27 = vadd.f32 %v1758_v26, %v1756_v28  ;;  %v1761_v4 = vadd.f32 %v1759_v46, %v1757_v20 }
 0x19f   : > { %v1839_v39 = vrot.slane %v1837_v59, 7  ;;  %v1840_v63 = vadd.f32 %v1838_v11, %v1836_v45 }
 0x1a0   : > { %v1780_v41 = vrot.slane %v1778_v53, 6  ;;  %v1781_v25 = vrot.slane %v1779_v51, 6  ;;  %v1796_v9 = vpop.permute.xlu1 %1795 }
 0x1a1   : > { %v1800_v18 = vmul.f32 %v1796_v9, %v3073_v15  ;;  %v1801_v0 = vmul.f32 %v1796_v9, %v3076_v52  ;;  %v1841_v43 = vadd.f32 %v1839_v39, %v1837_v59 }
 0x1a2   : > { %v1782_v37 = vadd.f32 %v1780_v41, %v1778_v53  ;;  %v1783_v23 = vadd.f32 %v1781_v25, %v1779_v51 }
 0x1a3   : > { %v1802_v7 = vadd.f32 %v1800_v18, %v1798_v29  ;;  %v1803_v22 = vadd.f32 %v1801_v0, %v1799_v30 }
 0x1a4   : > { %v1784_v10 = vrot.slane %v1782_v37, 7  ;;  %v1785_v6 = vrot.slane %v1783_v23, 7 }
 0x1a5   : > { %v1804_v44 = vrot.slane %v1802_v7, 4  ;;  %v1805_v12 = vrot.slane %v1803_v22, 4 }
 0x1a6   : > { %v1786_v62 = vadd.f32 %v1784_v10, %v1782_v37  ;;  %v1787_v13 = vadd.f32 %v1785_v6, %v1783_v23 }
 0x1a7   : > { %v1806_v40 = vadd.f32 %v1804_v44, %v1802_v7  ;;  %v1807_v47 = vadd.f32 %v1805_v12, %v1803_v22 }
 0x1a8   : > { %v1788_v15 = vadd.f32 %v1786_v62, %v1760_v27  ;;  %v1789_v2 = vadd.f32 %v1787_v13, %v1761_v4 }
 0x1a9   : > { %v1808_v52 = vrot.slane %v1806_v40, 6  ;;  %v1809_v31 = vrot.slane %v1807_v47, 6  ;;  %v1871_v24 = vpop.permute.xlu1 %1870 }
 0x1aa   : > { %v1852_v50 = vrot.slane %v1788_v15, 6  ;;  %v1853_v35 = vrot.slane %v1789_v2, 6 }
 0x1ab   : > { %v1810_v33 = vadd.f32 %v1808_v52, %v1806_v40  ;;  %v1811_v60 = vadd.f32 %v1809_v31, %v1807_v47 }
 0x1ac   : > { %v1864_v3 = vsel %vm967_vm1, %v1862_v17, %v1852_v50  ;;  %v1865_v21 = vsel %vm967_vm1, %v1863_v34, %v1853_v35 }
 0x1ad   : > { %v1812_v32 = vrot.slane %v1810_v33, 7  ;;  %v1813_v36 = vrot.slane %v1811_v60, 7 }
 0x1af   : > { %v1814_v14 = vadd.f32 %v1812_v32, %v1810_v33  ;;  %v1815_v48 = vadd.f32 %v1813_v36, %v1811_v60 }
 0x1b1   : > { %v1842_v57 = vadd.f32 %v1840_v63, %v1814_v14  ;;  %v1843_v56 = vadd.f32 %v1841_v43, %v1815_v48 }
 0x1b3   : > { %v1858_v54 = vrot.slane %v1842_v57, 5  ;;  %v1859_v61 = vrot.slane %v1843_v56, 5 }
 0x1b5   : > { %v1866_v8 = vsel %vm970_vm2, %v1864_v3, %v1858_v54  ;;  %v1867_v42 = vsel %vm970_vm2, %v1865_v21, %v1859_v61 }
 0x1b6   : > { %v1874_v38 = vadd.f32 %v1871_v24, %v1867_v42  ;;  %v1873_v58 = vadd.f32 %v1871_v24, %v1866_v8 }
 0x1b8   : > { %v1877_v49 = vrot.slane %v1874_v38, 4 }
 0x1ba   : > { %v1878_v1 = vsel %vm973_vm3, %v1873_v58, %v1877_v49 }
 0x1bb   : > { %1880 = vst [vmem:[%s326_s26] sm:$0xff] %v1878_v1 }
 0x1bc   : > { %2132 = shalt.err (!%p2129_p3)
}
 0x1bd   : > { %1972 = dma.vmem_to_hbm [thread:$0]  (%p2265_p5), %s1896_s27, 128, %s1898_s28, %s1882_s13  }
 0x1be PF: > { %p1978_p4 = scmp.ge.s32.totalorder %s2167_s12, 2  ;;  %s1909_s17 = sand.u32 1, %s2155_s30  }
 0x1bf   : > { %s1910_s25 = scalar_lea.sflag [#allocation3], %s1909_s17 }
 0x1c0   : > { %p1975_p7 = pnand %p1978_p4, %p2269_p6 }
 0x1c2   : > { %p1976_p8 = pneg %p1975_p7 }
 0x1c4   : > { %2150 = dma.done.wait (%p1976_p8), %s1910_s25, 128  }
 0x1c5   : > { %2152 = vsyncadd (%p1976_p8), %s1910_s25, 4294967168  ;;  %p19_p9 = scmp.ge.s32.totalorder %s2252_s15, 4   ;;  %s3171_s30 = smov %s2159_s10 }
 0x1c6   : > { %s3172_s10 = smov %s2163_s11  ;;  %s3173_s11 = smov %s2263_s18 }
 0x1c7   : > { %s3174_s12 = smov %s2252_s15  ;;  %21 = sbr.rel (!%p19_p9) target bundleno = 3 (0x3), region = 91 }
 0x1cc   :  { %1916 = vsyncpa [#allocation3], 1 }
 0x1cd   :  { %1918 = vsyncpa [#allocation3 + $0x1], 1 }

</bundles_post_ra>
